<compile_context>
chip_gen: v6e
topology: v6e:2x2x1
jax: 0.10.0
libtpu: 0.0.40
codegen_flags: <defaults>
</compile_context>

<pallas_src>
import functools
import math

import jax
import jax.numpy as jnp
from jax.experimental import pallas as pl
from jax.experimental.pallas import tpu as pltpu


def _gelu_tanh(x):
    # GELU(approximate='tanh'):
    # 0.5 * x * (1 + tanh(sqrt(2/pi) * (x + 0.044715 * x^3)))
    c = math.sqrt(2.0 / math.pi)
    return 0.5 * x * (1.0 + jnp.tanh(c * (x + 0.044715 * x * x * x)))


def _cdiv(a, b):
    return -(-a // b)


def _round_up(a, b):
    return _cdiv(a, b) * b


def _itemsize(a):
    return jnp.dtype(a.dtype).itemsize


def _vmem_capacity_bytes():
    """Physical VMEM per TensorCore (64 MiB v7x, 128 MiB v5e/v6e)."""
    try:
        info = pltpu.get_tpu_info()
        for attr in ("vmem_capacity_bytes", "vmem_bytes"):
            v = getattr(info, attr, None)
            if v:
                return int(v)
    except Exception:
        pass
    return 64 * 1024 * 1024  # conservative (v7x) fallback


def _pick_tile_m(M, tile_m):
    """Row-tile size: full extent for tiny M, else a multiple of 8 chosen so
    the grid has >= 2 steps (megacore) and stays MXU-friendly for large M."""
    if M <= 8:
        return M
    tm = max(8, (min(tile_m, M) // 8) * 8)
    if _cdiv(M, tm) < 2:
        tm = max(8, _round_up(_cdiv(M, 2), 8))
    return tm


# ---------------------------------------------------------------------------
# Fused kernel: full weights resident in VMEM, grid only over row tiles.
# ---------------------------------------------------------------------------
def _ffn_fused_kernel(x_ref, w1_ref, b1_ref, w2_ref, b2_ref, o_ref):
    xv = x_ref[...].astype(w1_ref.dtype)
    pre = jnp.dot(xv, w1_ref[...], preferred_element_type=jnp.float32)
    act = _gelu_tanh(pre + b1_ref[...].astype(jnp.float32))        # (tm, H)
    out = jnp.dot(act.astype(w2_ref.dtype), w2_ref[...],
                  preferred_element_type=jnp.float32)
    o_ref[...] = (out + b2_ref[...].astype(jnp.float32)).astype(o_ref.dtype)


# ---------------------------------------------------------------------------
# Fallback kernels: tile the hidden dimension (reduction axis, innermost).
# ---------------------------------------------------------------------------
def _ffn_tiled_kernel_f32(x_ref, w1_ref, b1_ref, w2_ref, b2_ref, o_ref):
    # Output is f32: accumulate directly into o_ref (constant block index
    # across h => resident in VMEM), add b2 on the final h step.
    h = pl.program_id(1)

    @pl.when(h == 0)
    def _():
        o_ref[...] = jnp.zeros_like(o_ref)

    xv = x_ref[...].astype(w1_ref.dtype)
    pre = jnp.dot(xv, w1_ref[...], preferred_element_type=jnp.float32)
    act = _gelu_tanh(pre + b1_ref[...].astype(jnp.float32))        # (tm, th)
    o_ref[...] += jnp.dot(act.astype(w2_ref.dtype), w2_ref[...],
                          preferred_element_type=jnp.float32)

    @pl.when(h == pl.num_programs(1) - 1)
    def _():
        o_ref[...] = o_ref[...] + b2_ref[...]


def _ffn_tiled_kernel_acc(x_ref, w1_ref, b1_ref, w2_ref, b2_ref, o_ref, acc_ref):
    # Non-f32 outputs: keep an f32 accumulator scratch, cast once at the end.
    h = pl.program_id(1)

    @pl.when(h == 0)
    def _():
        acc_ref[...] = jnp.zeros_like(acc_ref)

    xv = x_ref[...].astype(w1_ref.dtype)
    pre = jnp.dot(xv, w1_ref[...], preferred_element_type=jnp.float32)
    act = _gelu_tanh(pre + b1_ref[...].astype(jnp.float32))
    acc_ref[...] += jnp.dot(act.astype(w2_ref.dtype), w2_ref[...],
                            preferred_element_type=jnp.float32)

    @pl.when(h == pl.num_programs(1) - 1)
    def _():
        o_ref[...] = (acc_ref[...] + b2_ref[...].astype(jnp.float32)).astype(o_ref.dtype)


def feed_forward(x, w1, b1, w2, b2, *, tile_m=256, tile_h=1024, param_dtype=None):
    """x: [..., D]; w1: [D, H]; b1: [H]; w2: [H, D]; b2: [D].

    param_dtype: optionally cast W1/W2 (e.g. jnp.bfloat16) to halve weight
    DMA while still accumulating in f32.  Default keeps the caller's dtype.
    """
    orig_shape = x.shape
    D = orig_shape[-1]
    H = w1.shape[1]

    if param_dtype is not None:
        w1 = w1.astype(param_dtype)
        w2 = w2.astype(param_dtype)

    x2d = x.reshape(-1, D)
    M = x2d.shape[0]

    tile_m = _pick_tile_m(M, tile_m)
    num_m = _cdiv(M, tile_m)       # ragged last block handled by Pallas masking

    # ---- Generation-aware VMEM budget ------------------------------------
    vmem_cap = _vmem_capacity_bytes()
    vmem_limit = min(int(vmem_cap * 0.75), 100 * 1024 * 1024)   # ~48 MiB v7x, 96 MiB v5e/v6e

    weight_resident = (w1.size * _itemsize(w1) + w2.size * _itemsize(w2)
                       + b1.size * _itemsize(b1) + b2.size * _itemsize(b2))
    io_tiles = 2 * (2 * tile_m * D * _itemsize(x))          # x + out, double-buffered
    intermediate = 2 * tile_m * H * 4                        # (tm, H) f32 pre-act + act
    fused_need = weight_resident + io_tiles + intermediate
    use_fused = fused_need <= int(0.8 * vmem_limit)          # headroom for compiler scratch

    b2_2d = b2.reshape(1, D)

    if use_fused:
        # --- Fused path: weights resident (single-buffered), one pass per row tile.
        b1_2d = b1.reshape(1, H)
        grid_spec = pltpu.PrefetchScalarGridSpec(
            num_scalar_prefetch=0,
            grid=(num_m,),
            in_specs=[
                pl.BlockSpec((tile_m, D), lambda m: (m, 0)),                        # x row tile
                pl.BlockSpec((D, H), lambda m: (0, 0), pipeline_mode=pl.Buffered(1)),  # W1
                pl.BlockSpec((1, H), lambda m: (0, 0), pipeline_mode=pl.Buffered(1)),  # b1
                pl.BlockSpec((H, D), lambda m: (0, 0), pipeline_mode=pl.Buffered(1)),  # W2
                pl.BlockSpec((1, D), lambda m: (0, 0), pipeline_mode=pl.Buffered(1)),  # b2
            ],
            out_specs=pl.BlockSpec((tile_m, D), lambda m: (m, 0)),
        )
        kernel = _ffn_fused_kernel
        dim_sems = ("parallel",)
    else:
        # --- Fallback: tile the hidden dim; H is the (innermost) reduction axis.
        tile_h = max(128, (min(tile_h, H) // 128) * 128)
        if H % tile_h != 0:
            # Zero-pad H: GELU(0 + 0) = 0, and zero rows of W2 contribute nothing.
            H_pad = _round_up(H, tile_h)
            w1 = jnp.pad(w1, ((0, 0), (0, H_pad - H)))
            b1 = jnp.pad(b1, (0, H_pad - H))
            w2 = jnp.pad(w2, ((0, H_pad - H), (0, 0)))
            H = H_pad
        b1_2d = b1.reshape(1, H)

        out_is_f32 = jnp.dtype(x.dtype) == jnp.dtype(jnp.float32)
        grid_spec = pltpu.PrefetchScalarGridSpec(
            num_scalar_prefetch=0,
            grid=(num_m, H // tile_h),
            in_specs=[
                pl.BlockSpec((tile_m, D), lambda m, h: (m, 0)),                     # x row tile
                pl.BlockSpec((D, tile_h), lambda m, h: (0, h),
                             pipeline_mode=pl.Buffered(3)),                         # W1 tile
                pl.BlockSpec((1, tile_h), lambda m, h: (0, h)),                     # b1 tile
                pl.BlockSpec((tile_h, D), lambda m, h: (h, 0),
                             pipeline_mode=pl.Buffered(3)),                         # W2 tile
                pl.BlockSpec((1, D), lambda m, h: (0, 0),
                             pipeline_mode=pl.Buffered(1)),                         # b2
            ],
            out_specs=pl.BlockSpec((tile_m, D), lambda m, h: (m, 0)),
            scratch_shapes=([] if out_is_f32
                            else [pltpu.VMEM((tile_m, D), jnp.float32)]),
        )
        kernel = _ffn_tiled_kernel_f32 if out_is_f32 else _ffn_tiled_kernel_acc
        dim_sems = ("parallel", "arbitrary")

    out = pl.pallas_call(
        kernel,
        out_shape=jax.ShapeDtypeStruct((M, D), x.dtype),
        grid_spec=grid_spec,
        compiler_params=pltpu.CompilerParams(
            dimension_semantics=dim_sems,
            vmem_limit_bytes=vmem_limit,
        ),
    )(x2d, w1, b1_2d, w2, b2_2d)

    return out.reshape(orig_shape)


def _reference(x, w1, b1, w2, b2):
    h = x @ w1 + b1
    h = _gelu_tanh(h)
    return h @ w2 + b2


if __name__ == "__main__":
    # Small synthetic config: vocab_size=256, batch=2, seq=8; hidden=3072 is
    # fixed by the module definition.
    vocab_size = 256
    hidden = 3072
    batch, seq = 2, 8

    key = jax.random.PRNGKey(0)
    kx, kw1, kb1, kw2, kb2 = jax.random.split(key, 5)

    x = jax.random.normal(kx, (batch, seq, vocab_size), dtype=jnp.float32)

    # Deterministic init matching nn.Linear's uniform(-1/sqrt(fan_in), 1/sqrt(fan_in)).
    lim1 = 1.0 / math.sqrt(vocab_size)
    lim2 = 1.0 / math.sqrt(hidden)
    w1 = jax.random.uniform(kw1, (vocab_size, hidden), jnp.float32, -lim1, lim1)
    b1 = jax.random.uniform(kb1, (hidden,), jnp.float32, -lim1, lim1)
    w2 = jax.random.uniform(kw2, (hidden, vocab_size), jnp.float32, -lim2, lim2)
    b2 = jax.random.uniform(kb2, (vocab_size,), jnp.float32, -lim2, lim2)

    ffn = jax.jit(functools.partial(feed_forward))

    # Main case: M = 16 -> tile_m = 8, grid (2,) so both v7x TCs get work.
    out = jax.block_until_ready(ffn(x, w1, b1, w2, b2))
    ref = _reference(x, w1, b1, w2, b2)
    assert out.shape == (batch, seq, vocab_size)
    assert jnp.allclose(out, ref, atol=1e-4, rtol=1e-4)

    # Ragged / tiny-M case: M = 5 -> single full-extent row block, no padding.
    x_small = jax.random.normal(kx, (5, vocab_size), dtype=jnp.float32)
    out_s = jax.block_until_ready(ffn(x_small, w1, b1, w2, b2))
    ref_s = _reference(x_small, w1, b1, w2, b2)
    assert out_s.shape == (5, vocab_size)
    assert jnp.allclose(out_s, ref_s, atol=1e-4, rtol=1e-4)

    # TODO(synk): for production weight-DMA-bound serving, pass
    # param_dtype=jnp.bfloat16 to halve weight HBM traffic (looser tolerance).

    print("KERNEL_OK")
</pallas_src>

<mosaic_0001>
module attributes {stable_mosaic.version = 11 : i64} {
  func.func @_ffn_fused_kernel(%arg0: i32, %arg1: memref<8x256xf32, #tpu.memory_space<vmem>>, %arg2: memref<256x3072xf32, #tpu.memory_space<vmem>>, %arg3: memref<1x3072xf32, #tpu.memory_space<vmem>>, %arg4: memref<3072x256xf32, #tpu.memory_space<vmem>>, %arg5: memref<1x256xf32, #tpu.memory_space<vmem>>, %arg6: memref<8x256xf32, #tpu.memory_space<vmem>>) attributes {dimension_semantics = [#tpu.dimension_semantics<parallel>], iteration_bounds = array<i64: 2>, scalar_prefetch = 0 : i64, scratch_operands = 0 : i64, tpu.core_type = #tpu.core_type<tc>, window_params = [{transform_indices = @transform_0, window_bounds = array<i64: 8, 256>}, {pipeline_mode = #tpu.pipeline_mode<synchronous>, transform_indices = @transform_1, window_bounds = array<i64: 256, 3072>}, {pipeline_mode = #tpu.pipeline_mode<synchronous>, transform_indices = @transform_2, window_bounds = array<i64: 1, 3072>}, {pipeline_mode = #tpu.pipeline_mode<synchronous>, transform_indices = @transform_3, window_bounds = array<i64: 3072, 256>}, {pipeline_mode = #tpu.pipeline_mode<synchronous>, transform_indices = @transform_4, window_bounds = array<i64: 1, 256>}, {transform_indices = @transform_5, window_bounds = array<i64: 8, 256>}]} {
    %c0 = arith.constant 0 : index
    %c0_0 = arith.constant 0 : index
    %0 = vector.load %arg1[%c0, %c0_0] : memref<8x256xf32, #tpu.memory_space<vmem>>, vector<8x256xf32>
    %c0_1 = arith.constant 0 : index
    %c0_2 = arith.constant 0 : index
    %1 = vector.load %arg2[%c0_1, %c0_2] : memref<256x3072xf32, #tpu.memory_space<vmem>>, vector<256x3072xf32>
    %cst = arith.constant dense<0.000000e+00> : vector<8x3072xf32>
    %2 = tpu.matmul %0, %1, %cst {dimension_numbers = #tpu.dot_dimension_numbers<[1], [0], [0], [1], [0, 0, 1, 1], [], []>} : vector<8x256xf32>, vector<256x3072xf32>, vector<8x3072xf32> -> vector<8x3072xf32>
    %c0_3 = arith.constant 0 : index
    %c0_4 = arith.constant 0 : index
    %3 = vector.load %arg3[%c0_3, %c0_4] : memref<1x3072xf32, #tpu.memory_space<vmem>>, vector<1x3072xf32>
    %4 = vector.broadcast %3 : vector<1x3072xf32> to vector<8x3072xf32>
    %5 = arith.addf %2, %4 : vector<8x3072xf32>
    %cst_5 = arith.constant 5.000000e-01 : f32
    %6 = vector.broadcast %cst_5 : f32 to vector<8x3072xf32>
    %7 = arith.mulf %6, %5 : vector<8x3072xf32>
    %cst_6 = arith.constant 4.471500e-02 : f32
    %8 = vector.broadcast %cst_6 : f32 to vector<8x3072xf32>
    %9 = arith.mulf %8, %5 : vector<8x3072xf32>
    %10 = arith.mulf %9, %5 : vector<8x3072xf32>
    %11 = arith.mulf %10, %5 : vector<8x3072xf32>
    %12 = arith.addf %5, %11 : vector<8x3072xf32>
    %cst_7 = arith.constant 0.797884583 : f32
    %13 = vector.broadcast %cst_7 : f32 to vector<8x3072xf32>
    %14 = arith.mulf %13, %12 : vector<8x3072xf32>
    %15 = math.tanh %14 : vector<8x3072xf32>
    %cst_8 = arith.constant 1.000000e+00 : f32
    %16 = vector.broadcast %cst_8 : f32 to vector<8x3072xf32>
    %17 = arith.addf %16, %15 : vector<8x3072xf32>
    %18 = arith.mulf %7, %17 : vector<8x3072xf32>
    %c0_9 = arith.constant 0 : index
    %c0_10 = arith.constant 0 : index
    %19 = vector.load %arg4[%c0_9, %c0_10] : memref<3072x256xf32, #tpu.memory_space<vmem>>, vector<3072x256xf32>
    %cst_11 = arith.constant dense<0.000000e+00> : vector<8x256xf32>
    %20 = tpu.matmul %18, %19, %cst_11 {dimension_numbers = #tpu.dot_dimension_numbers<[1], [0], [0], [1], [0, 0, 1, 1], [], []>} : vector<8x3072xf32>, vector<3072x256xf32>, vector<8x256xf32> -> vector<8x256xf32>
    %c0_12 = arith.constant 0 : index
    %c0_13 = arith.constant 0 : index
    %21 = vector.load %arg5[%c0_12, %c0_13] : memref<1x256xf32, #tpu.memory_space<vmem>>, vector<1x256xf32>
    %22 = vector.broadcast %21 : vector<1x256xf32> to vector<8x256xf32>
    %23 = arith.addf %20, %22 : vector<8x256xf32>
    %c0_14 = arith.constant 0 : index
    %c0_15 = arith.constant 0 : index
    %24 = vector.load %arg6[%c0_14, %c0_15] : memref<8x256xf32, #tpu.memory_space<vmem>>, vector<8x256xf32>
    tpu.vector_store %arg6[%c0_14, %c0_15], %23 {strides = array<i32>} : memref<8x256xf32, #tpu.memory_space<vmem>>, vector<8x256xf32>,
    return
  }
  func.func @transform_0(%arg0: i32) -> (i32, i32) {
    %c0_i32 = arith.constant 0 : i32
    %c0_i32_0 = arith.constant 0 : i32
    return %arg0, %c0_i32 : i32, i32
  }
  func.func @transform_1(%arg0: i32) -> (i32, i32) {
    %c0_i32 = arith.constant 0 : i32
    %c0_i32_0 = arith.constant 0 : i32
    %c0_i32_1 = arith.constant 0 : i32
    return %c0_i32, %c0_i32_0 : i32, i32
  }
  func.func @transform_2(%arg0: i32) -> (i32, i32) {
    %c0_i32 = arith.constant 0 : i32
    %c0_i32_0 = arith.constant 0 : i32
    %c0_i32_1 = arith.constant 0 : i32
    return %c0_i32, %c0_i32_0 : i32, i32
  }
  func.func @transform_3(%arg0: i32) -> (i32, i32) {
    %c0_i32 = arith.constant 0 : i32
    %c0_i32_0 = arith.constant 0 : i32
    %c0_i32_1 = arith.constant 0 : i32
    return %c0_i32, %c0_i32_0 : i32, i32
  }
  func.func @transform_4(%arg0: i32) -> (i32, i32) {
    %c0_i32 = arith.constant 0 : i32
    %c0_i32_0 = arith.constant 0 : i32
    %c0_i32_1 = arith.constant 0 : i32
    return %c0_i32, %c0_i32_0 : i32, i32
  }
  func.func @transform_5(%arg0: i32) -> (i32, i32) {
    %c0_i32 = arith.constant 0 : i32
    %c0_i32_0 = arith.constant 0 : i32
    return %arg0, %c0_i32 : i32, i32
  }
}

</mosaic_0001>

<bundles_post_ra>
// kernel: feed_forward.1
= control target key start
LH: loop header
LB: loop body
LE: loop exit
PB: predicated region body
PF: predicated region fallthrough
CT: control target
= control target key end

     0   :  { %10 = vsyncpa [#allocation3], 0  ;;  %s4953_s0 = inlined_call_operand.hbm [shape: f32[16,256], index: 0, kind: input, shape index: {}]   ;;  %s4954_s1 = inlined_call_operand.hbm [shape: f32[256,3072], index: 1, kind: input, shape index: {}]   ;;  %s4955_s2 = inlined_call_operand.hbm [shape: f32[1,3072], index: 2, kind: input, shape index: {}]   ;;  %s4956_s3 = inlined_call_operand.hbm [shape: f32[3072,256], index: 3, kind: input, shape index: {}]   ;;  %s4957_s4 = inlined_call_operand.hbm [shape: f32[1,256], index: 4, kind: input, shape index: {}]   ;;  %s4958_s5 = inlined_call_operand.hbm [shape: f32[16,256], index: 5, kind: output, shape index: {}]  }
   0x1   :  { %12 = vsyncpa [#allocation3 + $0x1], 0 }
   0x2   :  { %13 = vsyncpa [#allocation6], 0 }
   0x3   :  { %14 = vsyncpa [#allocation9], 0 }
   0x4   :  { %15 = vsyncpa [#allocation4], 0 }
   0x5   :  { %17 = vsyncpa [#allocation4 + $0x1], 0  ;;  %s4432_s18 = smov 0   ;;  %s4434_s19 = smov 0  }
   0x6   :  { %s4436_s20 = smov 0   ;;  %s4438_s21 = smov 0  }
   0x7 LB: > { %s4392_s22 = smov [#allocation5]   ;;  %s4453_s24 = sadd.s32 4294967295, %s4390_s21   ;;  %s4390_s21 = sphi %s4438_s21, %s4982_s21   ;;  %s4386_s20 = sphi %s4436_s20, %s4981_s20   ;;  %s4382_s19 = sphi %s4434_s19, %s4980_s19   ;;  %s4378_s18 = sphi %s4432_s18, %s4979_s18  }
   0x8   : > { %s176_s23 = sshll.u32 %s4392_s22, 4  ;;  %p4017_p0 = scmp.ge.s32.totalorder %s4390_s21, 1  ;;  %s177_s23 = int_to_ptr.vmem [resolvable:$true] %s176_s23 }
   0x9   : > { %p4959_p1 = scmp.eq.s32.totalorder %s4453_s24, 0  ;;  %p164_p2 = scmp.lt.s32.totalorder %s4390_s21, 3 }
   0xa   : > { %s4393_s26 = smov [#allocation8]   ;;  %s4394_s29 = smov [#allocation7]  }
   0xb   : > { %p4458_p3 = pnand %p4017_p0, %p164_p2  ;;  %s200_s27 = sshll.u32 %s4393_s26, 4  ;;  %s4471_s27 = int_to_ptr.vmem [resolvable:$true] %s200_s27 }
   0xc   : > { %s4473_s30 = sshll.u32 %s4394_s29, 4  ;;  %s4197_s6 = scalar_lea.vmem %s177_s23, 98304  ;;  %s191_s30 = int_to_ptr.vmem [resolvable:$true] %s4473_s30 }
   0xd   : > { %s4963_s25 = scalar_select %p4458_p3, 1, 0 }
   0xe   : > { %p4060_p5 = pneg %p4458_p3  ;;  %p4198_p8 = scmp.ne.s32.totalorder %s177_s23, %s4197_s6 }
   0xf   : > { %p4205_p11 = scmp.lt.s32.totalorder %s177_s23, %s177_s23  ;;  %p4206_p12 = scmp.lt.s32.totalorder %s4197_s6, %s4197_s6 }
  0x10   : > { %p4467_p6 = pnand %p4060_p5, %p4959_p1 }
  0x11   : > { %p4207_p13 = por %p4206_p12, %p4205_p11 }
  0x12   : > { %p4188_p7 = pneg %p4467_p6 }
  0x14   : > { %p4200_p9 = pnand %p4198_p8, %p4188_p7 }
  0x16   : > { %p4201_p10 = pneg %p4200_p9 }
  0x18   : > { %p4208_p0 = pnand %p4207_p13, %p4201_p10 }
  0x1a   : > { %4211 = shalt.err (!%p4208_p0)
}
  0x1b   : > { %s4395_s7 = smov 3072   ;;  %s4396_s8 = smov 192  }
  0x1c   : > { %4063 = dma.hbm_to_vmem [thread:$0]  (!%p4467_p6), %s4954_s1, 98304, %s177_s23, [#allocation6], %s4395_s7, %s4395_s7, %s4396_s8  }
  0x1d   : > { %s4223_s11 = scalar_lea.vmem %s4471_s27, 98304  ;;  %p4231_p9 = scmp.lt.s32.totalorder %s4471_s27, %s4471_s27 }
  0x1e   : > { %p4224_p2 = scmp.ne.s32.totalorder %s4471_s27, %s4223_s11  ;;  %p4232_p10 = scmp.lt.s32.totalorder %s4223_s11, %s4223_s11 }
  0x20   : > { %p4226_p5 = pnand %p4224_p2, %p4188_p7  ;;  %p4233_p11 = por %p4232_p10, %p4231_p9 }
  0x22   : > { %p4227_p8 = pneg %p4226_p5 }
  0x24   : > { %p4234_p12 = pnand %p4233_p11, %p4227_p8 }
  0x26   : > { %4237 = shalt.err (!%p4234_p12)
}
  0x27   : > { %s4397_s12 = smov 256   ;;  %s4398_s13 = smov 16  }
  0x28   : > { %4069 = dma.hbm_to_vmem [thread:$0]  (!%p4467_p6), %s4956_s3, 98304, %s4471_s27, [#allocation9], %s4397_s12, %s4397_s12, %s4398_s13  }
  0x29   : > { %s4249_s16 = scalar_lea.vmem %s191_s30, 384  ;;  %p4257_p5 = scmp.lt.s32.totalorder %s191_s30, %s191_s30 }
  0x2a   : > { %p4250_p13 = scmp.ne.s32.totalorder %s191_s30, %s4249_s16  ;;  %p4258_p8 = scmp.lt.s32.totalorder %s4249_s16, %s4249_s16 }
  0x2c   : > { %p4252_p0 = pnand %p4250_p13, %p4188_p7  ;;  %p4259_p9 = por %p4258_p8, %p4257_p5 }
  0x2e   : > { %p4253_p2 = pneg %p4252_p0 }
  0x30   : > { %p4260_p10 = pnand %p4259_p9, %p4253_p2 }
  0x32   : > { %4263 = shalt.err (!%p4260_p10)
}
  0x33   : > { %4066 = dma.hbm_to_vmem [thread:$0]  (!%p4467_p6), %s4955_s2, 384, %s191_s30, [#allocation6]  }
  0x34   : > { %s4399_s23 = smov [#allocation10]  }
  0x35   : > { %s214_s26 = sshll.u32 %s4399_s23, 4  ;;  %s215_s26 = int_to_ptr.vmem [resolvable:$true] %s214_s26 }
  0x36   : > { %s4275_s27 = scalar_lea.vmem %s215_s26, 32  ;;  %p4283_p0 = scmp.lt.s32.totalorder %s215_s26, %s215_s26 }
  0x37   : > { %p4276_p11 = scmp.ne.s32.totalorder %s215_s26, %s4275_s27  ;;  %p4284_p5 = scmp.lt.s32.totalorder %s4275_s27, %s4275_s27 }
  0x39   : > { %p4278_p12 = pnand %p4276_p11, %p4188_p7  ;;  %p4285_p2 = por %p4284_p5, %p4283_p0 }
  0x3b   : > { %p4279_p13 = pneg %p4278_p12 }
  0x3d   : > { %p4286_p8 = pnand %p4285_p2, %p4279_p13 }
  0x3f   : > { %4289 = shalt.err (!%p4286_p8)
}
  0x40   : > { %4072 = dma.hbm_to_vmem [thread:$0]  (!%p4467_p6), %s4957_s4, 32, %s215_s26, [#allocation9]  }
  0x41   : > { %s4016_s30 = sadd.s32 4294967294, %s4390_s21   ;;  %s4517_s28 = sadd.s32 1, %s4390_s21  }
  0x42   : > { %s27_s7 = ssub.s32 %s4390_s21, %s4517_s28  ;;  %s30_s8 = sadd.s32 1, %s4386_s20 }
  0x43   : > { %p28_p7 = scmp.eq.s32.totalorder %s27_s7, 0  ;;  %p37_p9 = scmp.ne.s32.totalorder %s4386_s20, %s4382_s19 }
  0x44   : > { %p38_p10 = scmp.eq.s32.totalorder %s4390_s21, 0  ;;  %p43_p11 = scmp.ne.s32.totalorder %s4382_s19, %s4378_s18 }
  0x45   : > { %s4528_s9 = scalar_select %p28_p7, %s4386_s20, %s30_s8  }
  0x46   : > { %p4530_p12 = por %p38_p10, %p37_p9  ;;  %p4536_p6 = por %p4959_p1, %p43_p11 }
  0x47   : > { %p151_p13 = scmp.eq.s32.totalorder %s4453_s24, 1  ;;  %p157_p0 = scmp.eq.s32.totalorder %s4016_s30, 1 }
  0x48   : > { %s4966_s11 = scalar_select %p4536_p6, 1, 0 }
  0x49   : > { %p4085_p5 = scmp.lt.s32.totalorder %s4390_s21, 2  ;;  %s225_s12 = sand.u32 1, %s4386_s20  }
  0x4a   : > { %p4543_p2 = por %p151_p13, %p37_p9  ;;  %p4547_p8 = por %p157_p0, %p43_p11 }
  0x4b   : > { %s4023_s15 = sshll.u32 %s225_s12, 4  ;;  %s4038_s16 = sshll.u32 %s4390_s21, 8 }
  0x4c   : > { %s4967_s13 = scalar_select %p4543_p2, 1, 0 }
  0x4d   : > { %s4968_s14 = scalar_select %p4547_p8, 1, 0 }
  0x4e   : > { %s4555_s23 = scalar_lea.hbm %s4953_s0, %s4038_s16  ;;  %s229_s26 = scalar_lea.vmem [#allocation2], %s4023_s15 }
  0x4f   : > { %s237_s27 = sshll.u32 %s229_s26, 4  ;;  %p4559_p7 = pnand %p4085_p5, %p4530_p12  ;;  %s238_s27 = int_to_ptr.vmem [resolvable:$true] %s237_s27 }
  0x50   : > { %s226_s6 = scalar_lea.sflag [#allocation3], %s225_s12  ;;  %s4290_s30 = scalar_lea.hbm %s4555_s23, 256 }
  0x51   : > { %p4291_p9 = scmp.ne.s32.totalorder %s4555_s23, %s4290_s30  ;;  %p4292_p10 = pneg %p4559_p7 }
  0x52   : > { %s4295_s16 = scalar_lea.hbm %s4953_s0, 512  ;;  %p4296_p0 = scmp.lt.s32.totalorder %s4555_s23, %s4953_s0 }
  0x53   : > { %p4293_p11 = pnand %p4292_p10, %p4291_p9  ;;  %p4297_p12 = scmp.lt.s32.totalorder %s4295_s16, %s4290_s30 }
  0x55   : > { %p4294_p13 = pneg %p4293_p11  ;;  %p4298_p5 = por %p4297_p12, %p4296_p0 }
  0x57   : > { %p4299_p4 = pnand %p4298_p5, %p4294_p13 }
  0x59   : > { %4302 = shalt.err (!%p4299_p4)
}
  0x5a   : > { %s4303_s10 = scalar_lea.vmem %s238_s27, 256  ;;  %s4400_s12 = smov [#allocation2]  }
  0x5b   : > { %p4304_p1 = scmp.ne.s32.totalorder %s238_s27, %s4303_s10  ;;  %s4308_s22 = sshll.u32 %s4400_s12, 4  ;;  %s4309_s22 = int_to_ptr.vmem [resolvable:$false] %s4308_s22 }
  0x5c   : > { %s4310_s26 = scalar_lea.vmem %s4309_s22, 512  ;;  %p4311_p9 = scmp.lt.s32.totalorder %s238_s27, %s4309_s22 }
  0x5d   : > { %p4306_p8 = pnand %p4304_p1, %p4292_p10  ;;  %p4312_p11 = scmp.lt.s32.totalorder %s4310_s26, %s4303_s10 }
  0x5f   : > { %p4307_p2 = pneg %p4306_p8  ;;  %p4313_p6 = por %p4312_p11, %p4311_p9 }
  0x61   : > { %p4314_p3 = pnand %p4313_p6, %p4307_p2 }
  0x63   : > { %4317 = shalt.err (!%p4314_p3)
}
  0x64   : > { %4076 = dma.hbm_to_vmem [thread:$0]  (!%p4559_p7), %s4555_s23, 256, %s238_s27, %s226_s6  }
  0x65   : > { %p4970_p13 = scmp.ne.s32.totalorder %s4963_s25, 0 }
  0x66   : > { %s4580_s30 = sand.u32 (!%p4970_p13), 1, %s4382_s19   ;;  %p4971_p1 = scmp.ne.s32.totalorder (!%p4970_p13), %s4966_s11, 0 }
  0x67   : > { %246 = sbr.rel (%p4970_p13) target bundleno = 1119 (0x45f), region = 40  ;;  %s4027_s7 = sshll.u32 (!%p4970_p13), %s4580_s30, 4 }
  0x68   : > { %s249_s8 = scalar_lea.sflag (!%p4970_p13), [#allocation3], %s4580_s30  ;;  %s4586_s16 = scalar_lea.vmem (!%p4970_p13), [#allocation2], %s4027_s7 }
  0x6c   : > { %4361 = dma.done.wait (%p4971_p1), %s249_s8, 256  }
  0x6d   : > { %4363 = vsyncadd (%p4971_p1), %s249_s8, 4294967040  ;;  %p4972_p3 = scmp.eq.s32.totalorder %s4453_s24, 0 }
  0x6f   : > { %4365 = dma.done.wait (%p4972_p3), [#allocation6], 98688   ;;  %p4973_p4 = pmov %p4972_p3 }
  0x70   : > { %p4974_p6 = pmov %p4972_p3 }
  0x71   : > { %4367 = vsyncadd (%p4973_p4), [#allocation6], 4294868608 }
  0x72   : > { %4369 = dma.done.wait (%p4974_p6), [#allocation9], 98336   ;;  %p4975_p2 = pmov %p4972_p3 }
  0x73   : > { %v658_v0 = vld [vmem:[#allocation5 + $0xb48] sm:$0xff]  ;;  %v660_v1 = vld [vmem:[#allocation5 + $0xb58] sm:$0xff]  ;;  %v657_v2 = vld [vmem:[#allocation5 + $0xb40] sm:$0xff]  ;;  %s4039_s25 = sshll.u32 %s4453_s24, 8  ;;  %s294_s11 = scalar_lea.vmem [#allocation11], %s4027_s7 }
  0x74   : > { %4371 = vsyncadd (%p4975_p2), [#allocation9], 4294868960  ;;  %1191 = vmatprep.subr.mxu0 %v658_v0  ;;  %1262 = vmatprep.subr.mxu1 %v660_v1  ;;  %v659_v3 = vld [vmem:[#allocation5 + $0xb50] sm:$0xff]  ;;  %v634_v4 = vld [vmem:[#allocation5 + $0xa88] sm:$0xff]  ;;  %s3908_s23 = sshll.u32 %s294_s11, 4  ;;  %s3906_s6 = scalar_lea.hbm %s4958_s5, %s4039_s25  ;;  %s3909_s23 = int_to_ptr.vmem [resolvable:$true] %s3908_s23 }
  0x75   : > { %v636_v5 = vld [vmem:[#allocation5 + $0xa98] sm:$0xff]  ;;  %1192 = vmatpush1.msra.mxu0 %v657_v2  ;;  %1263 = vmatpush1.msra.mxu1 %v659_v3  ;;  %v633_v6 = vld [vmem:[#allocation5 + $0xa80] sm:$0xff]  ;;  %v635_v7 = vld [vmem:[#allocation5 + $0xa90] sm:$0xff]  ;;  %s3894_s15 = scalar_lea.sflag [#allocation4], %s4580_s30  ;;  %s4318_s17 = scalar_lea.vmem %s3909_s23, 256 }
  0x76   : > { %v610_v8 = vld [vmem:[#allocation5 + $0x9c8] sm:$0xff]  ;;  %1193 = vmatprep.subr.mxu0 %v634_v4  ;;  %1264 = vmatprep.subr.mxu1 %v636_v5  ;;  %v612_v9 = vld [vmem:[#allocation5 + $0x9d8] sm:$0xff]  ;;  %v609_v10 = vld [vmem:[#allocation5 + $0x9c0] sm:$0xff]  ;;  %p4319_p8 = scmp.ne.s32.totalorder %s3909_s23, %s4318_s17  ;;  %p4976_p7 = scmp.ne.s32.totalorder %s4967_s13, 0 }
  0x77   : > { %v611_v11 = vld [vmem:[#allocation5 + $0x9d0] sm:$0xff]  ;;  %1194 = vmatpush1.msra.mxu0 %v633_v6  ;;  %1265 = vmatpush1.msra.mxu1 %v635_v7  ;;  %v586_v12 = vld [vmem:[#allocation5 + $0x908] sm:$0xff]  ;;  %v588_v13 = vld [vmem:[#allocation5 + $0x918] sm:$0xff]  ;;  %s4401_s24 = smov [#allocation11]  }
  0x78   : > { %1195 = vmatprep.subr.mxu0 %v610_v8  ;;  %1266 = vmatprep.subr.mxu1 %v612_v9  ;;  %v585_v14 = vld [vmem:[#allocation5 + $0x900] sm:$0xff]  ;;  %v587_v15 = vld [vmem:[#allocation5 + $0x910] sm:$0xff]  ;;  %v562_v16 = vld [vmem:[#allocation5 + $0x848] sm:$0xff]  ;;  %p4320_p10 = pnand %p4319_p8, %p4976_p7  ;;  %s4322_s10 = sshll.u32 %s4401_s24, 4  ;;  %s4323_s10 = int_to_ptr.vmem [resolvable:$false] %s4322_s10 }
  0x79   : > { %1196 = vmatpush1.msra.mxu0 %v609_v10  ;;  %1267 = vmatpush1.msra.mxu1 %v611_v11  ;;  %v564_v17 = vld [vmem:[#allocation5 + $0x858] sm:$0xff]  ;;  %v561_v18 = vld [vmem:[#allocation5 + $0x840] sm:$0xff]  ;;  %v563_v19 = vld [vmem:[#allocation5 + $0x850] sm:$0xff]  ;;  %s4324_s12 = scalar_lea.vmem %s4323_s10, 512  ;;  %p4325_p12 = scmp.lt.s32.totalorder %s3909_s23, %s4323_s10 }
  0x7a   : > { %1197 = vmatprep.subr.mxu0 %v586_v12  ;;  %1268 = vmatprep.subr.mxu1 %v588_v13  ;;  %v538_v20 = vld [vmem:[#allocation5 + $0x788] sm:$0xff]  ;;  %v540_v21 = vld [vmem:[#allocation5 + $0x798] sm:$0xff]  ;;  %v537_v22 = vld [vmem:[#allocation5 + $0x780] sm:$0xff]  ;;  %p4321_p0 = pneg %p4320_p10  ;;  %p4326_p5 = scmp.lt.s32.totalorder %s4324_s12, %s4318_s17 }
  0x7b   : > { %1198 = vmatpush1.msra.mxu0 %v585_v14  ;;  %1269 = vmatpush1.msra.mxu1 %v587_v15  ;;  %v539_v23 = vld [vmem:[#allocation5 + $0x790] sm:$0xff]  ;;  %v514_v24 = vld [vmem:[#allocation5 + $0x6c8] sm:$0xff]  ;;  %v516_v25 = vld [vmem:[#allocation5 + $0x6d8] sm:$0xff] }
  0x7c   : > { %1199 = vmatprep.subr.mxu0 %v562_v16  ;;  %1270 = vmatprep.subr.mxu1 %v564_v17  ;;  %v513_v26 = vld [vmem:[#allocation5 + $0x6c0] sm:$0xff]  ;;  %v515_v27 = vld [vmem:[#allocation5 + $0x6d0] sm:$0xff]  ;;  %v490_v28 = vld [vmem:[#allocation5 + $0x608] sm:$0xff]  ;;  %p4327_p9 = por %p4326_p5, %p4325_p12 }
  0x7d   : > { %1200 = vmatpush1.msra.mxu0 %v561_v18  ;;  %1271 = vmatpush1.msra.mxu1 %v563_v19  ;;  %v492_v29 = vld [vmem:[#allocation5 + $0x618] sm:$0xff]  ;;  %v489_v30 = vld [vmem:[#allocation5 + $0x600] sm:$0xff]  ;;  %v491_v31 = vld [vmem:[#allocation5 + $0x610] sm:$0xff] }
  0x7e   : > { %1201 = vmatprep.subr.mxu0 %v538_v20  ;;  %1272 = vmatprep.subr.mxu1 %v540_v21  ;;  %v466_v32 = vld [vmem:[#allocation5 + $0x548] sm:$0xff]  ;;  %v468_v33 = vld [vmem:[#allocation5 + $0x558] sm:$0xff]  ;;  %v465_v34 = vld [vmem:[#allocation5 + $0x540] sm:$0xff]  ;;  %p4328_p11 = pnand %p4327_p9, %p4321_p0 }
  0x7f   : > { %1202 = vmatpush1.msra.mxu0 %v537_v22  ;;  %1273 = vmatpush1.msra.mxu1 %v539_v23  ;;  %v467_v35 = vld [vmem:[#allocation5 + $0x550] sm:$0xff]  ;;  %v442_v36 = vld [vmem:[#allocation5 + $0x488] sm:$0xff]  ;;  %v444_v37 = vld [vmem:[#allocation5 + $0x498] sm:$0xff] }
  0x80   : > { %1203 = vmatprep.subr.mxu0 %v514_v24  ;;  %1274 = vmatprep.subr.mxu1 %v516_v25  ;;  %v441_v38 = vld [vmem:[#allocation5 + $0x480] sm:$0xff]  ;;  %v443_v39 = vld [vmem:[#allocation5 + $0x490] sm:$0xff]  ;;  %v418_v40 = vld [vmem:[#allocation5 + $0x3c8] sm:$0xff] }
  0x81   : > { %1204 = vmatpush1.msra.mxu0 %v513_v26  ;;  %1275 = vmatpush1.msra.mxu1 %v515_v27  ;;  %v420_v41 = vld [vmem:[#allocation5 + $0x3d8] sm:$0xff]  ;;  %v417_v42 = vld [vmem:[#allocation5 + $0x3c0] sm:$0xff]  ;;  %v419_v43 = vld [vmem:[#allocation5 + $0x3d0] sm:$0xff] }
  0x82   : > { %1205 = vmatprep.subr.mxu0 %v490_v28  ;;  %1276 = vmatprep.subr.mxu1 %v492_v29  ;;  %v394_v44 = vld [vmem:[#allocation5 + $0x308] sm:$0xff]  ;;  %v396_v45 = vld [vmem:[#allocation5 + $0x318] sm:$0xff]  ;;  %v393_v46 = vld [vmem:[#allocation5 + $0x300] sm:$0xff] }
  0x83   : > { %1206 = vmatpush1.msra.mxu0 %v489_v30  ;;  %1277 = vmatpush1.msra.mxu1 %v491_v31  ;;  %v395_v47 = vld [vmem:[#allocation5 + $0x310] sm:$0xff]  ;;  %v370_v48 = vld [vmem:[#allocation5 + $0x248] sm:$0xff]  ;;  %v372_v49 = vld [vmem:[#allocation5 + $0x258] sm:$0xff] }
  0x84   : > { %1207 = vmatprep.subr.mxu0 %v466_v32  ;;  %1278 = vmatprep.subr.mxu1 %v468_v33  ;;  %v369_v50 = vld [vmem:[#allocation5 + $0x240] sm:$0xff]  ;;  %v371_v51 = vld [vmem:[#allocation5 + $0x250] sm:$0xff]  ;;  %v346_v52 = vld [vmem:[#allocation5 + $0x188] sm:$0xff] }
  0x85   : > { %1208 = vmatpush1.msra.mxu0 %v465_v34  ;;  %1279 = vmatpush1.msra.mxu1 %v467_v35  ;;  %v348_v53 = vld [vmem:[#allocation5 + $0x198] sm:$0xff]  ;;  %v345_v54 = vld [vmem:[#allocation5 + $0x180] sm:$0xff]  ;;  %v347_v55 = vld [vmem:[#allocation5 + $0x190] sm:$0xff] }
  0x86   : > { %1209 = vmatprep.subr.mxu0 %v442_v36  ;;  %1280 = vmatprep.subr.mxu1 %v444_v37  ;;  %v322_v56 = vld [vmem:[#allocation5 + $0xc8] sm:$0xff]  ;;  %v324_v57 = vld [vmem:[#allocation5 + $0xd8] sm:$0xff]  ;;  %v321_v58 = vld [vmem:[#allocation5 + $0xc0] sm:$0xff] }
  0x87   : > { %1210 = vmatpush1.msra.mxu0 %v441_v38  ;;  %1281 = vmatpush1.msra.mxu1 %v443_v39  ;;  %v323_v59 = vld [vmem:[#allocation5 + $0xd0] sm:$0xff]  ;;  %v298_v60 = vld [vmem:[#allocation5 + $0x8] sm:$0xff]  ;;  %v300_v61 = vld [vmem:[#allocation5 + $0x18] sm:$0xff] }
  0x88   : > { %1211 = vmatprep.subr.mxu0 %v418_v40  ;;  %1282 = vmatprep.subr.mxu1 %v420_v41  ;;  %v297_v62 = vld [vmem:[#allocation5] sm:$0xff]  ;;  %v299_v63 = vld [vmem:[#allocation5 + $0x10] sm:$0xff]  ;;  %v1042_v0 = vld [vmem:[#allocation5 + $0x1748] sm:$0xff] }
  0x89   : > { %1212 = vmatpush1.msra.mxu0 %v417_v42  ;;  %1283 = vmatpush1.msra.mxu1 %v419_v43  ;;  %v1044_v1 = vld [vmem:[#allocation5 + $0x1758] sm:$0xff]  ;;  %v1041_v2 = vld [vmem:[#allocation5 + $0x1740] sm:$0xff]  ;;  %v1043_v3 = vld [vmem:[#allocation5 + $0x1750] sm:$0xff] }
  0x8a   : > { %1213 = vmatprep.subr.mxu0 %v394_v44  ;;  %1284 = vmatprep.subr.mxu1 %v396_v45  ;;  %v1018_v4 = vld [vmem:[#allocation5 + $0x1688] sm:$0xff]  ;;  %v1020_v5 = vld [vmem:[#allocation5 + $0x1698] sm:$0xff]  ;;  %v1017_v6 = vld [vmem:[#allocation5 + $0x1680] sm:$0xff] }
  0x8b   : > { %1214 = vmatpush1.msra.mxu0 %v393_v46  ;;  %1285 = vmatpush1.msra.mxu1 %v395_v47  ;;  %v1019_v7 = vld [vmem:[#allocation5 + $0x1690] sm:$0xff]  ;;  %v994_v8 = vld [vmem:[#allocation5 + $0x15c8] sm:$0xff]  ;;  %v996_v9 = vld [vmem:[#allocation5 + $0x15d8] sm:$0xff] }
  0x8c   : > { %1215 = vmatprep.subr.mxu0 %v370_v48  ;;  %1286 = vmatprep.subr.mxu1 %v372_v49  ;;  %v993_v10 = vld [vmem:[#allocation5 + $0x15c0] sm:$0xff]  ;;  %v995_v11 = vld [vmem:[#allocation5 + $0x15d0] sm:$0xff]  ;;  %v970_v12 = vld [vmem:[#allocation5 + $0x1508] sm:$0xff] }
  0x8d   : > { %1216 = vmatpush1.msra.mxu0 %v369_v50  ;;  %1287 = vmatpush1.msra.mxu1 %v371_v51  ;;  %v972_v13 = vld [vmem:[#allocation5 + $0x1518] sm:$0xff]  ;;  %v969_v14 = vld [vmem:[#allocation5 + $0x1500] sm:$0xff]  ;;  %v971_v15 = vld [vmem:[#allocation5 + $0x1510] sm:$0xff] }
  0x8e   : > { %1217 = vmatprep.subr.mxu0 %v346_v52  ;;  %1288 = vmatprep.subr.mxu1 %v348_v53  ;;  %v946_v16 = vld [vmem:[#allocation5 + $0x1448] sm:$0xff]  ;;  %v948_v17 = vld [vmem:[#allocation5 + $0x1458] sm:$0xff]  ;;  %v945_v18 = vld [vmem:[#allocation5 + $0x1440] sm:$0xff] }
  0x8f   : > { %1218 = vmatpush1.msra.mxu0 %v345_v54  ;;  %1289 = vmatpush1.msra.mxu1 %v347_v55  ;;  %v947_v19 = vld [vmem:[#allocation5 + $0x1450] sm:$0xff]  ;;  %v922_v20 = vld [vmem:[#allocation5 + $0x1388] sm:$0xff]  ;;  %v924_v21 = vld [vmem:[#allocation5 + $0x1398] sm:$0xff] }
  0x90   : > { %1219 = vmatprep.subr.mxu0 %v322_v56  ;;  %1290 = vmatprep.subr.mxu1 %v324_v57  ;;  %v921_v22 = vld [vmem:[#allocation5 + $0x1380] sm:$0xff]  ;;  %v923_v23 = vld [vmem:[#allocation5 + $0x1390] sm:$0xff]  ;;  %v898_v24 = vld [vmem:[#allocation5 + $0x12c8] sm:$0xff] }
  0x91   : > { %1220 = vmatpush1.msra.mxu0 %v321_v58  ;;  %1291 = vmatpush1.msra.mxu1 %v323_v59  ;;  %v900_v25 = vld [vmem:[#allocation5 + $0x12d8] sm:$0xff]  ;;  %v897_v26 = vld [vmem:[#allocation5 + $0x12c0] sm:$0xff]  ;;  %v899_v27 = vld [vmem:[#allocation5 + $0x12d0] sm:$0xff] }
  0x92   : > { %1221 = vmatprep.subr.mxu0 %v298_v60  ;;  %1292 = vmatprep.subr.mxu1 %v300_v61  ;;  %v874_v28 = vld [vmem:[#allocation5 + $0x1208] sm:$0xff]  ;;  %v876_v29 = vld [vmem:[#allocation5 + $0x1218] sm:$0xff]  ;;  %v873_v30 = vld [vmem:[#allocation5 + $0x1200] sm:$0xff] }
  0x93   : > { %1222 = vmatpush1.msra.mxu0 %v297_v62  ;;  %1293 = vmatpush1.msra.mxu1 %v299_v63  ;;  %v875_v31 = vld [vmem:[#allocation5 + $0x1210] sm:$0xff]  ;;  %v850_v32 = vld [vmem:[#allocation5 + $0x1148] sm:$0xff]  ;;  %v852_v33 = vld [vmem:[#allocation5 + $0x1158] sm:$0xff] }
  0x94   : > { %1223 = vmatprep.subr.mxu0 %v1042_v0  ;;  %1294 = vmatprep.subr.mxu1 %v1044_v1  ;;  %v849_v34 = vld [vmem:[#allocation5 + $0x1140] sm:$0xff]  ;;  %v851_v35 = vld [vmem:[#allocation5 + $0x1150] sm:$0xff]  ;;  %v826_v36 = vld [vmem:[#allocation5 + $0x1088] sm:$0xff] }
  0x95   : > { %1224 = vmatpush2.msra.mxu0 %v1041_v2  ;;  %1295 = vmatpush2.msra.mxu1 %v1043_v3  ;;  %v828_v37 = vld [vmem:[#allocation5 + $0x1098] sm:$0xff]  ;;  %v825_v38 = vld [vmem:[#allocation5 + $0x1080] sm:$0xff]  ;;  %v827_v39 = vld [vmem:[#allocation5 + $0x1090] sm:$0xff] }
  0x96   : > { %1225 = vmatprep.subr.mxu0 %v1018_v4  ;;  %1296 = vmatprep.subr.mxu1 %v1020_v5  ;;  %v802_v40 = vld [vmem:[#allocation5 + $0xfc8] sm:$0xff]  ;;  %v804_v41 = vld [vmem:[#allocation5 + $0xfd8] sm:$0xff]  ;;  %v801_v42 = vld [vmem:[#allocation5 + $0xfc0] sm:$0xff] }
  0x97   : > { %1226 = vmatpush2.msra.mxu0 %v1017_v6  ;;  %1297 = vmatpush2.msra.mxu1 %v1019_v7  ;;  %v803_v43 = vld [vmem:[#allocation5 + $0xfd0] sm:$0xff]  ;;  %v778_v44 = vld [vmem:[#allocation5 + $0xf08] sm:$0xff]  ;;  %v780_v45 = vld [vmem:[#allocation5 + $0xf18] sm:$0xff] }
  0x98   : > { %1227 = vmatprep.subr.mxu0 %v994_v8  ;;  %1298 = vmatprep.subr.mxu1 %v996_v9  ;;  %v777_v46 = vld [vmem:[#allocation5 + $0xf00] sm:$0xff]  ;;  %v779_v47 = vld [vmem:[#allocation5 + $0xf10] sm:$0xff]  ;;  %v754_v48 = vld [vmem:[#allocation5 + $0xe48] sm:$0xff] }
  0x99   : > { %1228 = vmatpush2.msra.mxu0 %v993_v10  ;;  %1299 = vmatpush2.msra.mxu1 %v995_v11  ;;  %v756_v49 = vld [vmem:[#allocation5 + $0xe58] sm:$0xff]  ;;  %v753_v50 = vld [vmem:[#allocation5 + $0xe40] sm:$0xff]  ;;  %v755_v51 = vld [vmem:[#allocation5 + $0xe50] sm:$0xff] }
  0x9a   : > { %1229 = vmatprep.subr.mxu0 %v970_v12  ;;  %1300 = vmatprep.subr.mxu1 %v972_v13  ;;  %v730_v52 = vld [vmem:[#allocation5 + $0xd88] sm:$0xff]  ;;  %v732_v53 = vld [vmem:[#allocation5 + $0xd98] sm:$0xff]  ;;  %v729_v54 = vld [vmem:[#allocation5 + $0xd80] sm:$0xff] }
  0x9b   : > { %1230 = vmatpush2.msra.mxu0 %v969_v14  ;;  %1301 = vmatpush2.msra.mxu1 %v971_v15  ;;  %v731_v55 = vld [vmem:[#allocation5 + $0xd90] sm:$0xff]  ;;  %v706_v56 = vld [vmem:[#allocation5 + $0xcc8] sm:$0xff]  ;;  %v708_v57 = vld [vmem:[#allocation5 + $0xcd8] sm:$0xff] }
  0x9c   : > { %1231 = vmatprep.subr.mxu0 %v946_v16  ;;  %1302 = vmatprep.subr.mxu1 %v948_v17  ;;  %v705_v58 = vld [vmem:[#allocation5 + $0xcc0] sm:$0xff]  ;;  %v707_v59 = vld [vmem:[#allocation5 + $0xcd0] sm:$0xff]  ;;  %v682_v60 = vld [vmem:[#allocation5 + $0xc08] sm:$0xff] }
  0x9d   : > { %1232 = vmatpush2.msra.mxu0 %v945_v18  ;;  %1303 = vmatpush2.msra.mxu1 %v947_v19  ;;  %v684_v61 = vld [vmem:[#allocation5 + $0xc18] sm:$0xff]  ;;  %v681_v62 = vld [vmem:[#allocation5 + $0xc00] sm:$0xff]  ;;  %v683_v0 = vld [vmem:[#allocation5 + $0xc10] sm:$0xff] }
  0x9e   : > { %1233 = vmatprep.subr.mxu0 %v922_v20  ;;  %1304 = vmatprep.subr.mxu1 %v924_v21  ;;  %v4601_v63 = vld [vmem:[%s4586_s16 + $0x8] sm:$0xff]  ;;  %v4604_v1 = vld [vmem:[%s4586_s16] sm:$0xff] }
  0x9f   : > { %1234 = vmatpush2.msra.mxu0 %v921_v22  ;;  %1305 = vmatpush2.msra.mxu1 %v923_v23  ;;  %v662_v2 = vld [vmem:[#allocation5 + $0xb68] sm:$0xff]  ;;  %v664_v3 = vld [vmem:[#allocation5 + $0xb78] sm:$0xff]  ;;  %v661_v4 = vld [vmem:[#allocation5 + $0xb60] sm:$0xff] }
  0xa0   : > { %1235 = vmatprep.subr.mxu0 %v898_v24  ;;  %1306 = vmatprep.subr.mxu1 %v900_v25  ;;  %v663_v5 = vld [vmem:[#allocation5 + $0xb70] sm:$0xff]  ;;  %v638_v6 = vld [vmem:[#allocation5 + $0xaa8] sm:$0xff]  ;;  %v640_v7 = vld [vmem:[#allocation5 + $0xab8] sm:$0xff] }
  0xa1   : > { %1236 = vmatpush2.msra.mxu0 %v897_v26  ;;  %1307 = vmatpush2.msra.mxu1 %v899_v27  ;;  %v637_v8 = vld [vmem:[#allocation5 + $0xaa0] sm:$0xff]  ;;  %v639_v9 = vld [vmem:[#allocation5 + $0xab0] sm:$0xff]  ;;  %v614_v10 = vld [vmem:[#allocation5 + $0x9e8] sm:$0xff] }
  0xa2   : > { %1237 = vmatprep.subr.mxu0 %v874_v28  ;;  %1308 = vmatprep.subr.mxu1 %v876_v29  ;;  %v616_v11 = vld [vmem:[#allocation5 + $0x9f8] sm:$0xff]  ;;  %v613_v12 = vld [vmem:[#allocation5 + $0x9e0] sm:$0xff]  ;;  %v615_v13 = vld [vmem:[#allocation5 + $0x9f0] sm:$0xff] }
  0xa3   : > { %1238 = vmatpush2.msra.mxu0 %v873_v30  ;;  %1309 = vmatpush2.msra.mxu1 %v875_v31  ;;  %v590_v14 = vld [vmem:[#allocation5 + $0x928] sm:$0xff]  ;;  %v592_v15 = vld [vmem:[#allocation5 + $0x938] sm:$0xff]  ;;  %v589_v16 = vld [vmem:[#allocation5 + $0x920] sm:$0xff] }
  0xa4   : > { %1239 = vmatprep.subr.mxu0 %v850_v32  ;;  %1310 = vmatprep.subr.mxu1 %v852_v33  ;;  %v591_v17 = vld [vmem:[#allocation5 + $0x930] sm:$0xff]  ;;  %v566_v18 = vld [vmem:[#allocation5 + $0x868] sm:$0xff]  ;;  %v568_v19 = vld [vmem:[#allocation5 + $0x878] sm:$0xff] }
  0xa5   : > { %1240 = vmatpush2.msra.mxu0 %v849_v34  ;;  %1311 = vmatpush2.msra.mxu1 %v851_v35  ;;  %v565_v20 = vld [vmem:[#allocation5 + $0x860] sm:$0xff]  ;;  %v567_v21 = vld [vmem:[#allocation5 + $0x870] sm:$0xff]  ;;  %v542_v22 = vld [vmem:[#allocation5 + $0x7a8] sm:$0xff] }
  0xa6   : > { %1241 = vmatprep.subr.mxu0 %v826_v36  ;;  %1312 = vmatprep.subr.mxu1 %v828_v37  ;;  %v544_v23 = vld [vmem:[#allocation5 + $0x7b8] sm:$0xff]  ;;  %v541_v24 = vld [vmem:[#allocation5 + $0x7a0] sm:$0xff]  ;;  %v543_v25 = vld [vmem:[#allocation5 + $0x7b0] sm:$0xff] }
  0xa7   : > { %1242 = vmatpush2.msra.mxu0 %v825_v38  ;;  %1313 = vmatpush2.msra.mxu1 %v827_v39  ;;  %v518_v26 = vld [vmem:[#allocation5 + $0x6e8] sm:$0xff]  ;;  %v520_v27 = vld [vmem:[#allocation5 + $0x6f8] sm:$0xff]  ;;  %v517_v28 = vld [vmem:[#allocation5 + $0x6e0] sm:$0xff] }
  0xa8   : > { %1243 = vmatprep.subr.mxu0 %v802_v40  ;;  %1314 = vmatprep.subr.mxu1 %v804_v41  ;;  %v519_v29 = vld [vmem:[#allocation5 + $0x6f0] sm:$0xff]  ;;  %v494_v30 = vld [vmem:[#allocation5 + $0x628] sm:$0xff]  ;;  %v496_v31 = vld [vmem:[#allocation5 + $0x638] sm:$0xff] }
  0xa9   : > { %1244 = vmatpush2.msra.mxu0 %v801_v42  ;;  %1315 = vmatpush2.msra.mxu1 %v803_v43  ;;  %v493_v32 = vld [vmem:[#allocation5 + $0x620] sm:$0xff]  ;;  %v495_v33 = vld [vmem:[#allocation5 + $0x630] sm:$0xff]  ;;  %v470_v34 = vld [vmem:[#allocation5 + $0x568] sm:$0xff] }
  0xaa   : > { %1245 = vmatprep.subr.mxu0 %v778_v44  ;;  %1316 = vmatprep.subr.mxu1 %v780_v45  ;;  %v472_v35 = vld [vmem:[#allocation5 + $0x578] sm:$0xff]  ;;  %v469_v36 = vld [vmem:[#allocation5 + $0x560] sm:$0xff]  ;;  %v471_v37 = vld [vmem:[#allocation5 + $0x570] sm:$0xff] }
  0xab   : > { %1246 = vmatpush2.msra.mxu0 %v777_v46  ;;  %1317 = vmatpush2.msra.mxu1 %v779_v47  ;;  %v446_v38 = vld [vmem:[#allocation5 + $0x4a8] sm:$0xff]  ;;  %v448_v39 = vld [vmem:[#allocation5 + $0x4b8] sm:$0xff]  ;;  %v445_v40 = vld [vmem:[#allocation5 + $0x4a0] sm:$0xff] }
  0xac   : > { %1247 = vmatprep.subr.mxu0 %v754_v48  ;;  %1318 = vmatprep.subr.mxu1 %v756_v49  ;;  %v447_v41 = vld [vmem:[#allocation5 + $0x4b0] sm:$0xff]  ;;  %v422_v42 = vld [vmem:[#allocation5 + $0x3e8] sm:$0xff]  ;;  %v424_v43 = vld [vmem:[#allocation5 + $0x3f8] sm:$0xff] }
  0xad   : > { %1248 = vmatpush2.msra.mxu0 %v753_v50  ;;  %1319 = vmatpush2.msra.mxu1 %v755_v51  ;;  %v421_v44 = vld [vmem:[#allocation5 + $0x3e0] sm:$0xff]  ;;  %v423_v45 = vld [vmem:[#allocation5 + $0x3f0] sm:$0xff]  ;;  %v398_v46 = vld [vmem:[#allocation5 + $0x328] sm:$0xff] }
  0xae   : > { %1249 = vmatprep.subr.mxu0 %v730_v52  ;;  %1320 = vmatprep.subr.mxu1 %v732_v53  ;;  %v400_v47 = vld [vmem:[#allocation5 + $0x338] sm:$0xff]  ;;  %v397_v48 = vld [vmem:[#allocation5 + $0x320] sm:$0xff]  ;;  %v399_v49 = vld [vmem:[#allocation5 + $0x330] sm:$0xff] }
  0xaf   : > { %1250 = vmatpush2.msra.mxu0 %v729_v54  ;;  %1321 = vmatpush2.msra.mxu1 %v731_v55  ;;  %v374_v50 = vld [vmem:[#allocation5 + $0x268] sm:$0xff]  ;;  %v376_v51 = vld [vmem:[#allocation5 + $0x278] sm:$0xff]  ;;  %v373_v52 = vld [vmem:[#allocation5 + $0x260] sm:$0xff] }
  0xb0   : > { %1251 = vmatprep.subr.mxu0 %v706_v56  ;;  %1322 = vmatprep.subr.mxu1 %v708_v57  ;;  %v375_v53 = vld [vmem:[#allocation5 + $0x270] sm:$0xff]  ;;  %v350_v54 = vld [vmem:[#allocation5 + $0x1a8] sm:$0xff]  ;;  %v352_v55 = vld [vmem:[#allocation5 + $0x1b8] sm:$0xff] }
  0xb1   : > { %1252 = vmatpush2.msra.mxu0 %v705_v58  ;;  %1323 = vmatpush2.msra.mxu1 %v707_v59  ;;  %v349_v56 = vld [vmem:[#allocation5 + $0x1a0] sm:$0xff]  ;;  %v351_v57 = vld [vmem:[#allocation5 + $0x1b0] sm:$0xff]  ;;  %v326_v58 = vld [vmem:[#allocation5 + $0xe8] sm:$0xff] }
  0xb2   : > { %1253 = vmatprep.subr.mxu0 %v682_v60  ;;  %1324 = vmatprep.subr.mxu1 %v684_v61  ;;  %v328_v59 = vld [vmem:[#allocation5 + $0xf8] sm:$0xff]  ;;  %v325_v60 = vld [vmem:[#allocation5 + $0xe0] sm:$0xff]  ;;  %v327_v61 = vld [vmem:[#allocation5 + $0xf0] sm:$0xff] }
  0xb3   : > { %1254 = vmatpush2.msra.mxu0 %v681_v62  ;;  %1255 = vmatprep.mubr.f32.mxu0 %v4601_v63  ;;  %v302_v62 = vld [vmem:[#allocation5 + $0x28] sm:$0xff] }
  0xb4   : > { %1325 = vmatpush2.msra.mxu1 %v683_v0  ;;  %1326 = vmatprep.mubr.f32.mxu1 %v4601_v63  ;;  %v304_v0 = vld [vmem:[#allocation5 + $0x38] sm:$0xff] }
  0xb5   : > { %1256 = vmatmul.mubr.f32.vlgmr.msra.gmra.mxu0 %v4604_v1  ;;  %1327 = vmatmul.mubr.f32.vlgmr.msra.gmra.mxu1 %v4604_v1 }
  0xb6   : > { %1333 = vmatprep.subr.mxu0 %v662_v2  ;;  %1404 = vmatprep.subr.mxu1 %v664_v3  ;;  %v301_v2 = vld [vmem:[#allocation5 + $0x20] sm:$0xff]  ;;  %v303_v3 = vld [vmem:[#allocation5 + $0x30] sm:$0xff] }
  0xb7   : > { %1334 = vmatpush1.msra.mxu0 %v661_v4  ;;  %1405 = vmatpush1.msra.mxu1 %v663_v5  ;;  %v1046_v4 = vld [vmem:[#allocation5 + $0x1768] sm:$0xff]  ;;  %v1048_v5 = vld [vmem:[#allocation5 + $0x1778] sm:$0xff] }
  0xb8   : > { %1335 = vmatprep.subr.mxu0 %v638_v6  ;;  %1406 = vmatprep.subr.mxu1 %v640_v7  ;;  %v1045_v6 = vld [vmem:[#allocation5 + $0x1760] sm:$0xff]  ;;  %v1047_v7 = vld [vmem:[#allocation5 + $0x1770] sm:$0xff] }
  0xb9   : > { %1336 = vmatpush1.msra.mxu0 %v637_v8  ;;  %1407 = vmatpush1.msra.mxu1 %v639_v9  ;;  %v1022_v8 = vld [vmem:[#allocation5 + $0x16a8] sm:$0xff]  ;;  %v1024_v9 = vld [vmem:[#allocation5 + $0x16b8] sm:$0xff] }
  0xba   : > { %1337 = vmatprep.subr.mxu0 %v614_v10  ;;  %1408 = vmatprep.subr.mxu1 %v616_v11  ;;  %v1021_v10 = vld [vmem:[#allocation5 + $0x16a0] sm:$0xff]  ;;  %v1023_v11 = vld [vmem:[#allocation5 + $0x16b0] sm:$0xff] }
  0xbb   : > { %1338 = vmatpush1.msra.mxu0 %v613_v12  ;;  %1409 = vmatpush1.msra.mxu1 %v615_v13  ;;  %v998_v12 = vld [vmem:[#allocation5 + $0x15e8] sm:$0xff]  ;;  %v1000_v13 = vld [vmem:[#allocation5 + $0x15f8] sm:$0xff] }
  0xbc   : > { %1339 = vmatprep.subr.mxu0 %v590_v14  ;;  %1410 = vmatprep.subr.mxu1 %v592_v15  ;;  %v997_v14 = vld [vmem:[#allocation5 + $0x15e0] sm:$0xff]  ;;  %v999_v15 = vld [vmem:[#allocation5 + $0x15f0] sm:$0xff] }
  0xbd   : > { %1340 = vmatpush1.msra.mxu0 %v589_v16  ;;  %1411 = vmatpush1.msra.mxu1 %v591_v17  ;;  %v974_v16 = vld [vmem:[#allocation5 + $0x1528] sm:$0xff]  ;;  %v976_v17 = vld [vmem:[#allocation5 + $0x1538] sm:$0xff] }
  0xbe   : > { %1341 = vmatprep.subr.mxu0 %v566_v18  ;;  %1412 = vmatprep.subr.mxu1 %v568_v19  ;;  %v973_v18 = vld [vmem:[#allocation5 + $0x1520] sm:$0xff]  ;;  %v975_v19 = vld [vmem:[#allocation5 + $0x1530] sm:$0xff] }
  0xbf   : > { %1342 = vmatpush1.msra.mxu0 %v565_v20  ;;  %1413 = vmatpush1.msra.mxu1 %v567_v21  ;;  %v950_v20 = vld [vmem:[#allocation5 + $0x1468] sm:$0xff]  ;;  %v952_v21 = vld [vmem:[#allocation5 + $0x1478] sm:$0xff] }
  0xc0   : > { %1343 = vmatprep.subr.mxu0 %v542_v22  ;;  %1414 = vmatprep.subr.mxu1 %v544_v23  ;;  %v949_v22 = vld [vmem:[#allocation5 + $0x1460] sm:$0xff]  ;;  %v951_v23 = vld [vmem:[#allocation5 + $0x1470] sm:$0xff] }
  0xc1   : > { %1344 = vmatpush1.msra.mxu0 %v541_v24  ;;  %1415 = vmatpush1.msra.mxu1 %v543_v25  ;;  %v926_v24 = vld [vmem:[#allocation5 + $0x13a8] sm:$0xff]  ;;  %v928_v25 = vld [vmem:[#allocation5 + $0x13b8] sm:$0xff] }
  0xc2   : > { %1345 = vmatprep.subr.mxu0 %v518_v26  ;;  %1416 = vmatprep.subr.mxu1 %v520_v27  ;;  %v925_v26 = vld [vmem:[#allocation5 + $0x13a0] sm:$0xff]  ;;  %v927_v27 = vld [vmem:[#allocation5 + $0x13b0] sm:$0xff] }
  0xc3   : > { %1346 = vmatpush1.msra.mxu0 %v517_v28  ;;  %1417 = vmatpush1.msra.mxu1 %v519_v29  ;;  %v902_v28 = vld [vmem:[#allocation5 + $0x12e8] sm:$0xff]  ;;  %v904_v29 = vld [vmem:[#allocation5 + $0x12f8] sm:$0xff] }
  0xc4   : > { %1347 = vmatprep.subr.mxu0 %v494_v30  ;;  %1418 = vmatprep.subr.mxu1 %v496_v31  ;;  %v901_v30 = vld [vmem:[#allocation5 + $0x12e0] sm:$0xff]  ;;  %v903_v31 = vld [vmem:[#allocation5 + $0x12f0] sm:$0xff] }
  0xc5   : > { %1348 = vmatpush1.msra.mxu0 %v493_v32  ;;  %1419 = vmatpush1.msra.mxu1 %v495_v33  ;;  %v878_v32 = vld [vmem:[#allocation5 + $0x1228] sm:$0xff]  ;;  %v880_v33 = vld [vmem:[#allocation5 + $0x1238] sm:$0xff] }
  0xc6   : > { %1349 = vmatprep.subr.mxu0 %v470_v34  ;;  %1420 = vmatprep.subr.mxu1 %v472_v35  ;;  %v877_v34 = vld [vmem:[#allocation5 + $0x1220] sm:$0xff]  ;;  %v879_v35 = vld [vmem:[#allocation5 + $0x1230] sm:$0xff] }
  0xc7   : > { %1350 = vmatpush1.msra.mxu0 %v469_v36  ;;  %1421 = vmatpush1.msra.mxu1 %v471_v37  ;;  %v854_v36 = vld [vmem:[#allocation5 + $0x1168] sm:$0xff]  ;;  %v856_v37 = vld [vmem:[#allocation5 + $0x1178] sm:$0xff] }
  0xc8   : > { %1351 = vmatprep.subr.mxu0 %v446_v38  ;;  %1422 = vmatprep.subr.mxu1 %v448_v39  ;;  %v853_v38 = vld [vmem:[#allocation5 + $0x1160] sm:$0xff]  ;;  %v855_v39 = vld [vmem:[#allocation5 + $0x1170] sm:$0xff] }
  0xc9   : > { %1352 = vmatpush1.msra.mxu0 %v445_v40  ;;  %1423 = vmatpush1.msra.mxu1 %v447_v41  ;;  %v830_v40 = vld [vmem:[#allocation5 + $0x10a8] sm:$0xff]  ;;  %v832_v41 = vld [vmem:[#allocation5 + $0x10b8] sm:$0xff] }
  0xca   : > { %1353 = vmatprep.subr.mxu0 %v422_v42  ;;  %1424 = vmatprep.subr.mxu1 %v424_v43  ;;  %v829_v42 = vld [vmem:[#allocation5 + $0x10a0] sm:$0xff]  ;;  %v831_v43 = vld [vmem:[#allocation5 + $0x10b0] sm:$0xff] }
  0xcb   : > { %1354 = vmatpush1.msra.mxu0 %v421_v44  ;;  %1425 = vmatpush1.msra.mxu1 %v423_v45  ;;  %v806_v44 = vld [vmem:[#allocation5 + $0xfe8] sm:$0xff]  ;;  %v808_v45 = vld [vmem:[#allocation5 + $0xff8] sm:$0xff] }
  0xcc   : > { %1355 = vmatprep.subr.mxu0 %v398_v46  ;;  %1426 = vmatprep.subr.mxu1 %v400_v47  ;;  %v805_v46 = vld [vmem:[#allocation5 + $0xfe0] sm:$0xff]  ;;  %v807_v47 = vld [vmem:[#allocation5 + $0xff0] sm:$0xff] }
  0xcd   : > { %1356 = vmatpush1.msra.mxu0 %v397_v48  ;;  %1427 = vmatpush1.msra.mxu1 %v399_v49  ;;  %v782_v48 = vld [vmem:[#allocation5 + $0xf28] sm:$0xff]  ;;  %v784_v49 = vld [vmem:[#allocation5 + $0xf38] sm:$0xff] }
  0xce   : > { %1357 = vmatprep.subr.mxu0 %v374_v50  ;;  %1428 = vmatprep.subr.mxu1 %v376_v51  ;;  %v781_v50 = vld [vmem:[#allocation5 + $0xf20] sm:$0xff]  ;;  %v783_v51 = vld [vmem:[#allocation5 + $0xf30] sm:$0xff] }
  0xcf   : > { %1358 = vmatpush1.msra.mxu0 %v373_v52  ;;  %1429 = vmatpush1.msra.mxu1 %v375_v53  ;;  %v758_v52 = vld [vmem:[#allocation5 + $0xe68] sm:$0xff]  ;;  %v760_v53 = vld [vmem:[#allocation5 + $0xe78] sm:$0xff] }
  0xd0   : > { %1359 = vmatprep.subr.mxu0 %v350_v54  ;;  %1430 = vmatprep.subr.mxu1 %v352_v55  ;;  %v757_v54 = vld [vmem:[#allocation5 + $0xe60] sm:$0xff]  ;;  %v759_v55 = vld [vmem:[#allocation5 + $0xe70] sm:$0xff] }
  0xd1   : > { %1360 = vmatpush1.msra.mxu0 %v349_v56  ;;  %1431 = vmatpush1.msra.mxu1 %v351_v57  ;;  %v734_v56 = vld [vmem:[#allocation5 + $0xda8] sm:$0xff]  ;;  %v736_v57 = vld [vmem:[#allocation5 + $0xdb8] sm:$0xff] }
  0xd2   : > { %1361 = vmatprep.subr.mxu0 %v326_v58  ;;  %1432 = vmatprep.subr.mxu1 %v328_v59  ;;  %v733_v58 = vld [vmem:[#allocation5 + $0xda0] sm:$0xff]  ;;  %v735_v59 = vld [vmem:[#allocation5 + $0xdb0] sm:$0xff] }
  0xd3   : > { %1362 = vmatpush1.msra.mxu0 %v325_v60  ;;  %1433 = vmatpush1.msra.mxu1 %v327_v61  ;;  %v710_v60 = vld [vmem:[#allocation5 + $0xce8] sm:$0xff]  ;;  %v712_v61 = vld [vmem:[#allocation5 + $0xcf8] sm:$0xff] }
  0xd4   : > { %1363 = vmatprep.subr.mxu0 %v302_v62  ;;  %1434 = vmatprep.subr.mxu1 %v304_v0  ;;  %v709_v62 = vld [vmem:[#allocation5 + $0xce0] sm:$0xff]  ;;  %v711_v0 = vld [vmem:[#allocation5 + $0xcf0] sm:$0xff] }
  0xd5   : > { %1364 = vmatpush1.msra.mxu0 %v301_v2  ;;  %1435 = vmatpush1.msra.mxu1 %v303_v3  ;;  %v686_v2 = vld [vmem:[#allocation5 + $0xc28] sm:$0xff]  ;;  %v688_v3 = vld [vmem:[#allocation5 + $0xc38] sm:$0xff] }
  0xd6   : > { %1365 = vmatprep.subr.mxu0 %v1046_v4  ;;  %1436 = vmatprep.subr.mxu1 %v1048_v5  ;;  %v685_v4 = vld [vmem:[#allocation5 + $0xc20] sm:$0xff]  ;;  %v687_v5 = vld [vmem:[#allocation5 + $0xc30] sm:$0xff] }
  0xd7   : > { %1366 = vmatpush2.msra.mxu0 %v1045_v6  ;;  %1437 = vmatpush2.msra.mxu1 %v1047_v7  ;;  %v666_v6 = vld [vmem:[#allocation5 + $0xb88] sm:$0xff]  ;;  %v668_v7 = vld [vmem:[#allocation5 + $0xb98] sm:$0xff] }
  0xd8   : > { %1367 = vmatprep.subr.mxu0 %v1022_v8  ;;  %1438 = vmatprep.subr.mxu1 %v1024_v9  ;;  %v665_v8 = vld [vmem:[#allocation5 + $0xb80] sm:$0xff]  ;;  %v667_v9 = vld [vmem:[#allocation5 + $0xb90] sm:$0xff] }
  0xd9   : > { %1368 = vmatpush2.msra.mxu0 %v1021_v10  ;;  %1439 = vmatpush2.msra.mxu1 %v1023_v11  ;;  %v642_v10 = vld [vmem:[#allocation5 + $0xac8] sm:$0xff]  ;;  %v644_v11 = vld [vmem:[#allocation5 + $0xad8] sm:$0xff] }
  0xda   : > { %1369 = vmatprep.subr.mxu0 %v998_v12  ;;  %1440 = vmatprep.subr.mxu1 %v1000_v13  ;;  %v641_v12 = vld [vmem:[#allocation5 + $0xac0] sm:$0xff]  ;;  %v643_v13 = vld [vmem:[#allocation5 + $0xad0] sm:$0xff] }
  0xdb   : > { %1370 = vmatpush2.msra.mxu0 %v997_v14  ;;  %1441 = vmatpush2.msra.mxu1 %v999_v15  ;;  %v618_v14 = vld [vmem:[#allocation5 + $0xa08] sm:$0xff]  ;;  %v620_v15 = vld [vmem:[#allocation5 + $0xa18] sm:$0xff] }
  0xdc   : > { %1371 = vmatprep.subr.mxu0 %v974_v16  ;;  %1442 = vmatprep.subr.mxu1 %v976_v17  ;;  %v617_v16 = vld [vmem:[#allocation5 + $0xa00] sm:$0xff]  ;;  %v594_v17 = vld [vmem:[#allocation5 + $0x948] sm:$0xff] }
  0xdd   : > { %1372 = vmatpush2.msra.mxu0 %v973_v18  ;;  %1443 = vmatpush2.msra.mxu1 %v975_v19  ;;  %v596_v18 = vld [vmem:[#allocation5 + $0x958] sm:$0xff]  ;;  %v595_v19 = vld [vmem:[#allocation5 + $0x950] sm:$0xff] }
  0xde   : > { %1373 = vmatprep.subr.mxu0 %v950_v20  ;;  %1444 = vmatprep.subr.mxu1 %v952_v21  ;;  %v570_v20 = vld [vmem:[#allocation5 + $0x888] sm:$0xff]  ;;  %v572_v21 = vld [vmem:[#allocation5 + $0x898] sm:$0xff] }
  0xdf   : > { %1374 = vmatpush2.msra.mxu0 %v949_v22  ;;  %1445 = vmatpush2.msra.mxu1 %v951_v23  ;;  %v569_v22 = vld [vmem:[#allocation5 + $0x880] sm:$0xff]  ;;  %v571_v23 = vld [vmem:[#allocation5 + $0x890] sm:$0xff] }
  0xe0   : > { %1375 = vmatprep.subr.mxu0 %v926_v24  ;;  %1446 = vmatprep.subr.mxu1 %v928_v25  ;;  %v546_v24 = vld [vmem:[#allocation5 + $0x7c8] sm:$0xff]  ;;  %v548_v25 = vld [vmem:[#allocation5 + $0x7d8] sm:$0xff] }
  0xe1   : > { %1376 = vmatpush2.msra.mxu0 %v925_v26  ;;  %1447 = vmatpush2.msra.mxu1 %v927_v27  ;;  %v545_v26 = vld [vmem:[#allocation5 + $0x7c0] sm:$0xff]  ;;  %v547_v27 = vld [vmem:[#allocation5 + $0x7d0] sm:$0xff] }
  0xe2   : > { %1377 = vmatprep.subr.mxu0 %v902_v28  ;;  %1448 = vmatprep.subr.mxu1 %v904_v29  ;;  %v522_v28 = vld [vmem:[#allocation5 + $0x708] sm:$0xff]  ;;  %v524_v29 = vld [vmem:[#allocation5 + $0x718] sm:$0xff] }
  0xe3   : > { %1378 = vmatpush2.msra.mxu0 %v901_v30  ;;  %1449 = vmatpush2.msra.mxu1 %v903_v31  ;;  %v521_v30 = vld [vmem:[#allocation5 + $0x700] sm:$0xff]  ;;  %v523_v31 = vld [vmem:[#allocation5 + $0x710] sm:$0xff] }
  0xe4   : > { %1379 = vmatprep.subr.mxu0 %v878_v32  ;;  %1450 = vmatprep.subr.mxu1 %v880_v33  ;;  %v498_v32 = vld [vmem:[#allocation5 + $0x648] sm:$0xff]  ;;  %v500_v33 = vld [vmem:[#allocation5 + $0x658] sm:$0xff] }
  0xe5   : > { %1380 = vmatpush2.msra.mxu0 %v877_v34  ;;  %1451 = vmatpush2.msra.mxu1 %v879_v35  ;;  %v497_v34 = vld [vmem:[#allocation5 + $0x640] sm:$0xff]  ;;  %v499_v35 = vld [vmem:[#allocation5 + $0x650] sm:$0xff] }
  0xe6   : > { %1381 = vmatprep.subr.mxu0 %v854_v36  ;;  %1452 = vmatprep.subr.mxu1 %v856_v37  ;;  %v474_v36 = vld [vmem:[#allocation5 + $0x588] sm:$0xff]  ;;  %v476_v37 = vld [vmem:[#allocation5 + $0x598] sm:$0xff] }
  0xe7   : > { %1382 = vmatpush2.msra.mxu0 %v853_v38  ;;  %1453 = vmatpush2.msra.mxu1 %v855_v39  ;;  %v473_v38 = vld [vmem:[#allocation5 + $0x580] sm:$0xff]  ;;  %v475_v39 = vld [vmem:[#allocation5 + $0x590] sm:$0xff] }
  0xe8   : > { %1383 = vmatprep.subr.mxu0 %v830_v40  ;;  %1454 = vmatprep.subr.mxu1 %v832_v41  ;;  %v450_v40 = vld [vmem:[#allocation5 + $0x4c8] sm:$0xff]  ;;  %v452_v41 = vld [vmem:[#allocation5 + $0x4d8] sm:$0xff] }
  0xe9   : > { %1384 = vmatpush2.msra.mxu0 %v829_v42  ;;  %1455 = vmatpush2.msra.mxu1 %v831_v43  ;;  %v449_v42 = vld [vmem:[#allocation5 + $0x4c0] sm:$0xff]  ;;  %v451_v43 = vld [vmem:[#allocation5 + $0x4d0] sm:$0xff] }
  0xea   : > { %1385 = vmatprep.subr.mxu0 %v806_v44  ;;  %1456 = vmatprep.subr.mxu1 %v808_v45  ;;  %v426_v44 = vld [vmem:[#allocation5 + $0x408] sm:$0xff]  ;;  %v428_v45 = vld [vmem:[#allocation5 + $0x418] sm:$0xff] }
  0xeb   : > { %1386 = vmatpush2.msra.mxu0 %v805_v46  ;;  %1457 = vmatpush2.msra.mxu1 %v807_v47  ;;  %v425_v46 = vld [vmem:[#allocation5 + $0x400] sm:$0xff]  ;;  %v427_v47 = vld [vmem:[#allocation5 + $0x410] sm:$0xff] }
  0xec   : > { %1387 = vmatprep.subr.mxu0 %v782_v48  ;;  %1458 = vmatprep.subr.mxu1 %v784_v49  ;;  %v402_v48 = vld [vmem:[#allocation5 + $0x348] sm:$0xff]  ;;  %v404_v49 = vld [vmem:[#allocation5 + $0x358] sm:$0xff] }
  0xed   : > { %1388 = vmatpush2.msra.mxu0 %v781_v50  ;;  %1459 = vmatpush2.msra.mxu1 %v783_v51  ;;  %v401_v50 = vld [vmem:[#allocation5 + $0x340] sm:$0xff]  ;;  %v403_v51 = vld [vmem:[#allocation5 + $0x350] sm:$0xff] }
  0xee   : > { %1389 = vmatprep.subr.mxu0 %v758_v52  ;;  %1460 = vmatprep.subr.mxu1 %v760_v53  ;;  %v378_v52 = vld [vmem:[#allocation5 + $0x288] sm:$0xff]  ;;  %v380_v53 = vld [vmem:[#allocation5 + $0x298] sm:$0xff] }
  0xef   : > { %1390 = vmatpush2.msra.mxu0 %v757_v54  ;;  %1461 = vmatpush2.msra.mxu1 %v759_v55  ;;  %v377_v54 = vld [vmem:[#allocation5 + $0x280] sm:$0xff]  ;;  %v379_v55 = vld [vmem:[#allocation5 + $0x290] sm:$0xff] }
  0xf0   : > { %1391 = vmatprep.subr.mxu0 %v734_v56  ;;  %1462 = vmatprep.subr.mxu1 %v736_v57  ;;  %v354_v56 = vld [vmem:[#allocation5 + $0x1c8] sm:$0xff]  ;;  %v356_v57 = vld [vmem:[#allocation5 + $0x1d8] sm:$0xff] }
  0xf1   : > { %1392 = vmatpush2.msra.mxu0 %v733_v58  ;;  %1463 = vmatpush2.msra.mxu1 %v735_v59  ;;  %v353_v58 = vld [vmem:[#allocation5 + $0x1c0] sm:$0xff]  ;;  %v355_v59 = vld [vmem:[#allocation5 + $0x1d0] sm:$0xff] }
  0xf2   : > { %1393 = vmatprep.subr.mxu0 %v710_v60  ;;  %1464 = vmatprep.subr.mxu1 %v712_v61  ;;  %v330_v60 = vld [vmem:[#allocation5 + $0x108] sm:$0xff]  ;;  %v332_v61 = vld [vmem:[#allocation5 + $0x118] sm:$0xff] }
  0xf3   : > { %1394 = vmatpush2.msra.mxu0 %v709_v62  ;;  %1465 = vmatpush2.msra.mxu1 %v711_v0  ;;  %v329_v62 = vld [vmem:[#allocation5 + $0x100] sm:$0xff]  ;;  %v331_v0 = vld [vmem:[#allocation5 + $0x110] sm:$0xff] }
  0xf4   : > { %1395 = vmatprep.subr.mxu0 %v686_v2  ;;  %1466 = vmatprep.subr.mxu1 %v688_v3  ;;  %v306_v2 = vld [vmem:[#allocation5 + $0x48] sm:$0xff]  ;;  %v308_v3 = vld [vmem:[#allocation5 + $0x58] sm:$0xff] }
  0xf5   : > { %1396 = vmatpush2.msra.mxu0 %v685_v4  ;;  %1397 = vmatprep.mubr.f32.mxu0 %v4601_v63  ;;  %v305_v4 = vld [vmem:[#allocation5 + $0x40] sm:$0xff] }
  0xf6   : > { %1467 = vmatpush2.msra.mxu1 %v687_v5  ;;  %1468 = vmatprep.mubr.f32.mxu1 %v4601_v63  ;;  %v619_v63 = vld [vmem:[#allocation5 + $0xa10] sm:$0xff] }
  0xf7   : > { %1398 = vmatmul.mubr.f32.vlgmr.msra.gmra.mxu0 %v4604_v1  ;;  %1469 = vmatmul.mubr.f32.vlgmr.msra.gmra.mxu1 %v4604_v1  ;;  %v593_v1 = vld [vmem:[#allocation5 + $0x940] sm:$0xff]  ;;  %v307_v5 = vld [vmem:[#allocation5 + $0x50] sm:$0xff] }
  0xf8   : > { %1475 = vmatprep.subr.mxu0 %v666_v6  ;;  %1546 = vmatprep.subr.mxu1 %v668_v7  ;;  %v1050_v6 = vld [vmem:[#allocation5 + $0x1788] sm:$0xff]  ;;  %v1052_v7 = vld [vmem:[#allocation5 + $0x1798] sm:$0xff] }
  0xf9   : > { %1476 = vmatpush1.msra.mxu0 %v665_v8  ;;  %1547 = vmatpush1.msra.mxu1 %v667_v9  ;;  %v1049_v8 = vld [vmem:[#allocation5 + $0x1780] sm:$0xff]  ;;  %v1051_v9 = vld [vmem:[#allocation5 + $0x1790] sm:$0xff] }
  0xfa   : > { %1477 = vmatprep.subr.mxu0 %v642_v10  ;;  %1548 = vmatprep.subr.mxu1 %v644_v11  ;;  %v1026_v10 = vld [vmem:[#allocation5 + $0x16c8] sm:$0xff]  ;;  %v1028_v11 = vld [vmem:[#allocation5 + $0x16d8] sm:$0xff] }
  0xfb   : > { %1478 = vmatpush1.msra.mxu0 %v641_v12  ;;  %1549 = vmatpush1.msra.mxu1 %v643_v13  ;;  %v1025_v12 = vld [vmem:[#allocation5 + $0x16c0] sm:$0xff]  ;;  %v1027_v13 = vld [vmem:[#allocation5 + $0x16d0] sm:$0xff] }
  0xfc   : > { %1479 = vmatprep.subr.mxu0 %v618_v14  ;;  %1550 = vmatprep.subr.mxu1 %v620_v15  ;;  %v1002_v14 = vld [vmem:[#allocation5 + $0x1608] sm:$0xff]  ;;  %v1004_v15 = vld [vmem:[#allocation5 + $0x1618] sm:$0xff] }
  0xfd   : > { %1480 = vmatpush1.msra.mxu0 %v617_v16  ;;  %1551 = vmatpush1.msra.mxu1 %v619_v63  ;;  %v1001_v16 = vld [vmem:[#allocation5 + $0x1600] sm:$0xff]  ;;  %v1003_v63 = vld [vmem:[#allocation5 + $0x1610] sm:$0xff] }
  0xfe   : > { %1481 = vmatprep.subr.mxu0 %v594_v17  ;;  %1552 = vmatprep.subr.mxu1 %v596_v18  ;;  %v978_v17 = vld [vmem:[#allocation5 + $0x1548] sm:$0xff]  ;;  %v980_v18 = vld [vmem:[#allocation5 + $0x1558] sm:$0xff] }
  0xff   : > { %1482 = vmatpush1.msra.mxu0 %v593_v1  ;;  %1553 = vmatpush1.msra.mxu1 %v595_v19  ;;  %v977_v1 = vld [vmem:[#allocation5 + $0x1540] sm:$0xff]  ;;  %v979_v19 = vld [vmem:[#allocation5 + $0x1550] sm:$0xff] }
 0x100   : > { %1483 = vmatprep.subr.mxu0 %v570_v20  ;;  %1554 = vmatprep.subr.mxu1 %v572_v21  ;;  %v954_v20 = vld [vmem:[#allocation5 + $0x1488] sm:$0xff]  ;;  %v956_v21 = vld [vmem:[#allocation5 + $0x1498] sm:$0xff] }
 0x101   : > { %1484 = vmatpush1.msra.mxu0 %v569_v22  ;;  %1555 = vmatpush1.msra.mxu1 %v571_v23  ;;  %v953_v22 = vld [vmem:[#allocation5 + $0x1480] sm:$0xff]  ;;  %v955_v23 = vld [vmem:[#allocation5 + $0x1490] sm:$0xff] }
 0x102   : > { %1485 = vmatprep.subr.mxu0 %v546_v24  ;;  %1556 = vmatprep.subr.mxu1 %v548_v25  ;;  %v930_v24 = vld [vmem:[#allocation5 + $0x13c8] sm:$0xff]  ;;  %v932_v25 = vld [vmem:[#allocation5 + $0x13d8] sm:$0xff] }
 0x103   : > { %1486 = vmatpush1.msra.mxu0 %v545_v26  ;;  %1557 = vmatpush1.msra.mxu1 %v547_v27  ;;  %v929_v26 = vld [vmem:[#allocation5 + $0x13c0] sm:$0xff]  ;;  %v931_v27 = vld [vmem:[#allocation5 + $0x13d0] sm:$0xff] }
 0x104   : > { %1487 = vmatprep.subr.mxu0 %v522_v28  ;;  %1558 = vmatprep.subr.mxu1 %v524_v29  ;;  %v906_v28 = vld [vmem:[#allocation5 + $0x1308] sm:$0xff]  ;;  %v908_v29 = vld [vmem:[#allocation5 + $0x1318] sm:$0xff] }
 0x105   : > { %1488 = vmatpush1.msra.mxu0 %v521_v30  ;;  %1559 = vmatpush1.msra.mxu1 %v523_v31  ;;  %v905_v30 = vld [vmem:[#allocation5 + $0x1300] sm:$0xff]  ;;  %v907_v31 = vld [vmem:[#allocation5 + $0x1310] sm:$0xff] }
 0x106   : > { %1489 = vmatprep.subr.mxu0 %v498_v32  ;;  %1560 = vmatprep.subr.mxu1 %v500_v33  ;;  %v882_v32 = vld [vmem:[#allocation5 + $0x1248] sm:$0xff]  ;;  %v884_v33 = vld [vmem:[#allocation5 + $0x1258] sm:$0xff] }
 0x107   : > { %1490 = vmatpush1.msra.mxu0 %v497_v34  ;;  %1561 = vmatpush1.msra.mxu1 %v499_v35  ;;  %v881_v34 = vld [vmem:[#allocation5 + $0x1240] sm:$0xff]  ;;  %v883_v35 = vld [vmem:[#allocation5 + $0x1250] sm:$0xff] }
 0x108   : > { %1491 = vmatprep.subr.mxu0 %v474_v36  ;;  %1562 = vmatprep.subr.mxu1 %v476_v37  ;;  %v858_v36 = vld [vmem:[#allocation5 + $0x1188] sm:$0xff]  ;;  %v860_v37 = vld [vmem:[#allocation5 + $0x1198] sm:$0xff] }
 0x109   : > { %1492 = vmatpush1.msra.mxu0 %v473_v38  ;;  %1563 = vmatpush1.msra.mxu1 %v475_v39  ;;  %v857_v38 = vld [vmem:[#allocation5 + $0x1180] sm:$0xff]  ;;  %v859_v39 = vld [vmem:[#allocation5 + $0x1190] sm:$0xff] }
 0x10a   : > { %1493 = vmatprep.subr.mxu0 %v450_v40  ;;  %1564 = vmatprep.subr.mxu1 %v452_v41  ;;  %v834_v40 = vld [vmem:[#allocation5 + $0x10c8] sm:$0xff]  ;;  %v836_v41 = vld [vmem:[#allocation5 + $0x10d8] sm:$0xff] }
 0x10b   : > { %1494 = vmatpush1.msra.mxu0 %v449_v42  ;;  %1565 = vmatpush1.msra.mxu1 %v451_v43  ;;  %v833_v42 = vld [vmem:[#allocation5 + $0x10c0] sm:$0xff]  ;;  %v835_v43 = vld [vmem:[#allocation5 + $0x10d0] sm:$0xff] }
 0x10c   : > { %1495 = vmatprep.subr.mxu0 %v426_v44  ;;  %1566 = vmatprep.subr.mxu1 %v428_v45  ;;  %v810_v44 = vld [vmem:[#allocation5 + $0x1008] sm:$0xff]  ;;  %v812_v45 = vld [vmem:[#allocation5 + $0x1018] sm:$0xff] }
 0x10d   : > { %1496 = vmatpush1.msra.mxu0 %v425_v46  ;;  %1567 = vmatpush1.msra.mxu1 %v427_v47  ;;  %v809_v46 = vld [vmem:[#allocation5 + $0x1000] sm:$0xff]  ;;  %v811_v47 = vld [vmem:[#allocation5 + $0x1010] sm:$0xff] }
 0x10e   : > { %1497 = vmatprep.subr.mxu0 %v402_v48  ;;  %1568 = vmatprep.subr.mxu1 %v404_v49  ;;  %v786_v48 = vld [vmem:[#allocation5 + $0xf48] sm:$0xff]  ;;  %v788_v49 = vld [vmem:[#allocation5 + $0xf58] sm:$0xff] }
 0x10f   : > { %1498 = vmatpush1.msra.mxu0 %v401_v50  ;;  %1569 = vmatpush1.msra.mxu1 %v403_v51  ;;  %v785_v50 = vld [vmem:[#allocation5 + $0xf40] sm:$0xff]  ;;  %v787_v51 = vld [vmem:[#allocation5 + $0xf50] sm:$0xff] }
 0x110   : > { %1499 = vmatprep.subr.mxu0 %v378_v52  ;;  %1570 = vmatprep.subr.mxu1 %v380_v53  ;;  %v762_v52 = vld [vmem:[#allocation5 + $0xe88] sm:$0xff]  ;;  %v764_v53 = vld [vmem:[#allocation5 + $0xe98] sm:$0xff] }
 0x111   : > { %1500 = vmatpush1.msra.mxu0 %v377_v54  ;;  %1571 = vmatpush1.msra.mxu1 %v379_v55  ;;  %v761_v54 = vld [vmem:[#allocation5 + $0xe80] sm:$0xff]  ;;  %v763_v55 = vld [vmem:[#allocation5 + $0xe90] sm:$0xff] }
 0x112   : > { %1501 = vmatprep.subr.mxu0 %v354_v56  ;;  %1572 = vmatprep.subr.mxu1 %v356_v57  ;;  %v738_v56 = vld [vmem:[#allocation5 + $0xdc8] sm:$0xff]  ;;  %v740_v57 = vld [vmem:[#allocation5 + $0xdd8] sm:$0xff] }
 0x113   : > { %1502 = vmatpush1.msra.mxu0 %v353_v58  ;;  %1573 = vmatpush1.msra.mxu1 %v355_v59  ;;  %v737_v58 = vld [vmem:[#allocation5 + $0xdc0] sm:$0xff]  ;;  %v739_v59 = vld [vmem:[#allocation5 + $0xdd0] sm:$0xff] }
 0x114   : > { %1503 = vmatprep.subr.mxu0 %v330_v60  ;;  %1574 = vmatprep.subr.mxu1 %v332_v61  ;;  %v714_v60 = vld [vmem:[#allocation5 + $0xd08] sm:$0xff]  ;;  %v716_v61 = vld [vmem:[#allocation5 + $0xd18] sm:$0xff] }
 0x115   : > { %1504 = vmatpush1.msra.mxu0 %v329_v62  ;;  %1575 = vmatpush1.msra.mxu1 %v331_v0  ;;  %v713_v62 = vld [vmem:[#allocation5 + $0xd00] sm:$0xff]  ;;  %v715_v0 = vld [vmem:[#allocation5 + $0xd10] sm:$0xff] }
 0x116   : > { %1505 = vmatprep.subr.mxu0 %v306_v2  ;;  %1576 = vmatprep.subr.mxu1 %v308_v3  ;;  %v690_v2 = vld [vmem:[#allocation5 + $0xc48] sm:$0xff]  ;;  %v692_v3 = vld [vmem:[#allocation5 + $0xc58] sm:$0xff] }
 0x117   : > { %1506 = vmatpush1.msra.mxu0 %v305_v4  ;;  %1577 = vmatpush1.msra.mxu1 %v307_v5  ;;  %v689_v4 = vld [vmem:[#allocation5 + $0xc40] sm:$0xff]  ;;  %v691_v5 = vld [vmem:[#allocation5 + $0xc50] sm:$0xff] }
 0x118   : > { %1507 = vmatprep.subr.mxu0 %v1050_v6  ;;  %1578 = vmatprep.subr.mxu1 %v1052_v7  ;;  %v4615_v6 = vld [vmem:[%s4586_s16 + $0x8] sm:$0xff] }
 0x119   : > { %1508 = vmatpush2.msra.mxu0 %v1049_v8  ;;  %1579 = vmatpush2.msra.mxu1 %v1051_v9  ;;  %v670_v7 = vld [vmem:[#allocation5 + $0xba8] sm:$0xff]  ;;  %v672_v8 = vld [vmem:[#allocation5 + $0xbb8] sm:$0xff]  ;;  %v669_v9 = vld [vmem:[#allocation5 + $0xba0] sm:$0xff] }
 0x11a   : > { %1509 = vmatprep.subr.mxu0 %v1026_v10  ;;  %1580 = vmatprep.subr.mxu1 %v1028_v11  ;;  %v671_v10 = vld [vmem:[#allocation5 + $0xbb0] sm:$0xff] }
 0x11b   : > { %1510 = vmatpush2.msra.mxu0 %v1025_v12  ;;  %1581 = vmatpush2.msra.mxu1 %v1027_v13  ;;  %v4620_v11 = vld [vmem:[%s4586_s16] sm:$0xff]  ;;  %v646_v12 = vld [vmem:[#allocation5 + $0xae8] sm:$0xff]  ;;  %v648_v13 = vld [vmem:[#allocation5 + $0xaf8] sm:$0xff] }
 0x11c   : > { %1511 = vmatprep.subr.mxu0 %v1002_v14  ;;  %1582 = vmatprep.subr.mxu1 %v1004_v15  ;;  %v645_v14 = vld [vmem:[#allocation5 + $0xae0] sm:$0xff]  ;;  %v647_v15 = vld [vmem:[#allocation5 + $0xaf0] sm:$0xff] }
 0x11d   : > { %1512 = vmatpush2.msra.mxu0 %v1001_v16  ;;  %1583 = vmatpush2.msra.mxu1 %v1003_v63  ;;  %v622_v16 = vld [vmem:[#allocation5 + $0xa28] sm:$0xff]  ;;  %v624_v63 = vld [vmem:[#allocation5 + $0xa38] sm:$0xff] }
 0x11e   : > { %1513 = vmatprep.subr.mxu0 %v978_v17  ;;  %1584 = vmatprep.subr.mxu1 %v980_v18  ;;  %v621_v17 = vld [vmem:[#allocation5 + $0xa20] sm:$0xff]  ;;  %v623_v18 = vld [vmem:[#allocation5 + $0xa30] sm:$0xff] }
 0x11f   : > { %1514 = vmatpush2.msra.mxu0 %v977_v1  ;;  %1585 = vmatpush2.msra.mxu1 %v979_v19  ;;  %v598_v1 = vld [vmem:[#allocation5 + $0x968] sm:$0xff]  ;;  %v600_v19 = vld [vmem:[#allocation5 + $0x978] sm:$0xff] }
 0x120   : > { %1515 = vmatprep.subr.mxu0 %v954_v20  ;;  %1586 = vmatprep.subr.mxu1 %v956_v21  ;;  %v597_v20 = vld [vmem:[#allocation5 + $0x960] sm:$0xff]  ;;  %v599_v21 = vld [vmem:[#allocation5 + $0x970] sm:$0xff] }
 0x121   : > { %1516 = vmatpush2.msra.mxu0 %v953_v22  ;;  %1587 = vmatpush2.msra.mxu1 %v955_v23  ;;  %v574_v22 = vld [vmem:[#allocation5 + $0x8a8] sm:$0xff]  ;;  %v576_v23 = vld [vmem:[#allocation5 + $0x8b8] sm:$0xff] }
 0x122   : > { %1517 = vmatprep.subr.mxu0 %v930_v24  ;;  %1588 = vmatprep.subr.mxu1 %v932_v25  ;;  %v573_v24 = vld [vmem:[#allocation5 + $0x8a0] sm:$0xff]  ;;  %v575_v25 = vld [vmem:[#allocation5 + $0x8b0] sm:$0xff] }
 0x123   : > { %1518 = vmatpush2.msra.mxu0 %v929_v26  ;;  %1589 = vmatpush2.msra.mxu1 %v931_v27  ;;  %v550_v26 = vld [vmem:[#allocation5 + $0x7e8] sm:$0xff]  ;;  %v552_v27 = vld [vmem:[#allocation5 + $0x7f8] sm:$0xff] }
 0x124   : > { %1519 = vmatprep.subr.mxu0 %v906_v28  ;;  %1590 = vmatprep.subr.mxu1 %v908_v29  ;;  %v549_v28 = vld [vmem:[#allocation5 + $0x7e0] sm:$0xff]  ;;  %v551_v29 = vld [vmem:[#allocation5 + $0x7f0] sm:$0xff] }
 0x125   : > { %1520 = vmatpush2.msra.mxu0 %v905_v30  ;;  %1591 = vmatpush2.msra.mxu1 %v907_v31  ;;  %v526_v30 = vld [vmem:[#allocation5 + $0x728] sm:$0xff]  ;;  %v528_v31 = vld [vmem:[#allocation5 + $0x738] sm:$0xff] }
 0x126   : > { %1521 = vmatprep.subr.mxu0 %v882_v32  ;;  %1592 = vmatprep.subr.mxu1 %v884_v33  ;;  %v525_v32 = vld [vmem:[#allocation5 + $0x720] sm:$0xff]  ;;  %v527_v33 = vld [vmem:[#allocation5 + $0x730] sm:$0xff] }
 0x127   : > { %1522 = vmatpush2.msra.mxu0 %v881_v34  ;;  %1593 = vmatpush2.msra.mxu1 %v883_v35  ;;  %v502_v34 = vld [vmem:[#allocation5 + $0x668] sm:$0xff]  ;;  %v504_v35 = vld [vmem:[#allocation5 + $0x678] sm:$0xff] }
 0x128   : > { %1523 = vmatprep.subr.mxu0 %v858_v36  ;;  %1594 = vmatprep.subr.mxu1 %v860_v37  ;;  %v501_v36 = vld [vmem:[#allocation5 + $0x660] sm:$0xff]  ;;  %v503_v37 = vld [vmem:[#allocation5 + $0x670] sm:$0xff] }
 0x129   : > { %1524 = vmatpush2.msra.mxu0 %v857_v38  ;;  %1595 = vmatpush2.msra.mxu1 %v859_v39  ;;  %v478_v38 = vld [vmem:[#allocation5 + $0x5a8] sm:$0xff]  ;;  %v480_v39 = vld [vmem:[#allocation5 + $0x5b8] sm:$0xff] }
 0x12a   : > { %1525 = vmatprep.subr.mxu0 %v834_v40  ;;  %1596 = vmatprep.subr.mxu1 %v836_v41  ;;  %v477_v40 = vld [vmem:[#allocation5 + $0x5a0] sm:$0xff]  ;;  %v479_v41 = vld [vmem:[#allocation5 + $0x5b0] sm:$0xff] }
 0x12b   : > { %1526 = vmatpush2.msra.mxu0 %v833_v42  ;;  %1597 = vmatpush2.msra.mxu1 %v835_v43  ;;  %v454_v42 = vld [vmem:[#allocation5 + $0x4e8] sm:$0xff]  ;;  %v456_v43 = vld [vmem:[#allocation5 + $0x4f8] sm:$0xff] }
 0x12c   : > { %1527 = vmatprep.subr.mxu0 %v810_v44  ;;  %1598 = vmatprep.subr.mxu1 %v812_v45  ;;  %v453_v44 = vld [vmem:[#allocation5 + $0x4e0] sm:$0xff]  ;;  %v455_v45 = vld [vmem:[#allocation5 + $0x4f0] sm:$0xff] }
 0x12d   : > { %1528 = vmatpush2.msra.mxu0 %v809_v46  ;;  %1599 = vmatpush2.msra.mxu1 %v811_v47  ;;  %v430_v46 = vld [vmem:[#allocation5 + $0x428] sm:$0xff]  ;;  %v432_v47 = vld [vmem:[#allocation5 + $0x438] sm:$0xff] }
 0x12e   : > { %1529 = vmatprep.subr.mxu0 %v786_v48  ;;  %1600 = vmatprep.subr.mxu1 %v788_v49  ;;  %v429_v48 = vld [vmem:[#allocation5 + $0x420] sm:$0xff]  ;;  %v431_v49 = vld [vmem:[#allocation5 + $0x430] sm:$0xff] }
 0x12f   : > { %1530 = vmatpush2.msra.mxu0 %v785_v50  ;;  %1601 = vmatpush2.msra.mxu1 %v787_v51  ;;  %v406_v50 = vld [vmem:[#allocation5 + $0x368] sm:$0xff]  ;;  %v408_v51 = vld [vmem:[#allocation5 + $0x378] sm:$0xff] }
 0x130   : > { %1531 = vmatprep.subr.mxu0 %v762_v52  ;;  %1602 = vmatprep.subr.mxu1 %v764_v53  ;;  %v405_v52 = vld [vmem:[#allocation5 + $0x360] sm:$0xff]  ;;  %v407_v53 = vld [vmem:[#allocation5 + $0x370] sm:$0xff] }
 0x131   : > { %1532 = vmatpush2.msra.mxu0 %v761_v54  ;;  %1603 = vmatpush2.msra.mxu1 %v763_v55  ;;  %v382_v54 = vld [vmem:[#allocation5 + $0x2a8] sm:$0xff]  ;;  %v384_v55 = vld [vmem:[#allocation5 + $0x2b8] sm:$0xff] }
 0x132   : > { %1533 = vmatprep.subr.mxu0 %v738_v56  ;;  %1604 = vmatprep.subr.mxu1 %v740_v57  ;;  %v381_v56 = vld [vmem:[#allocation5 + $0x2a0] sm:$0xff]  ;;  %v383_v57 = vld [vmem:[#allocation5 + $0x2b0] sm:$0xff] }
 0x133   : > { %1534 = vmatpush2.msra.mxu0 %v737_v58  ;;  %1605 = vmatpush2.msra.mxu1 %v739_v59  ;;  %v358_v58 = vld [vmem:[#allocation5 + $0x1e8] sm:$0xff]  ;;  %v360_v59 = vld [vmem:[#allocation5 + $0x1f8] sm:$0xff] }
 0x134   : > { %1535 = vmatprep.subr.mxu0 %v714_v60  ;;  %1606 = vmatprep.subr.mxu1 %v716_v61  ;;  %v357_v60 = vld [vmem:[#allocation5 + $0x1e0] sm:$0xff]  ;;  %v359_v61 = vld [vmem:[#allocation5 + $0x1f0] sm:$0xff] }
 0x135   : > { %1536 = vmatpush2.msra.mxu0 %v713_v62  ;;  %1607 = vmatpush2.msra.mxu1 %v715_v0  ;;  %v334_v62 = vld [vmem:[#allocation5 + $0x128] sm:$0xff]  ;;  %v336_v0 = vld [vmem:[#allocation5 + $0x138] sm:$0xff] }
 0x136   : > { %1537 = vmatprep.subr.mxu0 %v690_v2  ;;  %1608 = vmatprep.subr.mxu1 %v692_v3  ;;  %v333_v2 = vld [vmem:[#allocation5 + $0x120] sm:$0xff]  ;;  %v335_v3 = vld [vmem:[#allocation5 + $0x130] sm:$0xff] }
 0x137   : > { %1538 = vmatpush2.msra.mxu0 %v689_v4  ;;  %1539 = vmatprep.mubr.f32.mxu0 %v4615_v6  ;;  %v310_v4 = vld [vmem:[#allocation5 + $0x68] sm:$0xff] }
 0x138   : > { %1609 = vmatpush2.msra.mxu1 %v691_v5  ;;  %1610 = vmatprep.mubr.f32.mxu1 %v4615_v6  ;;  %v312_v5 = vld [vmem:[#allocation5 + $0x78] sm:$0xff] }
 0x139   : > { %1540 = vmatmul.mubr.f32.vlgmr.msra.gmra.mxu0 %v4620_v11  ;;  %1611 = vmatmul.mubr.f32.vlgmr.msra.gmra.mxu1 %v4620_v11 }
 0x13a   : > { %1617 = vmatprep.subr.mxu0 %v670_v7  ;;  %1688 = vmatprep.subr.mxu1 %v672_v8  ;;  %v309_v7 = vld [vmem:[#allocation5 + $0x60] sm:$0xff]  ;;  %v311_v8 = vld [vmem:[#allocation5 + $0x70] sm:$0xff] }
 0x13b   : > { %1618 = vmatpush1.msra.mxu0 %v669_v9  ;;  %1689 = vmatpush1.msra.mxu1 %v671_v10  ;;  %v1054_v9 = vld [vmem:[#allocation5 + $0x17a8] sm:$0xff]  ;;  %v1056_v10 = vld [vmem:[#allocation5 + $0x17b8] sm:$0xff] }
 0x13c   : > { %1619 = vmatprep.subr.mxu0 %v646_v12  ;;  %1690 = vmatprep.subr.mxu1 %v648_v13  ;;  %v1053_v12 = vld [vmem:[#allocation5 + $0x17a0] sm:$0xff]  ;;  %v1055_v13 = vld [vmem:[#allocation5 + $0x17b0] sm:$0xff] }
 0x13d   : > { %1620 = vmatpush1.msra.mxu0 %v645_v14  ;;  %1691 = vmatpush1.msra.mxu1 %v647_v15  ;;  %v1030_v14 = vld [vmem:[#allocation5 + $0x16e8] sm:$0xff]  ;;  %v1032_v15 = vld [vmem:[#allocation5 + $0x16f8] sm:$0xff] }
 0x13e   : > { %1621 = vmatprep.subr.mxu0 %v622_v16  ;;  %1692 = vmatprep.subr.mxu1 %v624_v63  ;;  %v1029_v16 = vld [vmem:[#allocation5 + $0x16e0] sm:$0xff]  ;;  %v1031_v63 = vld [vmem:[#allocation5 + $0x16f0] sm:$0xff] }
 0x13f   : > { %1622 = vmatpush1.msra.mxu0 %v621_v17  ;;  %1693 = vmatpush1.msra.mxu1 %v623_v18  ;;  %v1006_v17 = vld [vmem:[#allocation5 + $0x1628] sm:$0xff]  ;;  %v1008_v18 = vld [vmem:[#allocation5 + $0x1638] sm:$0xff] }
 0x140   : > { %1623 = vmatprep.subr.mxu0 %v598_v1  ;;  %1694 = vmatprep.subr.mxu1 %v600_v19  ;;  %v1005_v1 = vld [vmem:[#allocation5 + $0x1620] sm:$0xff]  ;;  %v1007_v19 = vld [vmem:[#allocation5 + $0x1630] sm:$0xff] }
 0x141   : > { %1624 = vmatpush1.msra.mxu0 %v597_v20  ;;  %1695 = vmatpush1.msra.mxu1 %v599_v21  ;;  %v982_v20 = vld [vmem:[#allocation5 + $0x1568] sm:$0xff]  ;;  %v984_v21 = vld [vmem:[#allocation5 + $0x1578] sm:$0xff] }
 0x142   : > { %1625 = vmatprep.subr.mxu0 %v574_v22  ;;  %1696 = vmatprep.subr.mxu1 %v576_v23  ;;  %v981_v22 = vld [vmem:[#allocation5 + $0x1560] sm:$0xff]  ;;  %v983_v23 = vld [vmem:[#allocation5 + $0x1570] sm:$0xff] }
 0x143   : > { %1626 = vmatpush1.msra.mxu0 %v573_v24  ;;  %1697 = vmatpush1.msra.mxu1 %v575_v25  ;;  %v958_v24 = vld [vmem:[#allocation5 + $0x14a8] sm:$0xff]  ;;  %v960_v25 = vld [vmem:[#allocation5 + $0x14b8] sm:$0xff] }
 0x144   : > { %1627 = vmatprep.subr.mxu0 %v550_v26  ;;  %1698 = vmatprep.subr.mxu1 %v552_v27  ;;  %v957_v26 = vld [vmem:[#allocation5 + $0x14a0] sm:$0xff]  ;;  %v959_v27 = vld [vmem:[#allocation5 + $0x14b0] sm:$0xff] }
 0x145   : > { %1628 = vmatpush1.msra.mxu0 %v549_v28  ;;  %1699 = vmatpush1.msra.mxu1 %v551_v29  ;;  %v934_v28 = vld [vmem:[#allocation5 + $0x13e8] sm:$0xff]  ;;  %v936_v29 = vld [vmem:[#allocation5 + $0x13f8] sm:$0xff] }
 0x146   : > { %1629 = vmatprep.subr.mxu0 %v526_v30  ;;  %1700 = vmatprep.subr.mxu1 %v528_v31  ;;  %v933_v30 = vld [vmem:[#allocation5 + $0x13e0] sm:$0xff]  ;;  %v935_v31 = vld [vmem:[#allocation5 + $0x13f0] sm:$0xff] }
 0x147   : > { %1630 = vmatpush1.msra.mxu0 %v525_v32  ;;  %1701 = vmatpush1.msra.mxu1 %v527_v33  ;;  %v910_v32 = vld [vmem:[#allocation5 + $0x1328] sm:$0xff]  ;;  %v912_v33 = vld [vmem:[#allocation5 + $0x1338] sm:$0xff] }
 0x148   : > { %1631 = vmatprep.subr.mxu0 %v502_v34  ;;  %1702 = vmatprep.subr.mxu1 %v504_v35  ;;  %v909_v34 = vld [vmem:[#allocation5 + $0x1320] sm:$0xff]  ;;  %v911_v35 = vld [vmem:[#allocation5 + $0x1330] sm:$0xff] }
 0x149   : > { %1632 = vmatpush1.msra.mxu0 %v501_v36  ;;  %1703 = vmatpush1.msra.mxu1 %v503_v37  ;;  %v886_v36 = vld [vmem:[#allocation5 + $0x1268] sm:$0xff]  ;;  %v888_v37 = vld [vmem:[#allocation5 + $0x1278] sm:$0xff] }
 0x14a   : > { %1633 = vmatprep.subr.mxu0 %v478_v38  ;;  %1704 = vmatprep.subr.mxu1 %v480_v39  ;;  %v885_v38 = vld [vmem:[#allocation5 + $0x1260] sm:$0xff]  ;;  %v887_v39 = vld [vmem:[#allocation5 + $0x1270] sm:$0xff] }
 0x14b   : > { %1634 = vmatpush1.msra.mxu0 %v477_v40  ;;  %1705 = vmatpush1.msra.mxu1 %v479_v41  ;;  %v1071_v40 = vlaneseq  ;;  %v862_v41 = vld [vmem:[#allocation5 + $0x11a8] sm:$0xff] }
 0x14c   : > { %1635 = vmatprep.subr.mxu0 %v454_v42  ;;  %1706 = vmatprep.subr.mxu1 %v456_v43  ;;  %v864_v42 = vld [vmem:[#allocation5 + $0x11b8] sm:$0xff]  ;;  %v861_v43 = vld [vmem:[#allocation5 + $0x11a0] sm:$0xff] }
 0x14d   : > { %1636 = vmatpush1.msra.mxu0 %v453_v44  ;;  %1707 = vmatpush1.msra.mxu1 %v455_v45  ;;  %v863_v44 = vld [vmem:[#allocation5 + $0x11b0] sm:$0xff]  ;;  %v838_v45 = vld [vmem:[#allocation5 + $0x10e8] sm:$0xff] }
 0x14e   : > { %1637 = vmatprep.subr.mxu0 %v430_v46  ;;  %1708 = vmatprep.subr.mxu1 %v432_v47  ;;  %v840_v46 = vld [vmem:[#allocation5 + $0x10f8] sm:$0xff]  ;;  %v837_v47 = vld [vmem:[#allocation5 + $0x10e0] sm:$0xff] }
 0x14f   : > { %1638 = vmatpush1.msra.mxu0 %v429_v48  ;;  %1709 = vmatpush1.msra.mxu1 %v431_v49  ;;  %v839_v48 = vld [vmem:[#allocation5 + $0x10f0] sm:$0xff]  ;;  %v4624_v49 = vshrl.u32 %v1071_v40, 7  ;;  %v556_v40 = vld [vmem:[#allocation5 + $0x818] sm:$0xff] }
 0x150   : > { %1639 = vmatprep.subr.mxu0 %v406_v50  ;;  %1710 = vmatprep.subr.mxu1 %v408_v51  ;;  %v814_v50 = vld [vmem:[#allocation5 + $0x1028] sm:$0xff]  ;;  %v816_v51 = vld [vmem:[#allocation5 + $0x1038] sm:$0xff] }
 0x151   : > { %1640 = vmatpush1.msra.mxu0 %v405_v52  ;;  %1711 = vmatpush1.msra.mxu1 %v407_v53  ;;  %v813_v52 = vld [vmem:[#allocation5 + $0x1020] sm:$0xff]  ;;  %v815_v53 = vld [vmem:[#allocation5 + $0x1030] sm:$0xff] }
 0x152   : > { %1641 = vmatprep.subr.mxu0 %v382_v54  ;;  %1712 = vmatprep.subr.mxu1 %v384_v55  ;;  %v790_v54 = vld [vmem:[#allocation5 + $0xf68] sm:$0xff]  ;;  %v792_v55 = vld [vmem:[#allocation5 + $0xf78] sm:$0xff] }
 0x153   : > { %1642 = vmatpush1.msra.mxu0 %v381_v56  ;;  %1713 = vmatpush1.msra.mxu1 %v383_v57  ;;  %v789_v56 = vld [vmem:[#allocation5 + $0xf60] sm:$0xff]  ;;  %v791_v57 = vld [vmem:[#allocation5 + $0xf70] sm:$0xff] }
 0x154   : > { %1643 = vmatprep.subr.mxu0 %v358_v58  ;;  %1714 = vmatprep.subr.mxu1 %v360_v59  ;;  %v4627_v58 = vsub.s32 0, %v4624_v49  ;;  %v4630_v59 = vsub.s32 2, %v4624_v49 }
 0x155   : > { %1644 = vmatpush1.msra.mxu0 %v357_v60  ;;  %1715 = vmatpush1.msra.mxu1 %v359_v61  ;;  %v766_v60 = vld [vmem:[#allocation5 + $0xea8] sm:$0xff]  ;;  %v768_v61 = vld [vmem:[#allocation5 + $0xeb8] sm:$0xff] }
 0x156   : > { %1645 = vmatprep.subr.mxu0 %v334_v62  ;;  %1716 = vmatprep.subr.mxu1 %v336_v0  ;;  %v4632_v62 = vld [vmem:[#allocation7] sm:$0xff] }
 0x157   : > { %1646 = vmatpush1.msra.mxu0 %v333_v2  ;;  %1717 = vmatpush1.msra.mxu1 %v335_v3  ;;  %v765_v0 = vld [vmem:[#allocation5 + $0xea0] sm:$0xff]  ;;  %v767_v2 = vld [vmem:[#allocation5 + $0xeb0] sm:$0xff]  ;;  %v742_v3 = vld [vmem:[#allocation5 + $0xde8] sm:$0xff] }
 0x158   : > { %1647 = vmatprep.subr.mxu0 %v310_v4  ;;  %1718 = vmatprep.subr.mxu1 %v312_v5  ;;  %v744_v4 = vld [vmem:[#allocation5 + $0xdf8] sm:$0xff]  ;;  %v741_v5 = vld [vmem:[#allocation5 + $0xde0] sm:$0xff] }
 0x159   : > { %1648 = vmatpush1.msra.mxu0 %v309_v7  ;;  %1719 = vmatpush1.msra.mxu1 %v311_v8  ;;  %v743_v7 = vld [vmem:[#allocation5 + $0xdf0] sm:$0xff]  ;;  %v1074_v8 = vrot.slane %v4632_v62, %v4627_v58 }
 0x15a   : > { %1649 = vmatprep.subr.mxu0 %v1054_v9  ;;  %1720 = vmatprep.subr.mxu1 %v1056_v10  ;;  %v1082_v9 = vrot.slane %v4632_v62, %v4630_v59  ;;  %v718_v10 = vld [vmem:[#allocation5 + $0xd28] sm:$0xff] }
 0x15b   : > { %1650 = vmatpush2.msra.mxu0 %v1053_v12  ;;  %1721 = vmatpush2.msra.mxu1 %v1055_v13  ;;  %v720_v12 = vld [vmem:[#allocation5 + $0xd38] sm:$0xff]  ;;  %v717_v13 = vld [vmem:[#allocation5 + $0xd20] sm:$0xff] }
 0x15c   : > { %1651 = vmatprep.subr.mxu0 %v1030_v14  ;;  %1722 = vmatprep.subr.mxu1 %v1032_v15  ;;  %v719_v14 = vld [vmem:[#allocation5 + $0xd30] sm:$0xff]  ;;  %v694_v15 = vld [vmem:[#allocation5 + $0xc68] sm:$0xff] }
 0x15d   : > { %1652 = vmatpush2.msra.mxu0 %v1029_v16  ;;  %1723 = vmatpush2.msra.mxu1 %v1031_v63  ;;  %v696_v16 = vld [vmem:[#allocation5 + $0xc78] sm:$0xff] }
 0x15e   : > { %1653 = vmatprep.subr.mxu0 %v1006_v17  ;;  %1724 = vmatprep.subr.mxu1 %v1008_v18  ;;  %v693_v18 = vld [vmem:[#allocation5 + $0xc60] sm:$0xff] }
 0x15f   : > { %1654 = vmatpush2.msra.mxu0 %v1005_v1  ;;  %1725 = vmatpush2.msra.mxu1 %v1007_v19 }
 0x160   : > { %1655 = vmatprep.subr.mxu0 %v982_v20  ;;  %1726 = vmatprep.subr.mxu1 %v984_v21  ;;  %v695_v20 = vld [vmem:[#allocation5 + $0xc70] sm:$0xff]  ;;  %v674_v21 = vld [vmem:[#allocation5 + $0xbc8] sm:$0xff] }
 0x161   : > { %1656 = vmatpush2.msra.mxu0 %v981_v22  ;;  %1727 = vmatpush2.msra.mxu1 %v983_v23  ;;  %v676_v22 = vld [vmem:[#allocation5 + $0xbd8] sm:$0xff]  ;;  %v673_v23 = vld [vmem:[#allocation5 + $0xbc0] sm:$0xff] }
 0x162   : > { %1657 = vmatprep.subr.mxu0 %v958_v24  ;;  %1728 = vmatprep.subr.mxu1 %v960_v25  ;;  %v675_v24 = vld [vmem:[#allocation5 + $0xbd0] sm:$0xff]  ;;  %v650_v25 = vld [vmem:[#allocation5 + $0xb08] sm:$0xff] }
 0x163   : > { %1658 = vmatpush2.msra.mxu0 %v957_v26  ;;  %1729 = vmatpush2.msra.mxu1 %v959_v27  ;;  %v652_v26 = vld [vmem:[#allocation5 + $0xb18] sm:$0xff]  ;;  %v649_v27 = vld [vmem:[#allocation5 + $0xb00] sm:$0xff] }
 0x164   : > { %1659 = vmatprep.subr.mxu0 %v934_v28  ;;  %1730 = vmatprep.subr.mxu1 %v936_v29  ;;  %v651_v28 = vld [vmem:[#allocation5 + $0xb10] sm:$0xff]  ;;  %v626_v29 = vld [vmem:[#allocation5 + $0xa48] sm:$0xff] }
 0x165   : > { %1660 = vmatpush2.msra.mxu0 %v933_v30  ;;  %1731 = vmatpush2.msra.mxu1 %v935_v31  ;;  %v628_v30 = vld [vmem:[#allocation5 + $0xa58] sm:$0xff]  ;;  %v625_v31 = vld [vmem:[#allocation5 + $0xa40] sm:$0xff] }
 0x166   : > { %1661 = vmatprep.subr.mxu0 %v910_v32  ;;  %1732 = vmatprep.subr.mxu1 %v912_v33  ;;  %v602_v32 = vld [vmem:[#allocation5 + $0x988] sm:$0xff]  ;;  %v604_v33 = vld [vmem:[#allocation5 + $0x998] sm:$0xff] }
 0x167   : > { %1662 = vmatpush2.msra.mxu0 %v909_v34  ;;  %1733 = vmatpush2.msra.mxu1 %v911_v35  ;;  %v603_v34 = vld [vmem:[#allocation5 + $0x990] sm:$0xff]  ;;  %v578_v35 = vld [vmem:[#allocation5 + $0x8c8] sm:$0xff] }
 0x168   : > { %1663 = vmatprep.subr.mxu0 %v886_v36  ;;  %1734 = vmatprep.subr.mxu1 %v888_v37  ;;  %v580_v36 = vld [vmem:[#allocation5 + $0x8d8] sm:$0xff]  ;;  %v577_v37 = vld [vmem:[#allocation5 + $0x8c0] sm:$0xff] }
 0x169   : > { %1664 = vmatpush2.msra.mxu0 %v885_v38  ;;  %1735 = vmatpush2.msra.mxu1 %v887_v39  ;;  %v579_v38 = vld [vmem:[#allocation5 + $0x8d0] sm:$0xff]  ;;  %v554_v39 = vld [vmem:[#allocation5 + $0x808] sm:$0xff] }
 0x16a   : > { %1665 = vmatprep.subr.mxu0 %v862_v41  ;;  %1736 = vmatprep.subr.mxu1 %v864_v42  ;;  %v553_v41 = vld [vmem:[#allocation5 + $0x800] sm:$0xff]  ;;  %v555_v42 = vld [vmem:[#allocation5 + $0x810] sm:$0xff] }
 0x16b   : > { %1666 = vmatpush2.msra.mxu0 %v861_v43  ;;  %1737 = vmatpush2.msra.mxu1 %v863_v44  ;;  %v530_v43 = vld [vmem:[#allocation5 + $0x748] sm:$0xff]  ;;  %v532_v44 = vld [vmem:[#allocation5 + $0x758] sm:$0xff] }
 0x16c   : > { %1667 = vmatprep.subr.mxu0 %v838_v45  ;;  %1738 = vmatprep.subr.mxu1 %v840_v46  ;;  %v529_v45 = vld [vmem:[#allocation5 + $0x740] sm:$0xff]  ;;  %v531_v46 = vld [vmem:[#allocation5 + $0x750] sm:$0xff] }
 0x16d   : > { %1668 = vmatpush2.msra.mxu0 %v837_v47  ;;  %1739 = vmatpush2.msra.mxu1 %v839_v48  ;;  %v506_v47 = vld [vmem:[#allocation5 + $0x688] sm:$0xff]  ;;  %v508_v48 = vld [vmem:[#allocation5 + $0x698] sm:$0xff] }
 0x16e   : > { %1669 = vmatprep.subr.mxu0 %v814_v50  ;;  %1740 = vmatprep.subr.mxu1 %v816_v51  ;;  %v505_v50 = vld [vmem:[#allocation5 + $0x680] sm:$0xff]  ;;  %v507_v51 = vld [vmem:[#allocation5 + $0x690] sm:$0xff] }
 0x16f   : > { %1670 = vmatpush2.msra.mxu0 %v813_v52  ;;  %1741 = vmatpush2.msra.mxu1 %v815_v53  ;;  %v482_v52 = vld [vmem:[#allocation5 + $0x5c8] sm:$0xff]  ;;  %v484_v53 = vld [vmem:[#allocation5 + $0x5d8] sm:$0xff] }
 0x170   : > { %1671 = vmatprep.subr.mxu0 %v790_v54  ;;  %1742 = vmatprep.subr.mxu1 %v792_v55  ;;  %v481_v54 = vld [vmem:[#allocation5 + $0x5c0] sm:$0xff]  ;;  %v483_v55 = vld [vmem:[#allocation5 + $0x5d0] sm:$0xff] }
 0x171   : > { %1672 = vmatpush2.msra.mxu0 %v789_v56  ;;  %1743 = vmatpush2.msra.mxu1 %v791_v57  ;;  %v458_v56 = vld [vmem:[#allocation5 + $0x508] sm:$0xff]  ;;  %v460_v57 = vld [vmem:[#allocation5 + $0x518] sm:$0xff] }
 0x172   : > { %1673 = vmatprep.subr.mxu0 %v766_v60  ;;  %1744 = vmatprep.subr.mxu1 %v768_v61  ;;  %v457_v60 = vld [vmem:[#allocation5 + $0x500] sm:$0xff]  ;;  %v459_v61 = vld [vmem:[#allocation5 + $0x510] sm:$0xff] }
 0x173   : > { %1674 = vmatpush2.msra.mxu0 %v765_v0  ;;  %1745 = vmatpush2.msra.mxu1 %v767_v2  ;;  %v434_v0 = vld [vmem:[#allocation5 + $0x448] sm:$0xff]  ;;  %v436_v2 = vld [vmem:[#allocation5 + $0x458] sm:$0xff] }
 0x174   : > { %1675 = vmatprep.subr.mxu0 %v742_v3  ;;  %1746 = vmatprep.subr.mxu1 %v744_v4  ;;  %v433_v3 = vld [vmem:[#allocation5 + $0x440] sm:$0xff]  ;;  %v435_v4 = vld [vmem:[#allocation5 + $0x450] sm:$0xff] }
 0x175   : > { %1676 = vmatpush2.msra.mxu0 %v741_v5  ;;  %1747 = vmatpush2.msra.mxu1 %v743_v7  ;;  %v1257_v63 = vpop.f32.mrf.mxu0  ;;  %v1328_v17 = vpop.f32.mrf.mxu1  ;;  %v410_v5 = vld [vmem:[#allocation5 + $0x388] sm:$0xff]  ;;  %v412_v7 = vld [vmem:[#allocation5 + $0x398] sm:$0xff] }
 0x176   : > { %1677 = vmatprep.subr.mxu0 %v718_v10  ;;  %1748 = vmatprep.subr.mxu1 %v720_v12  ;;  %v4638_v1 = vadd.f32 %v1257_v63, %v1074_v8  ;;  %v4640_v19 = vadd.f32 %v1328_v17, %v1082_v9  ;;  %v409_v8 = vld [vmem:[#allocation5 + $0x380] sm:$0xff]  ;;  %v411_v9 = vld [vmem:[#allocation5 + $0x390] sm:$0xff]  ;;  %v386_v10 = vld [vmem:[#allocation5 + $0x2c8] sm:$0xff] }
 0x177   : > { %1678 = vmatpush2.msra.mxu0 %v717_v13  ;;  %1749 = vmatpush2.msra.mxu1 %v719_v14  ;;  %v388_v12 = vld [vmem:[#allocation5 + $0x2d8] sm:$0xff]  ;;  %v385_v13 = vld [vmem:[#allocation5 + $0x2c0] sm:$0xff]  ;;  %v387_v14 = vld [vmem:[#allocation5 + $0x2d0] sm:$0xff] }
 0x178   : > { %1679 = vmatprep.subr.mxu0 %v694_v15  ;;  %1750 = vmatprep.subr.mxu1 %v696_v16  ;;  %v362_v15 = vld [vmem:[#allocation5 + $0x208] sm:$0xff]  ;;  %v364_v16 = vld [vmem:[#allocation5 + $0x218] sm:$0xff]  ;;  %v361_v63 = vld [vmem:[#allocation5 + $0x200] sm:$0xff] }
 0x179   : > { %1680 = vmatpush2.msra.mxu0 %v693_v18  ;;  %1681 = vmatprep.mubr.f32.mxu0 %v4615_v6  ;;  %v363_v17 = vld [vmem:[#allocation5 + $0x210] sm:$0xff]  ;;  %v338_v18 = vld [vmem:[#allocation5 + $0x148] sm:$0xff] }
 0x17a   : > { %1751 = vmatpush2.msra.mxu1 %v695_v20  ;;  %1752 = vmatprep.mubr.f32.mxu1 %v4615_v6  ;;  %v627_v6 = vld [vmem:[#allocation5 + $0xa50] sm:$0xff]  ;;  %v340_v20 = vld [vmem:[#allocation5 + $0x158] sm:$0xff] }
 0x17b   : > { %1682 = vmatmul.mubr.f32.vlgmr.msra.gmra.mxu0 %v4620_v11  ;;  %1753 = vmatmul.mubr.f32.vlgmr.msra.gmra.mxu1 %v4620_v11  ;;  %v601_v11 = vld [vmem:[#allocation5 + $0x980] sm:$0xff] }
 0x17c   : > { %1759 = vmatprep.subr.mxu0 %v674_v21  ;;  %1830 = vmatprep.subr.mxu1 %v676_v22  ;;  %v337_v21 = vld [vmem:[#allocation5 + $0x140] sm:$0xff]  ;;  %v339_v22 = vld [vmem:[#allocation5 + $0x150] sm:$0xff] }
 0x17d   : > { %1760 = vmatpush1.msra.mxu0 %v673_v23  ;;  %1831 = vmatpush1.msra.mxu1 %v675_v24  ;;  %v314_v23 = vld [vmem:[#allocation5 + $0x88] sm:$0xff]  ;;  %v316_v24 = vld [vmem:[#allocation5 + $0x98] sm:$0xff] }
 0x17e   : > { %1761 = vmatprep.subr.mxu0 %v650_v25  ;;  %1832 = vmatprep.subr.mxu1 %v652_v26  ;;  %v313_v25 = vld [vmem:[#allocation5 + $0x80] sm:$0xff]  ;;  %v315_v26 = vld [vmem:[#allocation5 + $0x90] sm:$0xff] }
 0x17f   : > { %1762 = vmatpush1.msra.mxu0 %v649_v27  ;;  %1833 = vmatpush1.msra.mxu1 %v651_v28  ;;  %v1058_v27 = vld [vmem:[#allocation5 + $0x17c8] sm:$0xff]  ;;  %v1060_v28 = vld [vmem:[#allocation5 + $0x17d8] sm:$0xff] }
 0x180   : > { %1763 = vmatprep.subr.mxu0 %v626_v29  ;;  %1834 = vmatprep.subr.mxu1 %v628_v30  ;;  %v1057_v29 = vld [vmem:[#allocation5 + $0x17c0] sm:$0xff]  ;;  %v1059_v30 = vld [vmem:[#allocation5 + $0x17d0] sm:$0xff] }
 0x181   : > { %1764 = vmatpush1.msra.mxu0 %v625_v31  ;;  %1835 = vmatpush1.msra.mxu1 %v627_v6  ;;  %v1034_v31 = vld [vmem:[#allocation5 + $0x1708] sm:$0xff]  ;;  %v1036_v6 = vld [vmem:[#allocation5 + $0x1718] sm:$0xff] }
 0x182   : > { %1765 = vmatprep.subr.mxu0 %v602_v32  ;;  %1836 = vmatprep.subr.mxu1 %v604_v33  ;;  %v1033_v32 = vld [vmem:[#allocation5 + $0x1700] sm:$0xff]  ;;  %v1035_v33 = vld [vmem:[#allocation5 + $0x1710] sm:$0xff] }
 0x183   : > { %1766 = vmatpush1.msra.mxu0 %v601_v11  ;;  %1837 = vmatpush1.msra.mxu1 %v603_v34  ;;  %v1010_v11 = vld [vmem:[#allocation5 + $0x1648] sm:$0xff]  ;;  %v1012_v34 = vld [vmem:[#allocation5 + $0x1658] sm:$0xff] }
 0x184   : > { %1767 = vmatprep.subr.mxu0 %v578_v35  ;;  %1838 = vmatprep.subr.mxu1 %v580_v36  ;;  %v1009_v35 = vld [vmem:[#allocation5 + $0x1640] sm:$0xff]  ;;  %v1011_v36 = vld [vmem:[#allocation5 + $0x1650] sm:$0xff] }
 0x185   : > { %1768 = vmatpush1.msra.mxu0 %v577_v37  ;;  %1839 = vmatpush1.msra.mxu1 %v579_v38  ;;  %v986_v37 = vld [vmem:[#allocation5 + $0x1588] sm:$0xff]  ;;  %v988_v38 = vld [vmem:[#allocation5 + $0x1598] sm:$0xff] }
 0x186   : > { %1769 = vmatprep.subr.mxu0 %v554_v39  ;;  %1840 = vmatprep.subr.mxu1 %v556_v40  ;;  %v985_v39 = vld [vmem:[#allocation5 + $0x1580] sm:$0xff]  ;;  %v987_v40 = vld [vmem:[#allocation5 + $0x1590] sm:$0xff] }
 0x187   : > { %1770 = vmatpush1.msra.mxu0 %v553_v41  ;;  %1841 = vmatpush1.msra.mxu1 %v555_v42  ;;  %v962_v41 = vld [vmem:[#allocation5 + $0x14c8] sm:$0xff]  ;;  %v964_v42 = vld [vmem:[#allocation5 + $0x14d8] sm:$0xff] }
 0x188   : > { %1771 = vmatprep.subr.mxu0 %v530_v43  ;;  %1842 = vmatprep.subr.mxu1 %v532_v44  ;;  %v961_v43 = vld [vmem:[#allocation5 + $0x14c0] sm:$0xff]  ;;  %v963_v44 = vld [vmem:[#allocation5 + $0x14d0] sm:$0xff] }
 0x189   : > { %1772 = vmatpush1.msra.mxu0 %v529_v45  ;;  %1843 = vmatpush1.msra.mxu1 %v531_v46  ;;  %v938_v45 = vld [vmem:[#allocation5 + $0x1408] sm:$0xff]  ;;  %v940_v46 = vld [vmem:[#allocation5 + $0x1418] sm:$0xff] }
 0x18a   : > { %1773 = vmatprep.subr.mxu0 %v506_v47  ;;  %1844 = vmatprep.subr.mxu1 %v508_v48  ;;  %v937_v47 = vld [vmem:[#allocation5 + $0x1400] sm:$0xff]  ;;  %v939_v48 = vld [vmem:[#allocation5 + $0x1410] sm:$0xff] }
 0x18b   : > { %1774 = vmatpush1.msra.mxu0 %v505_v50  ;;  %1845 = vmatpush1.msra.mxu1 %v507_v51  ;;  %v914_v50 = vld [vmem:[#allocation5 + $0x1348] sm:$0xff]  ;;  %v916_v51 = vld [vmem:[#allocation5 + $0x1358] sm:$0xff] }
 0x18c   : > { %1775 = vmatprep.subr.mxu0 %v482_v52  ;;  %1846 = vmatprep.subr.mxu1 %v484_v53  ;;  %v913_v52 = vld [vmem:[#allocation5 + $0x1340] sm:$0xff]  ;;  %v915_v53 = vld [vmem:[#allocation5 + $0x1350] sm:$0xff] }
 0x18d   : > { %1776 = vmatpush1.msra.mxu0 %v481_v54  ;;  %1847 = vmatpush1.msra.mxu1 %v483_v55  ;;  %v890_v54 = vld [vmem:[#allocation5 + $0x1288] sm:$0xff]  ;;  %v892_v55 = vld [vmem:[#allocation5 + $0x1298] sm:$0xff] }
 0x18e   : > { %1777 = vmatprep.subr.mxu0 %v458_v56  ;;  %1848 = vmatprep.subr.mxu1 %v460_v57  ;;  %v889_v56 = vld [vmem:[#allocation5 + $0x1280] sm:$0xff]  ;;  %v891_v57 = vld [vmem:[#allocation5 + $0x1290] sm:$0xff] }
 0x18f   : > { %1778 = vmatpush1.msra.mxu0 %v457_v60  ;;  %1849 = vmatpush1.msra.mxu1 %v459_v61  ;;  %v866_v60 = vld [vmem:[#allocation5 + $0x11c8] sm:$0xff]  ;;  %v868_v61 = vld [vmem:[#allocation5 + $0x11d8] sm:$0xff] }
 0x190   : > { %1779 = vmatprep.subr.mxu0 %v434_v0  ;;  %1850 = vmatprep.subr.mxu1 %v436_v2  ;;  %v865_v0 = vld [vmem:[#allocation5 + $0x11c0] sm:$0xff]  ;;  %v867_v2 = vld [vmem:[#allocation5 + $0x11d0] sm:$0xff] }
 0x191   : > { %1780 = vmatpush1.msra.mxu0 %v433_v3  ;;  %1851 = vmatpush1.msra.mxu1 %v435_v4  ;;  %v842_v3 = vld [vmem:[#allocation5 + $0x1108] sm:$0xff]  ;;  %v844_v4 = vld [vmem:[#allocation5 + $0x1118] sm:$0xff] }
 0x192   : > { %1781 = vmatprep.subr.mxu0 %v410_v5  ;;  %1852 = vmatprep.subr.mxu1 %v412_v7  ;;  %v841_v5 = vld [vmem:[#allocation5 + $0x1100] sm:$0xff]  ;;  %v843_v7 = vld [vmem:[#allocation5 + $0x1110] sm:$0xff] }
 0x193   : > { %1782 = vmatpush1.msra.mxu0 %v409_v8  ;;  %1853 = vmatpush1.msra.mxu1 %v411_v9  ;;  %v818_v8 = vld [vmem:[#allocation5 + $0x1048] sm:$0xff]  ;;  %v820_v9 = vld [vmem:[#allocation5 + $0x1058] sm:$0xff] }
 0x194   : > { %1783 = vmatprep.subr.mxu0 %v386_v10  ;;  %1854 = vmatprep.subr.mxu1 %v388_v12  ;;  %v817_v10 = vld [vmem:[#allocation5 + $0x1040] sm:$0xff]  ;;  %v819_v12 = vld [vmem:[#allocation5 + $0x1050] sm:$0xff] }
 0x195   : > { %1784 = vmatpush1.msra.mxu0 %v385_v13  ;;  %1855 = vmatpush1.msra.mxu1 %v387_v14  ;;  %v794_v13 = vld [vmem:[#allocation5 + $0xf88] sm:$0xff]  ;;  %v796_v14 = vld [vmem:[#allocation5 + $0xf98] sm:$0xff] }
 0x196   : > { %1785 = vmatprep.subr.mxu0 %v362_v15  ;;  %1856 = vmatprep.subr.mxu1 %v364_v16  ;;  %v793_v15 = vld [vmem:[#allocation5 + $0xf80] sm:$0xff]  ;;  %v795_v16 = vld [vmem:[#allocation5 + $0xf90] sm:$0xff] }
 0x197   : > { %1786 = vmatpush1.msra.mxu0 %v361_v63  ;;  %1857 = vmatpush1.msra.mxu1 %v363_v17  ;;  %v4647_v63 = vsub.s32 4, %v4624_v49  ;;  %v4650_v17 = vsub.s32 6, %v4624_v49 }
 0x198   : > { %1787 = vmatprep.subr.mxu0 %v338_v18  ;;  %1858 = vmatprep.subr.mxu1 %v340_v20  ;;  %v770_v18 = vld [vmem:[#allocation5 + $0xec8] sm:$0xff]  ;;  %v772_v20 = vld [vmem:[#allocation5 + $0xed8] sm:$0xff] }
 0x199   : > { %1788 = vmatpush1.msra.mxu0 %v337_v21  ;;  %1859 = vmatpush1.msra.mxu1 %v339_v22  ;;  %v769_v21 = vld [vmem:[#allocation5 + $0xec0] sm:$0xff]  ;;  %v771_v22 = vld [vmem:[#allocation5 + $0xed0] sm:$0xff] }
 0x19a   : > { %1789 = vmatprep.subr.mxu0 %v314_v23  ;;  %1860 = vmatprep.subr.mxu1 %v316_v24  ;;  %v746_v23 = vld [vmem:[#allocation5 + $0xe08] sm:$0xff]  ;;  %v748_v24 = vld [vmem:[#allocation5 + $0xe18] sm:$0xff] }
 0x19b   : > { %1790 = vmatpush1.msra.mxu0 %v313_v25  ;;  %1861 = vmatpush1.msra.mxu1 %v315_v26  ;;  %v745_v25 = vld [vmem:[#allocation5 + $0xe00] sm:$0xff]  ;;  %v747_v26 = vld [vmem:[#allocation5 + $0xe10] sm:$0xff] }
 0x19c   : > { %1791 = vmatprep.subr.mxu0 %v1058_v27  ;;  %1862 = vmatprep.subr.mxu1 %v1060_v28  ;;  %v1090_v27 = vrot.slane %v4632_v62, %v4647_v63  ;;  %v1098_v28 = vrot.slane %v4632_v62, %v4650_v17 }
 0x19d   : > { %1792 = vmatpush2.msra.mxu0 %v1057_v29  ;;  %1863 = vmatpush2.msra.mxu1 %v1059_v30  ;;  %v4656_v29 = vpop.f32.mrf.mxu0  ;;  %v4658_v30 = vpop.f32.mrf.mxu1 }
 0x19e   : > { %1793 = vmatprep.subr.mxu0 %v1034_v31  ;;  %1864 = vmatprep.subr.mxu1 %v1036_v6  ;;  %v722_v31 = vld [vmem:[#allocation5 + $0xd48] sm:$0xff]  ;;  %v724_v6 = vld [vmem:[#allocation5 + $0xd58] sm:$0xff] }
 0x19f   : > { %1794 = vmatpush2.msra.mxu0 %v1033_v32  ;;  %1865 = vmatpush2.msra.mxu1 %v1035_v33  ;;  %v721_v32 = vld [vmem:[#allocation5 + $0xd40] sm:$0xff]  ;;  %v723_v33 = vld [vmem:[#allocation5 + $0xd50] sm:$0xff] }
 0x1a0   : > { %1795 = vmatprep.subr.mxu0 %v1010_v11  ;;  %1866 = vmatprep.subr.mxu1 %v1012_v34  ;;  %v698_v11 = vld [vmem:[#allocation5 + $0xc88] sm:$0xff]  ;;  %v700_v34 = vld [vmem:[#allocation5 + $0xc98] sm:$0xff] }
 0x1a1   : > { %1796 = vmatpush2.msra.mxu0 %v1009_v35  ;;  %1867 = vmatpush2.msra.mxu1 %v1011_v36 }
 0x1a2   : > { %1797 = vmatprep.subr.mxu0 %v986_v37  ;;  %1868 = vmatprep.subr.mxu1 %v988_v38  ;;  %v697_v37 = vld [vmem:[#allocation5 + $0xc80] sm:$0xff] }
 0x1a3   : > { %1798 = vmatpush2.msra.mxu0 %v985_v39  ;;  %1869 = vmatpush2.msra.mxu1 %v987_v40  ;;  %v699_v40 = vld [vmem:[#allocation5 + $0xc90] sm:$0xff] }
 0x1a4   : > { %1799 = vmatprep.subr.mxu0 %v962_v41  ;;  %1870 = vmatprep.subr.mxu1 %v964_v42  ;;  %v4665_v41 = vld [vmem:[%s4586_s16 + $0x8] sm:$0xff] }
 0x1a5   : > { %1800 = vmatpush2.msra.mxu0 %v961_v43  ;;  %1871 = vmatpush2.msra.mxu1 %v963_v44  ;;  %v678_v42 = vld [vmem:[#allocation5 + $0xbe8] sm:$0xff]  ;;  %v680_v43 = vld [vmem:[#allocation5 + $0xbf8] sm:$0xff]  ;;  %v677_v44 = vld [vmem:[#allocation5 + $0xbe0] sm:$0xff] }
 0x1a6   : > { %1801 = vmatprep.subr.mxu0 %v938_v45  ;;  %1872 = vmatprep.subr.mxu1 %v940_v46  ;;  %v679_v45 = vld [vmem:[#allocation5 + $0xbf0] sm:$0xff] }
 0x1a7   : > { %1802 = vmatpush2.msra.mxu0 %v937_v47  ;;  %1873 = vmatpush2.msra.mxu1 %v939_v48  ;;  %v4670_v46 = vld [vmem:[%s4586_s16] sm:$0xff]  ;;  %v654_v47 = vld [vmem:[#allocation5 + $0xb28] sm:$0xff]  ;;  %v656_v48 = vld [vmem:[#allocation5 + $0xb38] sm:$0xff] }
 0x1a8   : > { %1803 = vmatprep.subr.mxu0 %v914_v50  ;;  %1874 = vmatprep.subr.mxu1 %v916_v51  ;;  %v653_v50 = vld [vmem:[#allocation5 + $0xb20] sm:$0xff]  ;;  %v655_v51 = vld [vmem:[#allocation5 + $0xb30] sm:$0xff] }
 0x1a9   : > { %1804 = vmatpush2.msra.mxu0 %v913_v52  ;;  %1875 = vmatpush2.msra.mxu1 %v915_v53  ;;  %v630_v52 = vld [vmem:[#allocation5 + $0xa68] sm:$0xff]  ;;  %v632_v53 = vld [vmem:[#allocation5 + $0xa78] sm:$0xff] }
 0x1aa   : > { %1805 = vmatprep.subr.mxu0 %v890_v54  ;;  %1876 = vmatprep.subr.mxu1 %v892_v55  ;;  %v629_v54 = vld [vmem:[#allocation5 + $0xa60] sm:$0xff]  ;;  %v631_v55 = vld [vmem:[#allocation5 + $0xa70] sm:$0xff] }
 0x1ab   : > { %1806 = vmatpush2.msra.mxu0 %v889_v56  ;;  %1877 = vmatpush2.msra.mxu1 %v891_v57  ;;  %v606_v56 = vld [vmem:[#allocation5 + $0x9a8] sm:$0xff]  ;;  %v608_v57 = vld [vmem:[#allocation5 + $0x9b8] sm:$0xff] }
 0x1ac   : > { %1807 = vmatprep.subr.mxu0 %v866_v60  ;;  %1878 = vmatprep.subr.mxu1 %v868_v61  ;;  %v605_v60 = vld [vmem:[#allocation5 + $0x9a0] sm:$0xff]  ;;  %v607_v61 = vld [vmem:[#allocation5 + $0x9b0] sm:$0xff] }
 0x1ad   : > { %1808 = vmatpush2.msra.mxu0 %v865_v0  ;;  %1879 = vmatpush2.msra.mxu1 %v867_v2  ;;  %v582_v0 = vld [vmem:[#allocation5 + $0x8e8] sm:$0xff]  ;;  %v584_v2 = vld [vmem:[#allocation5 + $0x8f8] sm:$0xff] }
 0x1ae   : > { %1809 = vmatprep.subr.mxu0 %v842_v3  ;;  %1880 = vmatprep.subr.mxu1 %v844_v4  ;;  %v581_v3 = vld [vmem:[#allocation5 + $0x8e0] sm:$0xff]  ;;  %v583_v4 = vld [vmem:[#allocation5 + $0x8f0] sm:$0xff] }
 0x1af   : > { %1810 = vmatpush2.msra.mxu0 %v841_v5  ;;  %1881 = vmatpush2.msra.mxu1 %v843_v7  ;;  %v558_v5 = vld [vmem:[#allocation5 + $0x828] sm:$0xff]  ;;  %v560_v7 = vld [vmem:[#allocation5 + $0x838] sm:$0xff] }
 0x1b0   : > { %1811 = vmatprep.subr.mxu0 %v818_v8  ;;  %1882 = vmatprep.subr.mxu1 %v820_v9  ;;  %v557_v8 = vld [vmem:[#allocation5 + $0x820] sm:$0xff]  ;;  %v559_v9 = vld [vmem:[#allocation5 + $0x830] sm:$0xff] }
 0x1b1   : > { %1812 = vmatpush2.msra.mxu0 %v817_v10  ;;  %1883 = vmatpush2.msra.mxu1 %v819_v12  ;;  %v534_v10 = vld [vmem:[#allocation5 + $0x768] sm:$0xff]  ;;  %v536_v12 = vld [vmem:[#allocation5 + $0x778] sm:$0xff] }
 0x1b2   : > { %1813 = vmatprep.subr.mxu0 %v794_v13  ;;  %1884 = vmatprep.subr.mxu1 %v796_v14  ;;  %v533_v13 = vld [vmem:[#allocation5 + $0x760] sm:$0xff]  ;;  %v535_v14 = vld [vmem:[#allocation5 + $0x770] sm:$0xff] }
 0x1b3   : > { %1814 = vmatpush2.msra.mxu0 %v793_v15  ;;  %1885 = vmatpush2.msra.mxu1 %v795_v16  ;;  %v510_v15 = vld [vmem:[#allocation5 + $0x6a8] sm:$0xff]  ;;  %v512_v16 = vld [vmem:[#allocation5 + $0x6b8] sm:$0xff] }
 0x1b4   : > { %1815 = vmatprep.subr.mxu0 %v770_v18  ;;  %1886 = vmatprep.subr.mxu1 %v772_v20  ;;  %v509_v18 = vld [vmem:[#allocation5 + $0x6a0] sm:$0xff]  ;;  %v511_v20 = vld [vmem:[#allocation5 + $0x6b0] sm:$0xff] }
 0x1b5   : > { %1816 = vmatpush2.msra.mxu0 %v769_v21  ;;  %1887 = vmatpush2.msra.mxu1 %v771_v22  ;;  %v4675_v21 = vsub.s32 1, %v4624_v49  ;;  %v486_v22 = vld [vmem:[#allocation5 + $0x5e8] sm:$0xff] }
 0x1b6   : > { %1817 = vmatprep.subr.mxu0 %v746_v23  ;;  %1888 = vmatprep.subr.mxu1 %v748_v24  ;;  %v488_v23 = vld [vmem:[#allocation5 + $0x5f8] sm:$0xff]  ;;  %v4678_v24 = vsub.s32 3, %v4624_v49 }
 0x1b7   : > { %1818 = vmatpush2.msra.mxu0 %v745_v25  ;;  %1889 = vmatpush2.msra.mxu1 %v747_v26  ;;  %v1399_v35 = vpop.f32.mrf.mxu0  ;;  %v1470_v36 = vpop.f32.mrf.mxu1  ;;  %v485_v25 = vld [vmem:[#allocation5 + $0x5e0] sm:$0xff]  ;;  %v487_v26 = vld [vmem:[#allocation5 + $0x5f0] sm:$0xff] }
 0x1b8   : > { %1819 = vmatprep.subr.mxu0 %v722_v31  ;;  %1890 = vmatprep.subr.mxu1 %v724_v6  ;;  %v4660_v38 = vadd.f32 %v1399_v35, %v1090_v27  ;;  %v4662_v39 = vadd.f32 %v1470_v36, %v1098_v28  ;;  %v462_v27 = vld [vmem:[#allocation5 + $0x528] sm:$0xff]  ;;  %v464_v28 = vld [vmem:[#allocation5 + $0x538] sm:$0xff]  ;;  %v461_v31 = vld [vmem:[#allocation5 + $0x520] sm:$0xff] }
 0x1b9   : > { %1820 = vmatpush2.msra.mxu0 %v721_v32  ;;  %1891 = vmatpush2.msra.mxu1 %v723_v33  ;;  %v463_v6 = vld [vmem:[#allocation5 + $0x530] sm:$0xff]  ;;  %v1078_v32 = vrot.slane %v4632_v62, %v4675_v21  ;;  %v438_v33 = vld [vmem:[#allocation5 + $0x468] sm:$0xff]  ;;  %v437_v35 = vld [vmem:[#allocation5 + $0x460] sm:$0xff] }
 0x1ba   : > { %1821 = vmatprep.subr.mxu0 %v698_v11  ;;  %1892 = vmatprep.subr.mxu1 %v700_v34  ;;  %v440_v11 = vld [vmem:[#allocation5 + $0x478] sm:$0xff]  ;;  %v1086_v34 = vrot.slane %v4632_v62, %v4678_v24  ;;  %v439_v36 = vld [vmem:[#allocation5 + $0x470] sm:$0xff] }
 0x1bb   : > { %1822 = vmatpush2.msra.mxu0 %v697_v37  ;;  %1823 = vmatprep.mubr.f32.mxu0 %v4665_v41  ;;  %v414_v37 = vld [vmem:[#allocation5 + $0x3a8] sm:$0xff] }
 0x1bc   : > { %1893 = vmatpush2.msra.mxu1 %v699_v40  ;;  %1894 = vmatprep.mubr.f32.mxu1 %v4665_v41  ;;  %v416_v40 = vld [vmem:[#allocation5 + $0x3b8] sm:$0xff]  ;;  %v4688_v62 = vadd.f32 %v4658_v30, %v1086_v34  ;;  %v967_v34 = vld [vmem:[#allocation5 + $0x14f0] sm:$0xff] }
 0x1bd   : > { %1824 = vmatmul.mubr.f32.vlgmr.msra.gmra.mxu0 %v4670_v46  ;;  %1895 = vmatmul.mubr.f32.vlgmr.msra.gmra.mxu1 %v4670_v46 }
 0x1be   : > { %1901 = vmatprep.subr.mxu0 %v678_v42  ;;  %1972 = vmatprep.subr.mxu1 %v680_v43  ;;  %v413_v42 = vld [vmem:[#allocation5 + $0x3a0] sm:$0xff]  ;;  %v415_v43 = vld [vmem:[#allocation5 + $0x3b0] sm:$0xff]  ;;  %v2070_v30 = vmul.f32 0.044715, %v4688_v62 }
 0x1bf   : > { %1902 = vmatpush1.msra.mxu0 %v677_v44  ;;  %1973 = vmatpush1.msra.mxu1 %v679_v45  ;;  %v4685_v44 = vadd.f32 %v4656_v29, %v1078_v32  ;;  %v390_v45 = vld [vmem:[#allocation5 + $0x2e8] sm:$0xff]  ;;  %v367_v29 = vld [vmem:[#allocation5 + $0x230] sm:$0xff]  ;;  %v968_v32 = vld [vmem:[#allocation5 + $0x14f8] sm:$0xff] }
 0x1c0   : > { %1903 = vmatprep.subr.mxu0 %v654_v47  ;;  %1974 = vmatprep.subr.mxu1 %v656_v48  ;;  %v392_v47 = vld [vmem:[#allocation5 + $0x2f8] sm:$0xff]  ;;  %v389_v48 = vld [vmem:[#allocation5 + $0x2e0] sm:$0xff] }
 0x1c1   : > { %1904 = vmatpush1.msra.mxu0 %v653_v50  ;;  %1975 = vmatpush1.msra.mxu1 %v655_v51  ;;  %v391_v50 = vld [vmem:[#allocation5 + $0x2f0] sm:$0xff]  ;;  %v366_v51 = vld [vmem:[#allocation5 + $0x228] sm:$0xff] }
 0x1c2   : > { %1905 = vmatprep.subr.mxu0 %v630_v52  ;;  %1976 = vmatprep.subr.mxu1 %v632_v53  ;;  %v368_v52 = vld [vmem:[#allocation5 + $0x238] sm:$0xff]  ;;  %v365_v53 = vld [vmem:[#allocation5 + $0x220] sm:$0xff] }
 0x1c3   : > { %1906 = vmatpush1.msra.mxu0 %v629_v54  ;;  %1977 = vmatpush1.msra.mxu1 %v631_v55  ;;  %v2068_v54 = vmul.f32 0.044715, %v4685_v44  ;;  %v342_v55 = vld [vmem:[#allocation5 + $0x168] sm:$0xff] }
 0x1c4   : > { %1907 = vmatprep.subr.mxu0 %v606_v56  ;;  %1978 = vmatprep.subr.mxu1 %v608_v57  ;;  %v344_v56 = vld [vmem:[#allocation5 + $0x178] sm:$0xff]  ;;  %v341_v57 = vld [vmem:[#allocation5 + $0x160] sm:$0xff] }
 0x1c5   : > { %1908 = vmatpush1.msra.mxu0 %v605_v60  ;;  %1979 = vmatpush1.msra.mxu1 %v607_v61  ;;  %v343_v60 = vld [vmem:[#allocation5 + $0x170] sm:$0xff]  ;;  %v318_v61 = vld [vmem:[#allocation5 + $0xa8] sm:$0xff] }
 0x1c6   : > { %1909 = vmatprep.subr.mxu0 %v582_v0  ;;  %1980 = vmatprep.subr.mxu1 %v584_v2  ;;  %v320_v0 = vld [vmem:[#allocation5 + $0xb8] sm:$0xff]  ;;  %v317_v2 = vld [vmem:[#allocation5 + $0xa0] sm:$0xff] }
 0x1c7   : > { %1910 = vmatpush1.msra.mxu0 %v581_v3  ;;  %1981 = vmatpush1.msra.mxu1 %v583_v4  ;;  %v319_v3 = vld [vmem:[#allocation5 + $0xb0] sm:$0xff]  ;;  %v2092_v4 = vmul.f32 %v2068_v54, %v4685_v44 }
 0x1c8   : > { %1911 = vmatprep.subr.mxu0 %v558_v5  ;;  %1982 = vmatprep.subr.mxu1 %v560_v7  ;;  %v1062_v5 = vld [vmem:[#allocation5 + $0x17e8] sm:$0xff]  ;;  %v1064_v7 = vld [vmem:[#allocation5 + $0x17f8] sm:$0xff]  ;;  %v895_v54 = vld [vmem:[#allocation5 + $0x12b0] sm:$0xff] }
 0x1c9   : > { %1912 = vmatpush1.msra.mxu0 %v557_v8  ;;  %1983 = vmatpush1.msra.mxu1 %v559_v9  ;;  %v2094_v8 = vmul.f32 %v2070_v30, %v4688_v62  ;;  %v1061_v9 = vld [vmem:[#allocation5 + $0x17e0] sm:$0xff] }
 0x1ca   : > { %1913 = vmatprep.subr.mxu0 %v534_v10  ;;  %1984 = vmatprep.subr.mxu1 %v536_v12  ;;  %v1063_v10 = vld [vmem:[#allocation5 + $0x17f0] sm:$0xff]  ;;  %v1038_v12 = vld [vmem:[#allocation5 + $0x1728] sm:$0xff]  ;;  %v869_v30 = vld [vmem:[#allocation5 + $0x11e0] sm:$0xff] }
 0x1cb   : > { %1914 = vmatpush1.msra.mxu0 %v533_v13  ;;  %1985 = vmatpush1.msra.mxu1 %v535_v14  ;;  %v1040_v13 = vld [vmem:[#allocation5 + $0x1738] sm:$0xff]  ;;  %v1037_v14 = vld [vmem:[#allocation5 + $0x1720] sm:$0xff] }
 0x1cc   : > { %1915 = vmatprep.subr.mxu0 %v510_v15  ;;  %1986 = vmatprep.subr.mxu1 %v512_v16  ;;  %v1039_v15 = vld [vmem:[#allocation5 + $0x1730] sm:$0xff]  ;;  %v1014_v16 = vld [vmem:[#allocation5 + $0x1668] sm:$0xff] }
 0x1cd   : > { %1916 = vmatpush1.msra.mxu0 %v509_v18  ;;  %1987 = vmatpush1.msra.mxu1 %v511_v20  ;;  %v1016_v18 = vld [vmem:[#allocation5 + $0x1678] sm:$0xff]  ;;  %v2116_v20 = vmul.f32 %v2092_v4, %v4685_v44 }
 0x1ce   : > { %1917 = vmatprep.subr.mxu0 %v486_v22  ;;  %1988 = vmatprep.subr.mxu1 %v488_v23  ;;  %v1013_v22 = vld [vmem:[#allocation5 + $0x1660] sm:$0xff]  ;;  %v1015_v23 = vld [vmem:[#allocation5 + $0x1670] sm:$0xff]  ;;  %v824_v4 = vld [vmem:[#allocation5 + $0x1078] sm:$0xff] }
 0x1cf   : > { %1918 = vmatpush1.msra.mxu0 %v485_v25  ;;  %1989 = vmatpush1.msra.mxu1 %v487_v26  ;;  %v2118_v25 = vmul.f32 %v2094_v8, %v4688_v62  ;;  %v990_v26 = vld [vmem:[#allocation5 + $0x15a8] sm:$0xff] }
 0x1d0   : > { %1919 = vmatprep.subr.mxu0 %v462_v27  ;;  %1990 = vmatprep.subr.mxu1 %v464_v28  ;;  %v992_v27 = vld [vmem:[#allocation5 + $0x15b8] sm:$0xff]  ;;  %v989_v28 = vld [vmem:[#allocation5 + $0x15a0] sm:$0xff]  ;;  %v798_v8 = vld [vmem:[#allocation5 + $0xfa8] sm:$0xff] }
 0x1d1   : > { %1920 = vmatpush1.msra.mxu0 %v461_v31  ;;  %1991 = vmatpush1.msra.mxu1 %v463_v6  ;;  %v991_v31 = vld [vmem:[#allocation5 + $0x15b0] sm:$0xff]  ;;  %v966_v6 = vld [vmem:[#allocation5 + $0x14e8] sm:$0xff] }
 0x1d2   : > { %1921 = vmatprep.subr.mxu0 %v438_v33  ;;  %1992 = vmatprep.subr.mxu1 %v440_v11  ;;  %v2140_v33 = vadd.f32 %v2116_v20, %v4685_v44  ;;  %v965_v11 = vld [vmem:[#allocation5 + $0x14e0] sm:$0xff]  ;;  %v752_v20 = vld [vmem:[#allocation5 + $0xe38] sm:$0xff] }
 0x1d3   : > { %1922 = vmatpush1.msra.mxu0 %v437_v35  ;;  %1993 = vmatpush1.msra.mxu1 %v439_v36  ;;  %v2142_v35 = vadd.f32 %v2118_v25, %v4688_v62  ;;  %v942_v36 = vld [vmem:[#allocation5 + $0x1428] sm:$0xff] }
 0x1d4   : > { %1923 = vmatprep.subr.mxu0 %v414_v37  ;;  %1994 = vmatprep.subr.mxu1 %v416_v40  ;;  %v944_v37 = vld [vmem:[#allocation5 + $0x1438] sm:$0xff]  ;;  %v941_v40 = vld [vmem:[#allocation5 + $0x1420] sm:$0xff]  ;;  %v726_v25 = vld [vmem:[#allocation5 + $0xd68] sm:$0xff] }
 0x1d5   : > { %1924 = vmatpush1.msra.mxu0 %v413_v42  ;;  %1995 = vmatpush1.msra.mxu1 %v415_v43  ;;  %v943_v42 = vld [vmem:[#allocation5 + $0x1430] sm:$0xff]  ;;  %v918_v43 = vld [vmem:[#allocation5 + $0x1368] sm:$0xff] }
 0x1d6   : > { %1925 = vmatprep.subr.mxu0 %v390_v45  ;;  %1996 = vmatprep.subr.mxu1 %v392_v47  ;;  %v920_v45 = vld [vmem:[#allocation5 + $0x1378] sm:$0xff]  ;;  %v2164_v47 = vmul.f32 0.7978846, %v2140_v33 }
 0x1d7   : > { %1926 = vmatpush1.msra.mxu0 %v389_v48  ;;  %1997 = vmatpush1.msra.mxu1 %v391_v50  ;;  %v917_v48 = vld [vmem:[#allocation5 + $0x1360] sm:$0xff]  ;;  %v919_v50 = vld [vmem:[#allocation5 + $0x1370] sm:$0xff]  ;;  %v704_v33 = vld [vmem:[#allocation5 + $0xcb8] sm:$0xff] }
 0x1d8   : > { %1927 = vmatprep.subr.mxu0 %v366_v51  ;;  %1998 = vmatprep.subr.mxu1 %v368_v52  ;;  %v2166_v51 = vmul.f32 0.7978846, %v2142_v35  ;;  %v894_v52 = vld [vmem:[#allocation5 + $0x12a8] sm:$0xff]  ;;  %4131 = vtanh.f32 %v2164_v47 }
 0x1d9   : > { %1928 = vmatpush1.msra.mxu0 %v365_v53  ;;  %1999 = vmatpush1.msra.mxu1 %v367_v29  ;;  %v896_v53 = vld [vmem:[#allocation5 + $0x12b8] sm:$0xff]  ;;  %v893_v29 = vld [vmem:[#allocation5 + $0x12a0] sm:$0xff] }
 0x1da   : > { %1929 = vmatprep.subr.mxu0 %v342_v55  ;;  %2000 = vmatprep.subr.mxu1 %v344_v56  ;;  %v870_v55 = vld [vmem:[#allocation5 + $0x11e8] sm:$0xff]  ;;  %v872_v56 = vld [vmem:[#allocation5 + $0x11f8] sm:$0xff]  ;;  %4133 = vtanh.f32 %v2166_v51  ;;  %v2288_v51 = vld [vmem:[#allocation8 + $0xe8] sm:$0xff] }
 0x1db   : > { %1930 = vmatpush1.msra.mxu0 %v341_v57  ;;  %2001 = vmatpush1.msra.mxu1 %v343_v60  ;;  %v871_v57 = vld [vmem:[#allocation5 + $0x11f0] sm:$0xff]  ;;  %v846_v60 = vld [vmem:[#allocation5 + $0x1128] sm:$0xff] }
 0x1dc   : > { %1931 = vmatprep.subr.mxu0 %v318_v61  ;;  %2002 = vmatprep.subr.mxu1 %v320_v0  ;;  %v848_v61 = vld [vmem:[#allocation5 + $0x1138] sm:$0xff]  ;;  %v845_v0 = vld [vmem:[#allocation5 + $0x1120] sm:$0xff] }
 0x1dd   : > { %1932 = vmatpush1.msra.mxu0 %v317_v2  ;;  %2003 = vmatpush1.msra.mxu1 %v319_v3  ;;  %v847_v2 = vld [vmem:[#allocation5 + $0x1130] sm:$0xff]  ;;  %v822_v3 = vld [vmem:[#allocation5 + $0x1068] sm:$0xff] }
 0x1de   : > { %1933 = vmatprep.subr.mxu0 %v1062_v5  ;;  %2004 = vmatprep.subr.mxu1 %v1064_v7  ;;  %v821_v5 = vld [vmem:[#allocation5 + $0x1060] sm:$0xff]  ;;  %v823_v7 = vld [vmem:[#allocation5 + $0x1070] sm:$0xff] }
 0x1df   : > { %1934 = vmatpush2.msra.mxu0 %v1061_v9  ;;  %2005 = vmatpush2.msra.mxu1 %v1063_v10  ;;  %v800_v9 = vld [vmem:[#allocation5 + $0xfb8] sm:$0xff]  ;;  %v797_v10 = vld [vmem:[#allocation5 + $0xfa0] sm:$0xff] }
 0x1e0   : > { %1935 = vmatprep.subr.mxu0 %v1038_v12  ;;  %2006 = vmatprep.subr.mxu1 %v1040_v13  ;;  %v799_v12 = vld [vmem:[#allocation5 + $0xfb0] sm:$0xff]  ;;  %v774_v13 = vld [vmem:[#allocation5 + $0xee8] sm:$0xff] }
 0x1e1   : > { %1936 = vmatpush2.msra.mxu0 %v1037_v14  ;;  %2007 = vmatpush2.msra.mxu1 %v1039_v15  ;;  %v776_v14 = vld [vmem:[#allocation5 + $0xef8] sm:$0xff]  ;;  %v773_v15 = vld [vmem:[#allocation5 + $0xee0] sm:$0xff] }
 0x1e2   : > { %1937 = vmatprep.subr.mxu0 %v1014_v16  ;;  %2008 = vmatprep.subr.mxu1 %v1016_v18  ;;  %v775_v16 = vld [vmem:[#allocation5 + $0xef0] sm:$0xff]  ;;  %v750_v18 = vld [vmem:[#allocation5 + $0xe28] sm:$0xff] }
 0x1e3   : > { %1938 = vmatpush2.msra.mxu0 %v1013_v22  ;;  %2009 = vmatpush2.msra.mxu1 %v1015_v23  ;;  %v749_v22 = vld [vmem:[#allocation5 + $0xe20] sm:$0xff]  ;;  %v751_v23 = vld [vmem:[#allocation5 + $0xe30] sm:$0xff] }
 0x1e4   : > { %1939 = vmatprep.subr.mxu0 %v990_v26  ;;  %2010 = vmatprep.subr.mxu1 %v992_v27  ;;  %v728_v26 = vld [vmem:[#allocation5 + $0xd78] sm:$0xff] }
 0x1e5   : > { %1940 = vmatpush2.msra.mxu0 %v989_v28  ;;  %2011 = vmatpush2.msra.mxu1 %v991_v31  ;;  %v4132_v27 = vpop.eup %4131  ;;  %v725_v28 = vld [vmem:[#allocation5 + $0xd60] sm:$0xff]  ;;  %v727_v31 = vld [vmem:[#allocation5 + $0xd70] sm:$0xff] }
 0x1e6   : > { %1941 = vmatprep.subr.mxu0 %v966_v6  ;;  %2012 = vmatprep.subr.mxu1 %v968_v32  ;;  %v702_v32 = vld [vmem:[#allocation5 + $0xca8] sm:$0xff]  ;;  %v2212_v35 = vadd.f32 1.0, %v4132_v27  ;;  %v2336_v27 = vld [vmem:[#allocation8 + $0x268] sm:$0xff] }
 0x1e7   : > { %1942 = vmatpush2.msra.mxu0 %v965_v11  ;;  %2013 = vmatpush2.msra.mxu1 %v967_v34  ;;  %v4134_v6 = vpop.eup %4133  ;;  %v701_v11 = vld [vmem:[#allocation5 + $0xca0] sm:$0xff]  ;;  %v703_v34 = vld [vmem:[#allocation5 + $0xcb0] sm:$0xff] }
 0x1e8   : > { %1943 = vmatprep.subr.mxu0 %v942_v36  ;;  %2014 = vmatprep.subr.mxu1 %v944_v37  ;;  %v2214_v36 = vadd.f32 1.0, %v4134_v6  ;;  %v2290_v37 = vld [vmem:[#allocation8 + $0xf8] sm:$0xff]  ;;  %v2271_v6 = vld [vmem:[#allocation8 + $0x60] sm:$0xff] }
 0x1e9   : > { %1944 = vmatpush2.msra.mxu0 %v941_v40  ;;  %2015 = vmatpush2.msra.mxu1 %v943_v42  ;;  %v2354_v40 = vld [vmem:[#allocation8 + $0x2f8] sm:$0xff]  ;;  %v2044_v42 = vmul.f32 0.5, %v4685_v44  ;;  %v2287_v44 = vld [vmem:[#allocation8 + $0xe0] sm:$0xff] }
 0x1ea   : > { %1945 = vmatprep.subr.mxu0 %v918_v43  ;;  %2016 = vmatprep.subr.mxu1 %v920_v45  ;;  %v2289_v43 = vld [vmem:[#allocation8 + $0xf0] sm:$0xff]  ;;  %v2046_v45 = vmul.f32 0.5, %v4688_v62 }
 0x1eb   : > { %1946 = vmatpush2.msra.mxu0 %v917_v48  ;;  %2017 = vmatpush2.msra.mxu1 %v919_v50  ;;  %v2236_v47 = vmul.f32 %v2212_v35, %v2044_v42  ;;  %v2353_v48 = vld [vmem:[#allocation8 + $0x2f0] sm:$0xff]  ;;  %v1472_v35 = vpop.f32.mrf.mxu1  ;;  %v2332_v42 = vld [vmem:[#allocation8 + $0x248] sm:$0xff] }
 0x1ec   : > { %1947 = vmatprep.subr.mxu0 %v894_v52  ;;  %2018 = vmatprep.subr.mxu1 %v896_v53  ;;  %v2238_v50 = vmul.f32 %v2214_v36, %v2046_v45  ;;  %v2352_v52 = vld [vmem:[#allocation8 + $0x2e8] sm:$0xff]  ;;  %v2351_v53 = vld [vmem:[#allocation8 + $0x2e0] sm:$0xff]  ;;  %v2285_v62 = vld [vmem:[#allocation8 + $0xd0] sm:$0xff] }
 0x1ed   : > { %1948 = vmatpush2.msra.mxu0 %v893_v29  ;;  %2019 = vmatpush2.msra.mxu1 %v895_v54  ;;  %v2350_v29 = vld [vmem:[#allocation8 + $0x2d8] sm:$0xff]  ;;  %v2349_v54 = vld [vmem:[#allocation8 + $0x2d0] sm:$0xff]  ;;  %v2267_v45 = vld [vmem:[#allocation8 + $0x40] sm:$0xff] }
 0x1ee   : > { %1949 = vmatprep.subr.mxu0 %v870_v55  ;;  %2020 = vmatprep.subr.mxu1 %v872_v56  ;;  %v2348_v55 = vld [vmem:[#allocation8 + $0x2c8] sm:$0xff]  ;;  %v2283_v56 = vld [vmem:[#allocation8 + $0xc0] sm:$0xff]  ;;  %v2269_v36 = vld [vmem:[#allocation8 + $0x50] sm:$0xff] }
 0x1ef   : > { %1950 = vmatpush2.msra.mxu0 %v869_v30  ;;  %2021 = vmatpush2.msra.mxu1 %v871_v57  ;;  %v2347_v30 = vld [vmem:[#allocation8 + $0x2c0] sm:$0xff]  ;;  %v2282_v57 = vld [vmem:[#allocation8 + $0xb8] sm:$0xff] }
 0x1f0   : > { %1951 = vmatprep.subr.mxu0 %v846_v60  ;;  %2022 = vmatprep.subr.mxu1 %v848_v61  ;;  %v2346_v60 = vld [vmem:[#allocation8 + $0x2b8] sm:$0xff]  ;;  %v2281_v61 = vld [vmem:[#allocation8 + $0xb0] sm:$0xff] }
 0x1f1   : > { %1952 = vmatpush2.msra.mxu0 %v845_v0  ;;  %2023 = vmatpush2.msra.mxu1 %v847_v2  ;;  %v2345_v0 = vld [vmem:[#allocation8 + $0x2b0] sm:$0xff]  ;;  %v2280_v2 = vld [vmem:[#allocation8 + $0xa8] sm:$0xff] }
 0x1f2   : > { %1953 = vmatprep.subr.mxu0 %v822_v3  ;;  %2024 = vmatprep.subr.mxu1 %v824_v4  ;;  %v2344_v3 = vld [vmem:[#allocation8 + $0x2a8] sm:$0xff]  ;;  %v2279_v4 = vld [vmem:[#allocation8 + $0xa0] sm:$0xff] }
 0x1f3   : > { %1954 = vmatpush2.msra.mxu0 %v821_v5  ;;  %2025 = vmatpush2.msra.mxu1 %v823_v7  ;;  %v2343_v5 = vld [vmem:[#allocation8 + $0x2a0] sm:$0xff]  ;;  %v2278_v7 = vld [vmem:[#allocation8 + $0x98] sm:$0xff] }
 0x1f4   : > { %1955 = vmatprep.subr.mxu0 %v798_v8  ;;  %2026 = vmatprep.subr.mxu1 %v800_v9  ;;  %v2342_v8 = vld [vmem:[#allocation8 + $0x298] sm:$0xff]  ;;  %v2277_v9 = vld [vmem:[#allocation8 + $0x90] sm:$0xff] }
 0x1f5   : > { %1956 = vmatpush2.msra.mxu0 %v797_v10  ;;  %2027 = vmatpush2.msra.mxu1 %v799_v12  ;;  %v2341_v10 = vld [vmem:[#allocation8 + $0x290] sm:$0xff]  ;;  %v2276_v12 = vld [vmem:[#allocation8 + $0x88] sm:$0xff] }
 0x1f6   : > { %1957 = vmatprep.subr.mxu0 %v774_v13  ;;  %2028 = vmatprep.subr.mxu1 %v776_v14  ;;  %v2340_v13 = vld [vmem:[#allocation8 + $0x288] sm:$0xff]  ;;  %v4705_v14 = vsub.s32 5, %v4624_v49 }
 0x1f7   : > { %1958 = vmatpush2.msra.mxu0 %v773_v15  ;;  %2029 = vmatpush2.msra.mxu1 %v775_v16  ;;  %v2275_v15 = vld [vmem:[#allocation8 + $0x80] sm:$0xff] }
 0x1f8   : > { %1959 = vmatprep.subr.mxu0 %v750_v18  ;;  %2030 = vmatprep.subr.mxu1 %v752_v20  ;;  %v2339_v16 = vld [vmem:[#allocation8 + $0x280] sm:$0xff]  ;;  %v4708_v18 = vsub.s32 7, %v4624_v49  ;;  %v2274_v20 = vld [vmem:[#allocation8 + $0x78] sm:$0xff] }
 0x1f9   : > { %1960 = vmatpush2.msra.mxu0 %v749_v22  ;;  %2031 = vmatpush2.msra.mxu1 %v751_v23  ;;  %v2338_v22 = vld [vmem:[#allocation8 + $0x278] sm:$0xff]  ;;  %v2273_v23 = vld [vmem:[#allocation8 + $0x70] sm:$0xff]  ;;  %v2335_v49 = vld [vmem:[#allocation8 + $0x260] sm:$0xff] }
 0x1fa   : > { %1961 = vmatprep.subr.mxu0 %v726_v25  ;;  %2032 = vmatprep.subr.mxu1 %v728_v26  ;;  %v2337_v25 = vld [vmem:[#allocation8 + $0x270] sm:$0xff]  ;;  %v2272_v26 = vld [vmem:[#allocation8 + $0x68] sm:$0xff] }
 0x1fb   : > { %1962 = vmatpush2.msra.mxu0 %v725_v28  ;;  %2033 = vmatpush2.msra.mxu1 %v727_v31  ;;  %v4183_v28 = vld [vmem:[#allocation7] sm:$0xff] }
 0x1fc   : > { %1963 = vmatprep.subr.mxu0 %v702_v32  ;;  %2034 = vmatprep.subr.mxu1 %v704_v33  ;;  %v1094_v31 = vrot.slane %v4183_v28, %v4705_v14  ;;  %v1401_v32 = vpop.f32.mrf.mxu0  ;;  %v1102_v33 = vrot.slane %v4183_v28, %v4708_v18 }
 0x1fd   : > { %1964 = vmatpush2.msra.mxu0 %v701_v11  ;;  %1965 = vmatprep.mubr.f32.mxu0 %v4665_v41  ;;  %v2270_v11 = vld [vmem:[#allocation8 + $0x58] sm:$0xff] }
 0x1fe   : > { %2035 = vmatpush2.msra.mxu1 %v703_v34  ;;  %2036 = vmatprep.mubr.f32.mxu1 %v4665_v41  ;;  %v2286_v41 = vld [vmem:[#allocation8 + $0xd8] sm:$0xff] }
 0x1ff   : > { %1966 = vmatmul.mubr.f32.vlgmr.msra.gmra.mxu0 %v4670_v46  ;;  %2037 = vmatmul.mubr.f32.vlgmr.msra.gmra.mxu1 %v4670_v46  ;;  %v2284_v46 = vld [vmem:[#allocation8 + $0xc8] sm:$0xff]  ;;  %v2334_v34 = vld [vmem:[#allocation8 + $0x258] sm:$0xff] }
 0x200   : > { %3039 = vmatprep.subr.mxu0 %v2290_v37  ;;  %3110 = vmatprep.subr.mxu1 %v2354_v40  ;;  %v2333_v37 = vld [vmem:[#allocation8 + $0x250] sm:$0xff]  ;;  %v2268_v40 = vld [vmem:[#allocation8 + $0x48] sm:$0xff] }
 0x201   : > { %3040 = vmatpush1.msra.mxu0 %v2289_v43  ;;  %3103 = vmatprep.mubr.f32.mxu0 %v2236_v47  ;;  %v4712_v43 = vadd.f32 %v1401_v32, %v1094_v31  ;;  %v2331_v47 = vld [vmem:[#allocation8 + $0x240] sm:$0xff]  ;;  %v2318_v31 = vld [vmem:[#allocation8 + $0x1d8] sm:$0xff] }
 0x202   : > { %3111 = vmatpush1.msra.mxu1 %v2353_v48  ;;  %3174 = vmatprep.mubr.f32.mxu1 %v2238_v50  ;;  %v2067_v48 = vmul.f32 0.044715, %v4638_v1  ;;  %v4715_v50 = vadd.f32 %v1472_v35, %v1102_v33  ;;  %v2317_v33 = vld [vmem:[#allocation8 + $0x1d0] sm:$0xff]  ;;  %v2380_v35 = vld [vmem:[#allocation8 + $0x3c8] sm:$0xff] }
 0x203   : > { %3041 = vmatprep.subr.mxu0 %v2288_v51  ;;  %3112 = vmatprep.subr.mxu1 %v2352_v52  ;;  %v2266_v51 = vld [vmem:[#allocation8 + $0x38] sm:$0xff] }
 0x204   : > { %3042 = vmatpush1.msra.mxu0 %v2287_v44  ;;  %3113 = vmatpush1.msra.mxu1 %v2351_v53  ;;  %v2330_v52 = vld [vmem:[#allocation8 + $0x238] sm:$0xff]  ;;  %v2069_v44 = vmul.f32 0.044715, %v4640_v19  ;;  %v2265_v53 = vld [vmem:[#allocation8 + $0x30] sm:$0xff] }
 0x205   : > { %3043 = vmatprep.subr.mxu0 %v2286_v41  ;;  %3114 = vmatprep.subr.mxu1 %v2350_v29  ;;  %v2329_v41 = vld [vmem:[#allocation8 + $0x230] sm:$0xff]  ;;  %v2264_v29 = vld [vmem:[#allocation8 + $0x28] sm:$0xff] }
 0x206   : > { %3044 = vmatpush1.msra.mxu0 %v2285_v62  ;;  %3115 = vmatpush1.msra.mxu1 %v2349_v54  ;;  %v2328_v62 = vld [vmem:[#allocation8 + $0x228] sm:$0xff]  ;;  %v2072_v54 = vmul.f32 0.044715, %v4712_v43 }
 0x207   : > { %3045 = vmatprep.subr.mxu0 %v2284_v46  ;;  %3116 = vmatprep.subr.mxu1 %v2348_v55  ;;  %v2263_v46 = vld [vmem:[#allocation8 + $0x20] sm:$0xff] }
 0x208   : > { %3046 = vmatpush1.msra.mxu0 %v2283_v56  ;;  %3117 = vmatpush1.msra.mxu1 %v2347_v30  ;;  %v2327_v55 = vld [vmem:[#allocation8 + $0x220] sm:$0xff]  ;;  %v2091_v56 = vmul.f32 %v2067_v48, %v4638_v1  ;;  %v2074_v30 = vmul.f32 0.044715, %v4715_v50 }
 0x209   : > { %3047 = vmatprep.subr.mxu0 %v2282_v57  ;;  %3118 = vmatprep.subr.mxu1 %v2346_v60  ;;  %v2262_v57 = vld [vmem:[#allocation8 + $0x18] sm:$0xff] }
 0x20a   : > { %3048 = vmatpush1.msra.mxu0 %v2281_v61  ;;  %3119 = vmatpush1.msra.mxu1 %v2345_v0  ;;  %v2326_v60 = vld [vmem:[#allocation8 + $0x218] sm:$0xff]  ;;  %v2093_v61 = vmul.f32 %v2069_v44, %v4640_v19  ;;  %v2261_v0 = vld [vmem:[#allocation8 + $0x10] sm:$0xff] }
 0x20b   : > { %3049 = vmatprep.subr.mxu0 %v2280_v2  ;;  %3120 = vmatprep.subr.mxu1 %v2344_v3  ;;  %v2325_v2 = vld [vmem:[#allocation8 + $0x210] sm:$0xff]  ;;  %v2260_v3 = vld [vmem:[#allocation8 + $0x8] sm:$0xff] }
 0x20c   : > { %3050 = vmatpush1.msra.mxu0 %v2279_v4  ;;  %3121 = vmatpush1.msra.mxu1 %v2343_v5  ;;  %v2324_v4 = vld [vmem:[#allocation8 + $0x208] sm:$0xff]  ;;  %v2096_v5 = vmul.f32 %v2072_v54, %v4712_v43 }
 0x20d   : > { %3051 = vmatprep.subr.mxu0 %v2278_v7  ;;  %3122 = vmatprep.subr.mxu1 %v2342_v8  ;;  %v2259_v7 = vld [vmem:[#allocation8] sm:$0xff] }
 0x20e   : > { %3052 = vmatpush1.msra.mxu0 %v2277_v9  ;;  %3123 = vmatpush1.msra.mxu1 %v2341_v10  ;;  %v2323_v8 = vld [vmem:[#allocation8 + $0x200] sm:$0xff]  ;;  %v2115_v9 = vmul.f32 %v2091_v56, %v4638_v1  ;;  %v2098_v10 = vmul.f32 %v2074_v30, %v4715_v50  ;;  %v2309_v30 = vld [vmem:[#allocation8 + $0x190] sm:$0xff] }
 0x20f   : > { %3053 = vmatprep.subr.mxu0 %v2276_v12  ;;  %3124 = vmatprep.subr.mxu1 %v2340_v13  ;;  %v2322_v12 = vld [vmem:[#allocation8 + $0x1f8] sm:$0xff] }
 0x210   : > { %3054 = vmatpush1.msra.mxu0 %v2275_v15  ;;  %3125 = vmatpush1.msra.mxu1 %v2339_v16  ;;  %v2386_v13 = vld [vmem:[#allocation8 + $0x3f8] sm:$0xff]  ;;  %v2117_v15 = vmul.f32 %v2093_v61, %v4640_v19  ;;  %v2321_v16 = vld [vmem:[#allocation8 + $0x1f0] sm:$0xff]  ;;  %v2139_v28 = vadd.f32 %v2115_v9, %v4638_v1  ;;  %v2372_v61 = vld [vmem:[#allocation8 + $0x388] sm:$0xff] }
 0x211   : > { %3055 = vmatprep.subr.mxu0 %v2274_v20  ;;  %3126 = vmatprep.subr.mxu1 %v2338_v22  ;;  %v2385_v20 = vld [vmem:[#allocation8 + $0x3f0] sm:$0xff]  ;;  %v2320_v22 = vld [vmem:[#allocation8 + $0x1e8] sm:$0xff] }
 0x212   : > { %3056 = vmatpush1.msra.mxu0 %v2273_v23  ;;  %3127 = vmatpush1.msra.mxu1 %v2337_v25  ;;  %v2384_v23 = vld [vmem:[#allocation8 + $0x3e8] sm:$0xff]  ;;  %v2319_v25 = vld [vmem:[#allocation8 + $0x1e0] sm:$0xff]  ;;  %v2141_v32 = vadd.f32 %v2117_v15, %v4640_v19  ;;  %v2366_v15 = vld [vmem:[#allocation8 + $0x358] sm:$0xff] }
 0x213   : > { %3057 = vmatprep.subr.mxu0 %v2272_v26  ;;  %3128 = vmatprep.subr.mxu1 %v2336_v27  ;;  %v2383_v26 = vld [vmem:[#allocation8 + $0x3e0] sm:$0xff]  ;;  %v2120_v27 = vmul.f32 %v2096_v5, %v4712_v43  ;;  %v2305_v5 = vld [vmem:[#allocation8 + $0x170] sm:$0xff]  ;;  %v2368_v9 = vld [vmem:[#allocation8 + $0x368] sm:$0xff] }
 0x214   : > { %3058 = vmatpush1.msra.mxu0 %v2271_v6  ;;  %3129 = vmatpush1.msra.mxu1 %v2335_v49  ;;  %v2382_v6 = vld [vmem:[#allocation8 + $0x3d8] sm:$0xff]  ;;  %v2122_v49 = vmul.f32 %v2098_v10, %v4715_v50  ;;  %v2165_v44 = vmul.f32 0.7978846, %v2141_v32  ;;  %v2303_v10 = vld [vmem:[#allocation8 + $0x160] sm:$0xff] }
 0x215   : > { %3059 = vmatprep.subr.mxu0 %v2270_v11  ;;  %3130 = vmatprep.subr.mxu1 %v2334_v34  ;;  %v2381_v11 = vld [vmem:[#allocation8 + $0x3d0] sm:$0xff]  ;;  %v2316_v34 = vld [vmem:[#allocation8 + $0x1c8] sm:$0xff] }
 0x216   : > { %3060 = vmatpush1.msra.mxu0 %v2269_v36  ;;  %3131 = vmatpush1.msra.mxu1 %v2333_v37  ;;  %v2315_v36 = vld [vmem:[#allocation8 + $0x1c0] sm:$0xff]  ;;  %v2146_v48 = vadd.f32 %v2122_v49, %v4715_v50  ;;  %v2361_v49 = vld [vmem:[#allocation8 + $0x330] sm:$0xff] }
 0x217   : > { %3061 = vmatprep.subr.mxu0 %v2268_v40  ;;  %3132 = vmatprep.subr.mxu1 %v2332_v42  ;;  %v2379_v37 = vld [vmem:[#allocation8 + $0x3c0] sm:$0xff]  ;;  %v2144_v40 = vadd.f32 %v2120_v27, %v4712_v43  ;;  %v2314_v42 = vld [vmem:[#allocation8 + $0x1b8] sm:$0xff] }
 0x218   : > { %3062 = vmatpush1.msra.mxu0 %v2267_v45  ;;  %3133 = vmatpush1.msra.mxu1 %v2331_v47  ;;  %v2378_v45 = vld [vmem:[#allocation8 + $0x3b8] sm:$0xff]  ;;  %v2163_v47 = vmul.f32 0.7978846, %v2139_v28  ;;  %v2170_v56 = vmul.f32 0.7978846, %v2146_v48 }
 0x219   : > { %3063 = vmatprep.subr.mxu0 %v2266_v51  ;;  %3134 = vmatprep.subr.mxu1 %v2330_v52  ;;  %v2313_v51 = vld [vmem:[#allocation8 + $0x1b0] sm:$0xff]  ;;  %v2168_v54 = vmul.f32 0.7978846, %v2144_v40  ;;  %v2298_v27 = vld [vmem:[#allocation8 + $0x138] sm:$0xff] }
 0x21a   : > { %3064 = vmatpush1.msra.mxu0 %v2265_v53  ;;  %3135 = vmatpush1.msra.mxu1 %v2329_v41  ;;  %v2377_v52 = vld [vmem:[#allocation8 + $0x3b0] sm:$0xff]  ;;  %v2312_v53 = vld [vmem:[#allocation8 + $0x1a8] sm:$0xff]  ;;  %4135 = vtanh.f32 %v2163_v47  ;;  %v2362_v28 = vld [vmem:[#allocation8 + $0x338] sm:$0xff] }
 0x21b   : > { %3065 = vmatprep.subr.mxu0 %v2264_v29  ;;  %3136 = vmatprep.subr.mxu1 %v2328_v62  ;;  %v2376_v41 = vld [vmem:[#allocation8 + $0x3a8] sm:$0xff]  ;;  %v2311_v29 = vld [vmem:[#allocation8 + $0x1a0] sm:$0xff]  ;;  %4137 = vtanh.f32 %v2165_v44  ;;  %v2358_v40 = vld [vmem:[#allocation8 + $0x318] sm:$0xff] }
 0x21c   : > { %3066 = vmatpush1.msra.mxu0 %v2263_v46  ;;  %3137 = vmatpush1.msra.mxu1 %v2327_v55  ;;  %v2375_v62 = vld [vmem:[#allocation8 + $0x3a0] sm:$0xff]  ;;  %v2310_v46 = vld [vmem:[#allocation8 + $0x198] sm:$0xff]  ;;  %4139 = vtanh.f32 %v2168_v54  ;;  %v2357_v47 = vld [vmem:[#allocation8 + $0x310] sm:$0xff] }
 0x21d   : > { %3067 = vmatprep.subr.mxu0 %v2262_v57  ;;  %3138 = vmatprep.subr.mxu1 %v2326_v60  ;;  %v2374_v55 = vld [vmem:[#allocation8 + $0x398] sm:$0xff]  ;;  %v2373_v57 = vld [vmem:[#allocation8 + $0x390] sm:$0xff]  ;;  %v2308_v60 = vld [vmem:[#allocation8 + $0x188] sm:$0xff]  ;;  %4141 = vtanh.f32 %v2170_v56 }
 0x21e   : > { %3068 = vmatpush1.msra.mxu0 %v2261_v0  ;;  %3139 = vmatpush1.msra.mxu1 %v2325_v2  ;;  %v2307_v0 = vld [vmem:[#allocation8 + $0x180] sm:$0xff]  ;;  %v2356_v44 = vld [vmem:[#allocation8 + $0x308] sm:$0xff] }
 0x21f   : > { %3069 = vmatprep.subr.mxu0 %v2260_v3  ;;  %3140 = vmatprep.subr.mxu1 %v2324_v4  ;;  %v2371_v2 = vld [vmem:[#allocation8 + $0x380] sm:$0xff]  ;;  %v2306_v3 = vld [vmem:[#allocation8 + $0x178] sm:$0xff] }
 0x220   : > { %3070 = vmatpush1.msra.mxu0 %v2259_v7  ;;  %3141 = vmatpush1.msra.mxu1 %v2323_v8  ;;  %v2370_v4 = vld [vmem:[#allocation8 + $0x378] sm:$0xff]  ;;  %v2369_v7 = vld [vmem:[#allocation8 + $0x370] sm:$0xff]  ;;  %v2304_v8 = vld [vmem:[#allocation8 + $0x168] sm:$0xff] }
 0x221   : > { %3071 = vmatprep.subr.mxu0 %v2322_v12  ;;  %3142 = vmatprep.subr.mxu1 %v2386_v13  ;;  %v2367_v12 = vld [vmem:[#allocation8 + $0x360] sm:$0xff]  ;;  %v2302_v13 = vld [vmem:[#allocation8 + $0x158] sm:$0xff] }
 0x222   : > { %3072 = vmatpush2.msra.mxu0 %v2321_v16  ;;  %3143 = vmatpush2.msra.mxu1 %v2385_v20  ;;  %v2301_v16 = vld [vmem:[#allocation8 + $0x150] sm:$0xff] }
 0x223   : > { %3073 = vmatprep.subr.mxu0 %v2320_v22  ;;  %3144 = vmatprep.subr.mxu1 %v2384_v23  ;;  %v2365_v20 = vld [vmem:[#allocation8 + $0x350] sm:$0xff]  ;;  %v2300_v22 = vld [vmem:[#allocation8 + $0x148] sm:$0xff] }
 0x224   : > { %3074 = vmatpush2.msra.mxu0 %v2319_v25  ;;  %3145 = vmatpush2.msra.mxu1 %v2383_v26  ;;  %v2364_v23 = vld [vmem:[#allocation8 + $0x348] sm:$0xff]  ;;  %v2299_v25 = vld [vmem:[#allocation8 + $0x140] sm:$0xff] }
 0x225   : > { %3075 = vmatprep.subr.mxu0 %v2318_v31  ;;  %3146 = vmatprep.subr.mxu1 %v2382_v6  ;;  %v2363_v26 = vld [vmem:[#allocation8 + $0x340] sm:$0xff]  ;;  %v2297_v6 = vld [vmem:[#allocation8 + $0x130] sm:$0xff] }
 0x226   : > { %3076 = vmatpush2.msra.mxu0 %v2317_v33  ;;  %3147 = vmatpush2.msra.mxu1 %v2381_v11  ;;  %v2296_v33 = vld [vmem:[#allocation8 + $0x128] sm:$0xff] }
 0x227   : > { %3077 = vmatprep.subr.mxu0 %v2316_v34  ;;  %3148 = vmatprep.subr.mxu1 %v2380_v35  ;;  %v4136_v31 = vpop.eup %4135  ;;  %v2360_v11 = vld [vmem:[#allocation8 + $0x328] sm:$0xff]  ;;  %v2295_v34 = vld [vmem:[#allocation8 + $0x120] sm:$0xff] }
 0x228   : > { %3078 = vmatpush2.msra.mxu0 %v2315_v36  ;;  %3149 = vmatpush2.msra.mxu1 %v2379_v37  ;;  %v4138_v32 = vpop.eup %4137  ;;  %v2359_v35 = vld [vmem:[#allocation8 + $0x320] sm:$0xff]  ;;  %v2294_v37 = vld [vmem:[#allocation8 + $0x118] sm:$0xff]  ;;  %v2211_v48 = vadd.f32 1.0, %v4136_v31 }
 0x229   : > { %3079 = vmatprep.subr.mxu0 %v2314_v42  ;;  %3150 = vmatprep.subr.mxu1 %v2378_v45  ;;  %v4140_v36 = vpop.eup %4139  ;;  %v2293_v45 = vld [vmem:[#allocation8 + $0x110] sm:$0xff]  ;;  %v2406_v31 = vld [vmem:[#allocation8 + $0x498] sm:$0xff] }
 0x22a   : > { %3080 = vmatpush2.msra.mxu0 %v2313_v51  ;;  %3151 = vmatpush2.msra.mxu1 %v2377_v52  ;;  %v4142_v42 = vpop.eup %4141  ;;  %v2213_v51 = vadd.f32 1.0, %v4138_v32  ;;  %v2292_v52 = vld [vmem:[#allocation8 + $0x108] sm:$0xff]  ;;  %v2216_v54 = vadd.f32 1.0, %v4140_v36  ;;  %v2469_v32 = vld [vmem:[#allocation8 + $0x690] sm:$0xff]  ;;  %v4736_v36 = vpop.f32.mrf.mxu0 }
 0x22b   : > { %3081 = vmatprep.subr.mxu0 %v2312_v53  ;;  %3152 = vmatprep.subr.mxu1 %v2376_v41  ;;  %v2291_v53 = vld [vmem:[#allocation8 + $0x100] sm:$0xff] }
 0x22c   : > { %3082 = vmatpush2.msra.mxu0 %v2311_v29  ;;  %3153 = vmatpush2.msra.mxu1 %v2375_v62  ;;  %v2355_v41 = vld [vmem:[#allocation8 + $0x300] sm:$0xff]  ;;  %v2043_v29 = vmul.f32 0.5, %v4638_v1  ;;  %v2045_v62 = vmul.f32 0.5, %v4640_v19  ;;  %v2481_v19 = vld [vmem:[#allocation8 + $0x6f0] sm:$0xff] }
 0x22d   : > { %3083 = vmatprep.subr.mxu0 %v2310_v46  ;;  %3154 = vmatprep.subr.mxu1 %v2374_v55  ;;  %v2218_v46 = vadd.f32 1.0, %v4142_v42  ;;  %v4738_v42 = vpop.f32.mrf.mxu1 }
 0x22e   : > { %3084 = vmatpush2.msra.mxu0 %v2309_v30  ;;  %3155 = vmatpush2.msra.mxu1 %v2373_v57  ;;  %v2235_v55 = vmul.f32 %v2211_v48, %v2043_v29  ;;  %v2237_v56 = vmul.f32 %v2213_v51, %v2045_v62  ;;  %v2418_v30 = vld [vmem:[#allocation8 + $0x4f8] sm:$0xff]  ;;  %v4740_v48 = vld [vmem:[#allocation7 + $0x8] sm:$0xff]  ;;  %v2400_v51 = vld [vmem:[#allocation8 + $0x468] sm:$0xff]  ;;  %v1543_v29 = vpop.f32.mrf.mxu0 }
 0x22f   : > { %3085 = vmatprep.subr.mxu0 %v2308_v60  ;;  %3156 = vmatprep.subr.mxu1 %v2372_v61  ;;  %v2482_v57 = vld [vmem:[#allocation8 + $0x6f8] sm:$0xff]  ;;  %v2048_v60 = vmul.f32 0.5, %v4712_v43  ;;  %v2417_v61 = vld [vmem:[#allocation8 + $0x4f0] sm:$0xff]  ;;  %v1118_v62 = vrot.slane %v4740_v48, %v4678_v24 }
 0x230   : > { %3086 = vmatpush2.msra.mxu0 %v2307_v0  ;;  %3157 = vmatpush2.msra.mxu1 %v2371_v2  ;;  %v2050_v0 = vmul.f32 0.5, %v4715_v50  ;;  %v2414_v43 = vld [vmem:[#allocation8 + $0x4d8] sm:$0xff]  ;;  %v2413_v50 = vld [vmem:[#allocation8 + $0x4d0] sm:$0xff] }
 0x231   : > { %3087 = vmatprep.subr.mxu0 %v2306_v3  ;;  %3158 = vmatprep.subr.mxu1 %v2370_v4  ;;  %v2240_v1 = vmul.f32 %v2216_v54, %v2048_v60  ;;  %v2416_v3 = vld [vmem:[#allocation8 + $0x4e8] sm:$0xff]  ;;  %v2398_v54 = vld [vmem:[#allocation8 + $0x458] sm:$0xff] }
 0x232   : > { %3088 = vmatpush2.msra.mxu0 %v2305_v5  ;;  %3159 = vmatpush2.msra.mxu1 %v2369_v7  ;;  %v2242_v2 = vmul.f32 %v2218_v46, %v2050_v0  ;;  %v2480_v4 = vld [vmem:[#allocation8 + $0x6e8] sm:$0xff]  ;;  %v2415_v5 = vld [vmem:[#allocation8 + $0x4e0] sm:$0xff]  ;;  %v2462_v46 = vld [vmem:[#allocation8 + $0x658] sm:$0xff] }
 0x233   : > { %3089 = vmatprep.subr.mxu0 %v2304_v8  ;;  %3160 = vmatprep.subr.mxu1 %v2368_v9  ;;  %v2479_v7 = vld [vmem:[#allocation8 + $0x6e0] sm:$0xff]  ;;  %v2478_v8 = vld [vmem:[#allocation8 + $0x6d8] sm:$0xff]  ;;  %v2477_v9 = vld [vmem:[#allocation8 + $0x6d0] sm:$0xff] }
 0x234   : > { %3090 = vmatpush2.msra.mxu0 %v2303_v10  ;;  %3161 = vmatpush2.msra.mxu1 %v2367_v12  ;;  %v2412_v10 = vld [vmem:[#allocation8 + $0x4c8] sm:$0xff]  ;;  %v2395_v0 = vld [vmem:[#allocation8 + $0x440] sm:$0xff] }
 0x235   : > { %3091 = vmatprep.subr.mxu0 %v2302_v13  ;;  %3162 = vmatprep.subr.mxu1 %v2366_v15  ;;  %v2476_v12 = vld [vmem:[#allocation8 + $0x6c8] sm:$0xff]  ;;  %v2411_v13 = vld [vmem:[#allocation8 + $0x4c0] sm:$0xff] }
 0x236   : > { %3092 = vmatpush2.msra.mxu0 %v2301_v16  ;;  %3163 = vmatpush2.msra.mxu1 %v2365_v20  ;;  %v2475_v15 = vld [vmem:[#allocation8 + $0x6c0] sm:$0xff]  ;;  %v2410_v16 = vld [vmem:[#allocation8 + $0x4b8] sm:$0xff]  ;;  %v2460_v60 = vld [vmem:[#allocation8 + $0x648] sm:$0xff] }
 0x237   : > { %3093 = vmatprep.subr.mxu0 %v2300_v22  ;;  %3164 = vmatprep.subr.mxu1 %v2364_v23  ;;  %v2474_v20 = vld [vmem:[#allocation8 + $0x6b8] sm:$0xff]  ;;  %v2409_v22 = vld [vmem:[#allocation8 + $0x4b0] sm:$0xff] }
 0x238   : > { %3094 = vmatpush2.msra.mxu0 %v2299_v25  ;;  %3165 = vmatpush2.msra.mxu1 %v2363_v26  ;;  %v2473_v23 = vld [vmem:[#allocation8 + $0x6b0] sm:$0xff]  ;;  %v2408_v25 = vld [vmem:[#allocation8 + $0x4a8] sm:$0xff] }
 0x239   : > { %3095 = vmatprep.subr.mxu0 %v2298_v27  ;;  %3166 = vmatprep.subr.mxu1 %v2362_v28  ;;  %v2472_v26 = vld [vmem:[#allocation8 + $0x6a8] sm:$0xff]  ;;  %v2407_v27 = vld [vmem:[#allocation8 + $0x4a0] sm:$0xff] }
 0x23a   : > { %3096 = vmatpush2.msra.mxu0 %v2297_v6  ;;  %3167 = vmatpush2.msra.mxu1 %v2361_v49  ;;  %v2471_v28 = vld [vmem:[#allocation8 + $0x6a0] sm:$0xff]  ;;  %v2470_v6 = vld [vmem:[#allocation8 + $0x698] sm:$0xff]  ;;  %v2405_v49 = vld [vmem:[#allocation8 + $0x490] sm:$0xff] }
 0x23b   : > { %3097 = vmatprep.subr.mxu0 %v2296_v33  ;;  %3168 = vmatprep.subr.mxu1 %v2360_v11  ;;  %v2404_v33 = vld [vmem:[#allocation8 + $0x488] sm:$0xff] }
 0x23c   : > { %3098 = vmatpush2.msra.mxu0 %v2295_v34  ;;  %3169 = vmatpush2.msra.mxu1 %v2359_v35  ;;  %v2468_v11 = vld [vmem:[#allocation8 + $0x688] sm:$0xff]  ;;  %v2403_v34 = vld [vmem:[#allocation8 + $0x480] sm:$0xff] }
 0x23d   : > { %3099 = vmatprep.subr.mxu0 %v2294_v37  ;;  %3170 = vmatprep.subr.mxu1 %v2358_v40  ;;  %v2467_v35 = vld [vmem:[#allocation8 + $0x680] sm:$0xff]  ;;  %v2402_v37 = vld [vmem:[#allocation8 + $0x478] sm:$0xff] }
 0x23e   : > { %3100 = vmatpush2.msra.mxu0 %v2293_v45  ;;  %3171 = vmatpush2.msra.mxu1 %v2357_v47  ;;  %v2466_v40 = vld [vmem:[#allocation8 + $0x678] sm:$0xff]  ;;  %v2401_v45 = vld [vmem:[#allocation8 + $0x470] sm:$0xff] }
 0x23f   : > { %3101 = vmatprep.subr.mxu0 %v2292_v52  ;;  %3172 = vmatprep.subr.mxu1 %v2356_v44  ;;  %v2465_v47 = vld [vmem:[#allocation8 + $0x670] sm:$0xff]  ;;  %v2464_v52 = vld [vmem:[#allocation8 + $0x668] sm:$0xff]  ;;  %v1110_v44 = vrot.slane %v4740_v48, %v4675_v21 }
 0x240   : > { %3102 = vmatpush2.msra.mxu0 %v2291_v53  ;;  %3173 = vmatpush2.msra.mxu1 %v2355_v41  ;;  %v2399_v53 = vld [vmem:[#allocation8 + $0x460] sm:$0xff] }
 0x241   : > { %3104 = vmatmul.mubr.f32.vlgmr.msra.gmra.mxu0 %v2235_v55  ;;  %3175 = vmatmul.mubr.f32.vlgmr.msra.gmra.mxu1 %v2237_v56  ;;  %v2463_v41 = vld [vmem:[#allocation8 + $0x660] sm:$0xff]  ;;  %v1614_v55 = vpop.f32.mrf.mxu1  ;;  %v2397_v56 = vld [vmem:[#allocation8 + $0x450] sm:$0xff] }
 0x242   : > { %3181 = vmatprep.subr.mxu0 %v2418_v30  ;;  %3252 = vmatprep.subr.mxu1 %v2482_v57  ;;  %v2461_v30 = vld [vmem:[#allocation8 + $0x650] sm:$0xff]  ;;  %v2396_v57 = vld [vmem:[#allocation8 + $0x448] sm:$0xff] }
 0x243   : > { %3182 = vmatpush1.msra.mxu0 %v2417_v61  ;;  %3245 = vmatprep.mubr.f32.mxu0 %v2240_v1  ;;  %v4746_v61 = vadd.f32 %v1543_v29, %v1110_v44  ;;  %v2459_v1 = vld [vmem:[#allocation8 + $0x640] sm:$0xff] }
 0x244   : > { %3253 = vmatpush1.msra.mxu1 %v2481_v19  ;;  %3316 = vmatprep.mubr.f32.mxu1 %v2242_v2  ;;  %v2071_v19 = vmul.f32 0.044715, %v4660_v38  ;;  %v4749_v2 = vadd.f32 %v1614_v55, %v1118_v62  ;;  %v2444_v55 = vld [vmem:[#allocation8 + $0x5c8] sm:$0xff] }
 0x245   : > { %3183 = vmatprep.subr.mxu0 %v2416_v3  ;;  %3254 = vmatprep.subr.mxu1 %v2480_v4  ;;  %v2394_v3 = vld [vmem:[#allocation8 + $0x438] sm:$0xff] }
 0x246   : > { %3184 = vmatpush1.msra.mxu0 %v2415_v5  ;;  %3255 = vmatpush1.msra.mxu1 %v2479_v7  ;;  %v2458_v4 = vld [vmem:[#allocation8 + $0x638] sm:$0xff]  ;;  %v2073_v5 = vmul.f32 0.044715, %v4662_v39  ;;  %v2393_v7 = vld [vmem:[#allocation8 + $0x430] sm:$0xff] }
 0x247   : > { %3185 = vmatprep.subr.mxu0 %v2414_v43  ;;  %3256 = vmatprep.subr.mxu1 %v2478_v8  ;;  %v2457_v43 = vld [vmem:[#allocation8 + $0x630] sm:$0xff]  ;;  %v2392_v8 = vld [vmem:[#allocation8 + $0x428] sm:$0xff] }
 0x248   : > { %3186 = vmatpush1.msra.mxu0 %v2413_v50  ;;  %3257 = vmatpush1.msra.mxu1 %v2477_v9  ;;  %v2456_v50 = vld [vmem:[#allocation8 + $0x628] sm:$0xff]  ;;  %v2076_v9 = vmul.f32 0.044715, %v4746_v61 }
 0x249   : > { %3187 = vmatprep.subr.mxu0 %v2412_v10  ;;  %3258 = vmatprep.subr.mxu1 %v2476_v12  ;;  %v2391_v10 = vld [vmem:[#allocation8 + $0x420] sm:$0xff] }
 0x24a   : > { %3188 = vmatpush1.msra.mxu0 %v2411_v13  ;;  %3259 = vmatpush1.msra.mxu1 %v2475_v15  ;;  %v2455_v12 = vld [vmem:[#allocation8 + $0x620] sm:$0xff]  ;;  %v2095_v13 = vmul.f32 %v2071_v19, %v4660_v38  ;;  %v2078_v15 = vmul.f32 0.044715, %v4749_v2 }
 0x24b   : > { %3189 = vmatprep.subr.mxu0 %v2410_v16  ;;  %3260 = vmatprep.subr.mxu1 %v2474_v20  ;;  %v2390_v16 = vld [vmem:[#allocation8 + $0x418] sm:$0xff] }
 0x24c   : > { %3190 = vmatpush1.msra.mxu0 %v2409_v22  ;;  %3261 = vmatpush1.msra.mxu1 %v2473_v23  ;;  %v2454_v20 = vld [vmem:[#allocation8 + $0x618] sm:$0xff]  ;;  %v2097_v22 = vmul.f32 %v2073_v5, %v4662_v39  ;;  %v2389_v23 = vld [vmem:[#allocation8 + $0x410] sm:$0xff] }
 0x24d   : > { %3191 = vmatprep.subr.mxu0 %v2408_v25  ;;  %3262 = vmatprep.subr.mxu1 %v2472_v26  ;;  %v2453_v25 = vld [vmem:[#allocation8 + $0x610] sm:$0xff]  ;;  %v2388_v26 = vld [vmem:[#allocation8 + $0x408] sm:$0xff] }
 0x24e   : > { %3192 = vmatpush1.msra.mxu0 %v2407_v27  ;;  %3263 = vmatpush1.msra.mxu1 %v2471_v28  ;;  %v2452_v27 = vld [vmem:[#allocation8 + $0x608] sm:$0xff]  ;;  %v2100_v28 = vmul.f32 %v2076_v9, %v4746_v61  ;;  %v2505_v5 = vld [vmem:[#allocation8 + $0x7b0] sm:$0xff]  ;;  %v2503_v9 = vld [vmem:[#allocation8 + $0x7a0] sm:$0xff] }
 0x24f   : > { %3193 = vmatprep.subr.mxu0 %v2406_v31  ;;  %3264 = vmatprep.subr.mxu1 %v2470_v6  ;;  %v2387_v31 = vld [vmem:[#allocation8 + $0x400] sm:$0xff] }
 0x250   : > { %3194 = vmatpush1.msra.mxu0 %v2405_v49  ;;  %3265 = vmatpush1.msra.mxu1 %v2469_v32  ;;  %v2451_v6 = vld [vmem:[#allocation8 + $0x600] sm:$0xff]  ;;  %v2119_v49 = vmul.f32 %v2095_v13, %v4660_v38  ;;  %v2102_v32 = vmul.f32 %v2078_v15, %v4749_v2  ;;  %v2502_v13 = vld [vmem:[#allocation8 + $0x798] sm:$0xff] }
 0x251   : > { %3195 = vmatprep.subr.mxu0 %v2404_v33  ;;  %3266 = vmatprep.subr.mxu1 %v2468_v11  ;;  %v2450_v33 = vld [vmem:[#allocation8 + $0x5f8] sm:$0xff] }
 0x252   : > { %3196 = vmatpush1.msra.mxu0 %v2403_v34  ;;  %3267 = vmatpush1.msra.mxu1 %v2467_v35  ;;  %v2514_v11 = vld [vmem:[#allocation8 + $0x7f8] sm:$0xff]  ;;  %v2121_v34 = vmul.f32 %v2097_v22, %v4662_v39  ;;  %v2449_v35 = vld [vmem:[#allocation8 + $0x5f0] sm:$0xff]  ;;  %v2143_v44 = vadd.f32 %v2119_v49, %v4660_v38  ;;  %v2126_v29 = vmul.f32 %v2102_v32, %v4749_v2  ;;  %v2436_v22 = vld [vmem:[#allocation8 + $0x588] sm:$0xff] }
 0x253   : > { %3197 = vmatprep.subr.mxu0 %v2402_v37  ;;  %3268 = vmatprep.subr.mxu1 %v2466_v40  ;;  %v2513_v37 = vld [vmem:[#allocation8 + $0x7f0] sm:$0xff]  ;;  %v2448_v40 = vld [vmem:[#allocation8 + $0x5e8] sm:$0xff] }
 0x254   : > { %3198 = vmatpush1.msra.mxu0 %v2401_v45  ;;  %3269 = vmatpush1.msra.mxu1 %v2465_v47  ;;  %v2512_v45 = vld [vmem:[#allocation8 + $0x7e8] sm:$0xff]  ;;  %v2447_v47 = vld [vmem:[#allocation8 + $0x5e0] sm:$0xff]  ;;  %v2145_v62 = vadd.f32 %v2121_v34, %v4662_v39  ;;  %v2167_v19 = vmul.f32 0.7978846, %v2143_v44  ;;  %v2430_v34 = vld [vmem:[#allocation8 + $0x558] sm:$0xff] }
 0x255   : > { %3199 = vmatprep.subr.mxu0 %v2400_v51  ;;  %3270 = vmatprep.subr.mxu1 %v2464_v52  ;;  %v2511_v51 = vld [vmem:[#allocation8 + $0x7e0] sm:$0xff]  ;;  %v2124_v52 = vmul.f32 %v2100_v28, %v4746_v61  ;;  %v2498_v28 = vld [vmem:[#allocation8 + $0x778] sm:$0xff]  ;;  %v2432_v49 = vld [vmem:[#allocation8 + $0x568] sm:$0xff] }
 0x256   : > { %3200 = vmatpush1.msra.mxu0 %v2399_v53  ;;  %3271 = vmatpush1.msra.mxu1 %v2463_v41  ;;  %v2446_v53 = vld [vmem:[#allocation8 + $0x5d8] sm:$0xff]  ;;  %4143 = vtanh.f32 %v2167_v19  ;;  %v2496_v32 = vld [vmem:[#allocation8 + $0x768] sm:$0xff]  ;;  %v2421_v19 = vld [vmem:[#allocation8 + $0x510] sm:$0xff] }
 0x257   : > { %3201 = vmatprep.subr.mxu0 %v2398_v54  ;;  %3272 = vmatprep.subr.mxu1 %v2462_v46  ;;  %v2510_v41 = vld [vmem:[#allocation8 + $0x7d8] sm:$0xff]  ;;  %v2445_v54 = vld [vmem:[#allocation8 + $0x5d0] sm:$0xff] }
 0x258   : > { %3202 = vmatpush1.msra.mxu0 %v2397_v56  ;;  %3273 = vmatpush1.msra.mxu1 %v2461_v30  ;;  %v2509_v46 = vld [vmem:[#allocation8 + $0x7d0] sm:$0xff]  ;;  %v2508_v56 = vld [vmem:[#allocation8 + $0x7c8] sm:$0xff]  ;;  %v2443_v30 = vld [vmem:[#allocation8 + $0x5c0] sm:$0xff] }
 0x259   : > { %3203 = vmatprep.subr.mxu0 %v2396_v57  ;;  %3274 = vmatprep.subr.mxu1 %v2460_v60  ;;  %v2507_v57 = vld [vmem:[#allocation8 + $0x7c0] sm:$0xff]  ;;  %v2148_v60 = vadd.f32 %v2124_v52, %v4746_v61  ;;  %v2426_v44 = vld [vmem:[#allocation8 + $0x538] sm:$0xff] }
 0x25a   : > { %3204 = vmatpush1.msra.mxu0 %v2395_v0  ;;  %3275 = vmatpush1.msra.mxu1 %v2459_v1  ;;  %v2442_v0 = vld [vmem:[#allocation8 + $0x5b8] sm:$0xff]  ;;  %v2491_v52 = vld [vmem:[#allocation8 + $0x740] sm:$0xff] }
 0x25b   : > { %3205 = vmatprep.subr.mxu0 %v2394_v3  ;;  %3276 = vmatprep.subr.mxu1 %v2458_v4  ;;  %v2506_v1 = vld [vmem:[#allocation8 + $0x7b8] sm:$0xff]  ;;  %v2150_v3 = vadd.f32 %v2126_v29, %v4749_v2  ;;  %v2441_v4 = vld [vmem:[#allocation8 + $0x5b0] sm:$0xff] }
 0x25c   : > { %3206 = vmatpush1.msra.mxu0 %v2393_v7  ;;  %3277 = vmatpush1.msra.mxu1 %v2457_v43  ;;  %v2169_v7 = vmul.f32 0.7978846, %v2145_v62  ;;  %v2440_v43 = vld [vmem:[#allocation8 + $0x5a8] sm:$0xff]  ;;  %v2425_v29 = vld [vmem:[#allocation8 + $0x530] sm:$0xff] }
 0x25d   : > { %3207 = vmatprep.subr.mxu0 %v2392_v8  ;;  %3278 = vmatprep.subr.mxu1 %v2456_v50  ;;  %v2504_v8 = vld [vmem:[#allocation8 + $0x7a8] sm:$0xff]  ;;  %v2439_v50 = vld [vmem:[#allocation8 + $0x5a0] sm:$0xff]  ;;  %v2174_v15 = vmul.f32 0.7978846, %v2150_v3  ;;  %v2489_v62 = vld [vmem:[#allocation8 + $0x730] sm:$0xff] }
 0x25e   : > { %3208 = vmatpush1.msra.mxu0 %v2391_v10  ;;  %3279 = vmatpush1.msra.mxu1 %v2455_v12  ;;  %v2172_v10 = vmul.f32 0.7978846, %v2148_v60  ;;  %v2438_v12 = vld [vmem:[#allocation8 + $0x598] sm:$0xff]  ;;  %4145 = vtanh.f32 %v2169_v7  ;;  %v2485_v3 = vld [vmem:[#allocation8 + $0x710] sm:$0xff]  ;;  %v2420_v7 = vld [vmem:[#allocation8 + $0x508] sm:$0xff] }
 0x25f   : > { %3209 = vmatprep.subr.mxu0 %v2390_v16  ;;  %3280 = vmatprep.subr.mxu1 %v2454_v20  ;;  %v2437_v16 = vld [vmem:[#allocation8 + $0x590] sm:$0xff]  ;;  %v2422_v60 = vld [vmem:[#allocation8 + $0x518] sm:$0xff] }
 0x260   : > { %3210 = vmatpush1.msra.mxu0 %v2389_v23  ;;  %3281 = vmatpush1.msra.mxu1 %v2453_v25  ;;  %v2501_v20 = vld [vmem:[#allocation8 + $0x790] sm:$0xff]  ;;  %v2500_v23 = vld [vmem:[#allocation8 + $0x788] sm:$0xff]  ;;  %v2435_v25 = vld [vmem:[#allocation8 + $0x580] sm:$0xff]  ;;  %4147 = vtanh.f32 %v2172_v10  ;;  %v2049_v10 = vmul.f32 0.5, %v4662_v39 }
 0x261   : > { %3211 = vmatprep.subr.mxu0 %v2388_v26  ;;  %3282 = vmatprep.subr.mxu1 %v2452_v27  ;;  %v2499_v26 = vld [vmem:[#allocation8 + $0x780] sm:$0xff]  ;;  %v2434_v27 = vld [vmem:[#allocation8 + $0x578] sm:$0xff]  ;;  %4149 = vtanh.f32 %v2174_v15  ;;  %v2609_v39 = vld [vmem:[#allocation8 + $0xaf0] sm:$0xff] }
 0x262   : > { %3212 = vmatpush1.msra.mxu0 %v2387_v31  ;;  %3283 = vmatpush1.msra.mxu1 %v2451_v6  ;;  %v2433_v31 = vld [vmem:[#allocation8 + $0x570] sm:$0xff] }
 0x263   : > { %3213 = vmatprep.subr.mxu0 %v2450_v33  ;;  %3284 = vmatprep.subr.mxu1 %v2514_v11  ;;  %v2497_v6 = vld [vmem:[#allocation8 + $0x770] sm:$0xff]  ;;  %v2431_v33 = vld [vmem:[#allocation8 + $0x560] sm:$0xff] }
 0x264   : > { %3214 = vmatpush2.msra.mxu0 %v2449_v35  ;;  %3285 = vmatpush2.msra.mxu1 %v2513_v37  ;;  %v2495_v11 = vld [vmem:[#allocation8 + $0x760] sm:$0xff]  ;;  %v2494_v35 = vld [vmem:[#allocation8 + $0x758] sm:$0xff]  ;;  %v2429_v37 = vld [vmem:[#allocation8 + $0x550] sm:$0xff] }
 0x265   : > { %3215 = vmatprep.subr.mxu0 %v2448_v40  ;;  %3286 = vmatprep.subr.mxu1 %v2512_v45  ;;  %v2493_v40 = vld [vmem:[#allocation8 + $0x750] sm:$0xff]  ;;  %v2428_v45 = vld [vmem:[#allocation8 + $0x548] sm:$0xff] }
 0x266   : > { %3216 = vmatpush2.msra.mxu0 %v2447_v47  ;;  %3287 = vmatpush2.msra.mxu1 %v2511_v51  ;;  %v2492_v47 = vld [vmem:[#allocation8 + $0x748] sm:$0xff]  ;;  %v2427_v51 = vld [vmem:[#allocation8 + $0x540] sm:$0xff] }
 0x267   : > { %3217 = vmatprep.subr.mxu0 %v2446_v53  ;;  %3288 = vmatprep.subr.mxu1 %v2510_v41  ;;  %v2490_v53 = vld [vmem:[#allocation8 + $0x738] sm:$0xff]  ;;  %v4144_v41 = vpop.eup %4143 }
 0x268   : > { %3218 = vmatpush2.msra.mxu0 %v2445_v54  ;;  %3289 = vmatpush2.msra.mxu1 %v2509_v46  ;;  %v2424_v46 = vld [vmem:[#allocation8 + $0x528] sm:$0xff] }
 0x269   : > { %3219 = vmatprep.subr.mxu0 %v2444_v55  ;;  %3290 = vmatprep.subr.mxu1 %v2508_v56  ;;  %v2488_v55 = vld [vmem:[#allocation8 + $0x728] sm:$0xff]  ;;  %v2423_v56 = vld [vmem:[#allocation8 + $0x520] sm:$0xff] }
 0x26a   : > { %3220 = vmatpush2.msra.mxu0 %v2443_v30  ;;  %3291 = vmatpush2.msra.mxu1 %v2507_v57  ;;  %v2487_v30 = vld [vmem:[#allocation8 + $0x720] sm:$0xff] }
 0x26b   : > { %3221 = vmatprep.subr.mxu0 %v2442_v0  ;;  %3292 = vmatprep.subr.mxu1 %v2506_v1  ;;  %v4146_v54 = vpop.eup %4145  ;;  %v2486_v0 = vld [vmem:[#allocation8 + $0x718] sm:$0xff] }
 0x26c   : > { %3222 = vmatpush2.msra.mxu0 %v2441_v4  ;;  %3293 = vmatpush2.msra.mxu1 %v2505_v5  ;;  %v2215_v4 = vadd.f32 1.0, %v4144_v41  ;;  %v2217_v5 = vadd.f32 1.0, %v4146_v54  ;;  %v2599_v41 = vld [vmem:[#allocation8 + $0xaa0] sm:$0xff]  ;;  %v2533_v54 = vld [vmem:[#allocation8 + $0x890] sm:$0xff] }
 0x26d   : > { %3223 = vmatprep.subr.mxu0 %v2440_v43  ;;  %3294 = vmatprep.subr.mxu1 %v2504_v8  ;;  %v4148_v57 = vpop.eup %4147  ;;  %v2484_v43 = vld [vmem:[#allocation8 + $0x708] sm:$0xff]  ;;  %v2419_v8 = vld [vmem:[#allocation8 + $0x500] sm:$0xff] }
 0x26e   : > { %3224 = vmatpush2.msra.mxu0 %v2439_v50  ;;  %3295 = vmatpush2.msra.mxu1 %v2503_v9  ;;  %v4150_v1 = vpop.eup %4149  ;;  %v2483_v50 = vld [vmem:[#allocation8 + $0x700] sm:$0xff]  ;;  %v2047_v9 = vmul.f32 0.5, %v4660_v38 }
 0x26f   : > { %3225 = vmatprep.subr.mxu0 %v2438_v12  ;;  %3296 = vmatprep.subr.mxu1 %v2502_v13  ;;  %v2220_v12 = vadd.f32 1.0, %v4148_v57  ;;  %v2222_v13 = vadd.f32 1.0, %v4150_v1  ;;  %v2595_v57 = vld [vmem:[#allocation8 + $0xa80] sm:$0xff]  ;;  %v2530_v1 = vld [vmem:[#allocation8 + $0x878] sm:$0xff] }
 0x270   : > { %3226 = vmatpush2.msra.mxu0 %v2437_v16  ;;  %3297 = vmatpush2.msra.mxu1 %v2501_v20  ;;  %v2239_v15 = vmul.f32 %v2215_v4, %v2047_v9  ;;  %v2241_v16 = vmul.f32 %v2217_v5, %v2049_v10  ;;  %v2546_v20 = vld [vmem:[#allocation8 + $0x8f8] sm:$0xff]  ;;  %v4776_v4 = vpop.f32.mrf.mxu1  ;;  %v2529_v5 = vld [vmem:[#allocation8 + $0x870] sm:$0xff]  ;;  %v2527_v9 = vld [vmem:[#allocation8 + $0x860] sm:$0xff] }
 0x271   : > { %3227 = vmatprep.subr.mxu0 %v2436_v22  ;;  %3298 = vmatprep.subr.mxu1 %v2500_v23  ;;  %v2610_v22 = vld [vmem:[#allocation8 + $0xaf8] sm:$0xff]  ;;  %v2052_v23 = vmul.f32 0.5, %v4746_v61  ;;  %v2591_v10 = vld [vmem:[#allocation8 + $0xa60] sm:$0xff] }
 0x272   : > { %3228 = vmatpush2.msra.mxu0 %v2435_v25  ;;  %3299 = vmatpush2.msra.mxu1 %v2499_v26  ;;  %v2545_v25 = vld [vmem:[#allocation8 + $0x8f0] sm:$0xff]  ;;  %v2054_v26 = vmul.f32 0.5, %v4749_v2  ;;  %v2542_v61 = vld [vmem:[#allocation8 + $0x8d8] sm:$0xff] }
 0x273   : > { %3229 = vmatprep.subr.mxu0 %v2434_v27  ;;  %3300 = vmatprep.subr.mxu1 %v2498_v28  ;;  %v2244_v38 = vmul.f32 %v2220_v12, %v2052_v23  ;;  %v2544_v28 = vld [vmem:[#allocation8 + $0x8e8] sm:$0xff]  ;;  %v2541_v2 = vld [vmem:[#allocation8 + $0x8d0] sm:$0xff]  ;;  %v1756_v23 = vpop.f32.mrf.mxu1 }
 0x274   : > { %3230 = vmatpush2.msra.mxu0 %v2433_v31  ;;  %3301 = vmatpush2.msra.mxu1 %v2497_v6  ;;  %v2246_v27 = vmul.f32 %v2222_v13, %v2054_v26  ;;  %v2608_v31 = vld [vmem:[#allocation8 + $0xae8] sm:$0xff]  ;;  %v2543_v6 = vld [vmem:[#allocation8 + $0x8e0] sm:$0xff]  ;;  %v2589_v26 = vld [vmem:[#allocation8 + $0xa50] sm:$0xff] }
 0x275   : > { %3231 = vmatprep.subr.mxu0 %v2432_v49  ;;  %3302 = vmatprep.subr.mxu1 %v2496_v32  ;;  %v2607_v49 = vld [vmem:[#allocation8 + $0xae0] sm:$0xff]  ;;  %v2606_v32 = vld [vmem:[#allocation8 + $0xad8] sm:$0xff] }
 0x276   : > { %3232 = vmatpush2.msra.mxu0 %v2431_v33  ;;  %3303 = vmatpush2.msra.mxu1 %v2495_v11  ;;  %v2605_v33 = vld [vmem:[#allocation8 + $0xad0] sm:$0xff]  ;;  %v2540_v11 = vld [vmem:[#allocation8 + $0x8c8] sm:$0xff] }
 0x277   : > { %3233 = vmatprep.subr.mxu0 %v2430_v34  ;;  %3304 = vmatprep.subr.mxu1 %v2494_v35  ;;  %v2604_v34 = vld [vmem:[#allocation8 + $0xac8] sm:$0xff]  ;;  %v2539_v35 = vld [vmem:[#allocation8 + $0x8c0] sm:$0xff] }
 0x278   : > { %3234 = vmatpush2.msra.mxu0 %v2429_v37  ;;  %3305 = vmatpush2.msra.mxu1 %v2493_v40  ;;  %v2603_v37 = vld [vmem:[#allocation8 + $0xac0] sm:$0xff]  ;;  %v2538_v40 = vld [vmem:[#allocation8 + $0x8b8] sm:$0xff] }
 0x279   : > { %3235 = vmatprep.subr.mxu0 %v2428_v45  ;;  %3306 = vmatprep.subr.mxu1 %v2492_v47  ;;  %v2602_v45 = vld [vmem:[#allocation8 + $0xab8] sm:$0xff]  ;;  %v2537_v47 = vld [vmem:[#allocation8 + $0x8b0] sm:$0xff] }
 0x27a   : > { %3236 = vmatpush2.msra.mxu0 %v2427_v51  ;;  %3307 = vmatpush2.msra.mxu1 %v2491_v52  ;;  %v2601_v51 = vld [vmem:[#allocation8 + $0xab0] sm:$0xff]  ;;  %v2536_v52 = vld [vmem:[#allocation8 + $0x8a8] sm:$0xff] }
 0x27b   : > { %3237 = vmatprep.subr.mxu0 %v2426_v44  ;;  %3308 = vmatprep.subr.mxu1 %v2490_v53  ;;  %v2600_v44 = vld [vmem:[#allocation8 + $0xaa8] sm:$0xff]  ;;  %v2535_v53 = vld [vmem:[#allocation8 + $0x8a0] sm:$0xff] }
 0x27c   : > { %3238 = vmatpush2.msra.mxu0 %v2425_v29  ;;  %3309 = vmatpush2.msra.mxu1 %v2489_v62  ;;  %v2534_v29 = vld [vmem:[#allocation8 + $0x898] sm:$0xff] }
 0x27d   : > { %3239 = vmatprep.subr.mxu0 %v2424_v46  ;;  %3310 = vmatprep.subr.mxu1 %v2488_v55  ;;  %v2598_v62 = vld [vmem:[#allocation8 + $0xa98] sm:$0xff]  ;;  %v2597_v46 = vld [vmem:[#allocation8 + $0xa90] sm:$0xff]  ;;  %v2532_v55 = vld [vmem:[#allocation8 + $0x888] sm:$0xff] }
 0x27e   : > { %3240 = vmatpush2.msra.mxu0 %v2423_v56  ;;  %3311 = vmatpush2.msra.mxu1 %v2487_v30  ;;  %v2596_v56 = vld [vmem:[#allocation8 + $0xa88] sm:$0xff]  ;;  %v2531_v30 = vld [vmem:[#allocation8 + $0x880] sm:$0xff] }
 0x27f   : > { %3241 = vmatprep.subr.mxu0 %v2422_v60  ;;  %3312 = vmatprep.subr.mxu1 %v2486_v0  ;;  %v1106_v60 = vrot.slane %v4740_v48, %v4627_v58  ;;  %v4772_v0 = vpop.f32.mrf.mxu0 }
 0x280   : > { %3242 = vmatpush2.msra.mxu0 %v2421_v19  ;;  %3313 = vmatpush2.msra.mxu1 %v2485_v3  ;;  %v2594_v19 = vld [vmem:[#allocation8 + $0xa78] sm:$0xff]  ;;  %v1114_v3 = vrot.slane %v4740_v48, %v4630_v59 }
 0x281   : > { %3243 = vmatprep.subr.mxu0 %v2420_v7  ;;  %3314 = vmatprep.subr.mxu1 %v2484_v43  ;;  %v2593_v7 = vld [vmem:[#allocation8 + $0xa70] sm:$0xff]  ;;  %v2528_v43 = vld [vmem:[#allocation8 + $0x868] sm:$0xff]  ;;  %v4781_v12 = vadd.f32 %v4736_v36, %v1106_v60  ;;  %v1685_v13 = vpop.f32.mrf.mxu0 }
 0x282   : > { %3244 = vmatpush2.msra.mxu0 %v2419_v8  ;;  %3315 = vmatpush2.msra.mxu1 %v2483_v50  ;;  %v2592_v8 = vld [vmem:[#allocation8 + $0xa68] sm:$0xff]  ;;  %v1126_v50 = vrot.slane %v4740_v48, %v4705_v14  ;;  %v2577_v60 = vld [vmem:[#allocation8 + $0x9f0] sm:$0xff] }
 0x283   : > { %3246 = vmatmul.mubr.f32.vlgmr.msra.gmra.mxu0 %v2239_v15  ;;  %3317 = vmatmul.mubr.f32.vlgmr.msra.gmra.mxu1 %v2241_v16  ;;  %v1134_v15 = vrot.slane %v4740_v48, %v4708_v18  ;;  %v2526_v16 = vld [vmem:[#allocation8 + $0x858] sm:$0xff]  ;;  %v2524_v36 = vld [vmem:[#allocation8 + $0x848] sm:$0xff]  ;;  %v2523_v48 = vld [vmem:[#allocation8 + $0x840] sm:$0xff] }
 0x284   : > { %3323 = vmatprep.subr.mxu0 %v2546_v20  ;;  %3394 = vmatprep.subr.mxu1 %v2610_v22  ;;  %v2590_v20 = vld [vmem:[#allocation8 + $0xa58] sm:$0xff]  ;;  %v4786_v22 = vadd.f32 %v4738_v42, %v1114_v3  ;;  %v2640_v3 = vld [vmem:[#allocation8 + $0xbe8] sm:$0xff] }
 0x285   : > { %3324 = vmatpush1.msra.mxu0 %v2545_v25  ;;  %3387 = vmatprep.mubr.f32.mxu0 %v2244_v38  ;;  %v2525_v25 = vld [vmem:[#allocation8 + $0x850] sm:$0xff]  ;;  %v2588_v38 = vld [vmem:[#allocation8 + $0xa48] sm:$0xff]  ;;  %v2522_v42 = vld [vmem:[#allocation8 + $0x838] sm:$0xff] }
 0x286   : > { %3395 = vmatpush1.msra.mxu1 %v2609_v39  ;;  %3458 = vmatprep.mubr.f32.mxu1 %v2246_v27  ;;  %v4788_v39 = vadd.f32 %v1685_v13, %v1126_v50  ;;  %v2587_v27 = vld [vmem:[#allocation8 + $0xa40] sm:$0xff]  ;;  %v2574_v50 = vld [vmem:[#allocation8 + $0x9d8] sm:$0xff] }
 0x287   : > { %3325 = vmatprep.subr.mxu0 %v2544_v28  ;;  %3396 = vmatprep.subr.mxu1 %v2608_v31  ;;  %v2075_v28 = vmul.f32 0.044715, %v4781_v12  ;;  %v4791_v31 = vadd.f32 %v1756_v23, %v1134_v15  ;;  %v2573_v15 = vld [vmem:[#allocation8 + $0x9d0] sm:$0xff]  ;;  %v2636_v23 = vld [vmem:[#allocation8 + $0xbc8] sm:$0xff] }
 0x288   : > { %3326 = vmatpush1.msra.mxu0 %v2543_v6  ;;  %3397 = vmatpush1.msra.mxu1 %v2607_v49  ;;  %v2586_v6 = vld [vmem:[#allocation8 + $0xa38] sm:$0xff]  ;;  %v2077_v49 = vmul.f32 0.044715, %v4786_v22 }
 0x289   : > { %3327 = vmatprep.subr.mxu0 %v2542_v61  ;;  %3398 = vmatprep.subr.mxu1 %v2606_v32  ;;  %v2521_v61 = vld [vmem:[#allocation8 + $0x830] sm:$0xff] }
 0x28a   : > { %3328 = vmatpush1.msra.mxu0 %v2541_v2  ;;  %3399 = vmatpush1.msra.mxu1 %v2605_v33  ;;  %v2585_v32 = vld [vmem:[#allocation8 + $0xa30] sm:$0xff]  ;;  %v2520_v2 = vld [vmem:[#allocation8 + $0x828] sm:$0xff] }
 0x28b   : > { %3329 = vmatprep.subr.mxu0 %v2540_v11  ;;  %3400 = vmatprep.subr.mxu1 %v2604_v34  ;;  %v2584_v33 = vld [vmem:[#allocation8 + $0xa28] sm:$0xff]  ;;  %v2080_v11 = vmul.f32 0.044715, %v4788_v39  ;;  %v2519_v34 = vld [vmem:[#allocation8 + $0x820] sm:$0xff] }
 0x28c   : > { %3330 = vmatpush1.msra.mxu0 %v2539_v35  ;;  %3401 = vmatpush1.msra.mxu1 %v2603_v37  ;;  %v2583_v35 = vld [vmem:[#allocation8 + $0xa20] sm:$0xff]  ;;  %v2099_v37 = vmul.f32 %v2075_v28, %v4781_v12 }
 0x28d   : > { %3331 = vmatprep.subr.mxu0 %v2538_v40  ;;  %3402 = vmatprep.subr.mxu1 %v2602_v45  ;;  %v2082_v40 = vmul.f32 0.044715, %v4791_v31  ;;  %v2518_v45 = vld [vmem:[#allocation8 + $0x818] sm:$0xff] }
 0x28e   : > { %3332 = vmatpush1.msra.mxu0 %v2537_v47  ;;  %3403 = vmatpush1.msra.mxu1 %v2601_v51  ;;  %v2582_v47 = vld [vmem:[#allocation8 + $0xa18] sm:$0xff]  ;;  %v2101_v51 = vmul.f32 %v2077_v49, %v4786_v22 }
 0x28f   : > { %3333 = vmatprep.subr.mxu0 %v2536_v52  ;;  %3404 = vmatprep.subr.mxu1 %v2600_v44  ;;  %v2517_v52 = vld [vmem:[#allocation8 + $0x810] sm:$0xff] }
 0x290   : > { %3334 = vmatpush1.msra.mxu0 %v2535_v53  ;;  %3405 = vmatpush1.msra.mxu1 %v2599_v41  ;;  %v2581_v44 = vld [vmem:[#allocation8 + $0xa10] sm:$0xff]  ;;  %v2516_v53 = vld [vmem:[#allocation8 + $0x808] sm:$0xff] }
 0x291   : > { %3335 = vmatprep.subr.mxu0 %v2534_v29  ;;  %3406 = vmatprep.subr.mxu1 %v2598_v62  ;;  %v2580_v41 = vld [vmem:[#allocation8 + $0xa08] sm:$0xff]  ;;  %v2104_v29 = vmul.f32 %v2080_v11, %v4788_v39  ;;  %v2515_v62 = vld [vmem:[#allocation8 + $0x800] sm:$0xff] }
 0x292   : > { %3336 = vmatpush1.msra.mxu0 %v2533_v54  ;;  %3407 = vmatpush1.msra.mxu1 %v2597_v46  ;;  %v2579_v54 = vld [vmem:[#allocation8 + $0xa00] sm:$0xff]  ;;  %v2123_v46 = vmul.f32 %v2099_v37, %v4781_v12 }
 0x293   : > { %3337 = vmatprep.subr.mxu0 %v2532_v55  ;;  %3408 = vmatprep.subr.mxu1 %v2596_v56  ;;  %v2106_v55 = vmul.f32 %v2082_v40, %v4791_v31  ;;  %v2578_v56 = vld [vmem:[#allocation8 + $0x9f8] sm:$0xff]  ;;  %v2565_v40 = vld [vmem:[#allocation8 + $0x990] sm:$0xff] }
 0x294   : > { %3338 = vmatpush1.msra.mxu0 %v2531_v30  ;;  %3409 = vmatpush1.msra.mxu1 %v2595_v57  ;;  %v2642_v30 = vld [vmem:[#allocation8 + $0xbf8] sm:$0xff]  ;;  %v2125_v57 = vmul.f32 %v2101_v51, %v4786_v22  ;;  %v2628_v51 = vld [vmem:[#allocation8 + $0xb88] sm:$0xff] }
 0x295   : > { %3339 = vmatprep.subr.mxu0 %v2530_v1  ;;  %3410 = vmatprep.subr.mxu1 %v2594_v19  ;;  %v2641_v1 = vld [vmem:[#allocation8 + $0xbf0] sm:$0xff]  ;;  %v2576_v19 = vld [vmem:[#allocation8 + $0x9e8] sm:$0xff] }
 0x296   : > { %3340 = vmatpush1.msra.mxu0 %v2529_v5  ;;  %3411 = vmatpush1.msra.mxu1 %v2593_v7  ;;  %v2575_v5 = vld [vmem:[#allocation8 + $0x9e0] sm:$0xff]  ;;  %v2149_v13 = vadd.f32 %v2125_v57, %v4786_v22  ;;  %v2622_v57 = vld [vmem:[#allocation8 + $0xb58] sm:$0xff] }
 0x297   : > { %3341 = vmatprep.subr.mxu0 %v2528_v43  ;;  %3412 = vmatprep.subr.mxu1 %v2592_v8  ;;  %v2639_v7 = vld [vmem:[#allocation8 + $0xbe0] sm:$0xff]  ;;  %v2128_v43 = vmul.f32 %v2104_v29, %v4788_v39  ;;  %v2147_v8 = vadd.f32 %v2123_v46, %v4781_v12  ;;  %v2561_v29 = vld [vmem:[#allocation8 + $0x970] sm:$0xff]  ;;  %v2624_v46 = vld [vmem:[#allocation8 + $0xb68] sm:$0xff] }
 0x298   : > { %3342 = vmatpush1.msra.mxu0 %v2527_v9  ;;  %3413 = vmatpush1.msra.mxu1 %v2591_v10  ;;  %v2638_v9 = vld [vmem:[#allocation8 + $0xbd8] sm:$0xff]  ;;  %v2130_v10 = vmul.f32 %v2106_v55, %v4791_v31  ;;  %v2173_v49 = vmul.f32 0.7978846, %v2149_v13  ;;  %v2559_v55 = vld [vmem:[#allocation8 + $0x960] sm:$0xff] }
 0x299   : > { %3343 = vmatprep.subr.mxu0 %v2526_v16  ;;  %3414 = vmatprep.subr.mxu1 %v2590_v20  ;;  %v2637_v16 = vld [vmem:[#allocation8 + $0xbd0] sm:$0xff]  ;;  %v2572_v20 = vld [vmem:[#allocation8 + $0x9c8] sm:$0xff] }
 0x29a   : > { %3344 = vmatpush1.msra.mxu0 %v2525_v25  ;;  %3415 = vmatpush1.msra.mxu1 %v2589_v26  ;;  %v2571_v25 = vld [vmem:[#allocation8 + $0x9c0] sm:$0xff]  ;;  %v2154_v28 = vadd.f32 %v2130_v10, %v4791_v31  ;;  %v2617_v10 = vld [vmem:[#allocation8 + $0xb30] sm:$0xff] }
 0x29b   : > { %3345 = vmatprep.subr.mxu0 %v2524_v36  ;;  %3416 = vmatprep.subr.mxu1 %v2588_v38  ;;  %v2635_v26 = vld [vmem:[#allocation8 + $0xbc0] sm:$0xff]  ;;  %v2152_v36 = vadd.f32 %v2128_v43, %v4788_v39  ;;  %v2570_v38 = vld [vmem:[#allocation8 + $0x9b8] sm:$0xff] }
 0x29c   : > { %3346 = vmatpush1.msra.mxu0 %v2523_v48  ;;  %3417 = vmatpush1.msra.mxu1 %v2587_v27  ;;  %v2634_v48 = vld [vmem:[#allocation8 + $0xbb8] sm:$0xff]  ;;  %v2171_v27 = vmul.f32 0.7978846, %v2147_v8  ;;  %v2178_v37 = vmul.f32 0.7978846, %v2154_v28 }
 0x29d   : > { %3347 = vmatprep.subr.mxu0 %v2522_v42  ;;  %3418 = vmatprep.subr.mxu1 %v2586_v6  ;;  %v2569_v42 = vld [vmem:[#allocation8 + $0x9b0] sm:$0xff]  ;;  %v2176_v11 = vmul.f32 0.7978846, %v2152_v36  ;;  %v2554_v43 = vld [vmem:[#allocation8 + $0x938] sm:$0xff] }
 0x29e   : > { %3348 = vmatpush1.msra.mxu0 %v2521_v61  ;;  %3419 = vmatpush1.msra.mxu1 %v2585_v32  ;;  %v2633_v6 = vld [vmem:[#allocation8 + $0xbb0] sm:$0xff]  ;;  %v2568_v61 = vld [vmem:[#allocation8 + $0x9a8] sm:$0xff]  ;;  %4151 = vtanh.f32 %v2171_v27  ;;  %v2618_v8 = vld [vmem:[#allocation8 + $0xb38] sm:$0xff] }
 0x29f   : > { %3349 = vmatprep.subr.mxu0 %v2520_v2  ;;  %3420 = vmatprep.subr.mxu1 %v2584_v33  ;;  %v2632_v32 = vld [vmem:[#allocation8 + $0xba8] sm:$0xff]  ;;  %v2567_v2 = vld [vmem:[#allocation8 + $0x9a0] sm:$0xff]  ;;  %4153 = vtanh.f32 %v2173_v49  ;;  %v2614_v36 = vld [vmem:[#allocation8 + $0xb18] sm:$0xff] }
 0x2a0   : > { %3350 = vmatpush1.msra.mxu0 %v2519_v34  ;;  %3421 = vmatpush1.msra.mxu1 %v2583_v35  ;;  %v2631_v33 = vld [vmem:[#allocation8 + $0xba0] sm:$0xff]  ;;  %v2566_v34 = vld [vmem:[#allocation8 + $0x998] sm:$0xff]  ;;  %4155 = vtanh.f32 %v2176_v11  ;;  %v2613_v27 = vld [vmem:[#allocation8 + $0xb10] sm:$0xff] }
 0x2a1   : > { %3351 = vmatprep.subr.mxu0 %v2518_v45  ;;  %3422 = vmatprep.subr.mxu1 %v2582_v47  ;;  %v2630_v35 = vld [vmem:[#allocation8 + $0xb98] sm:$0xff]  ;;  %v2629_v45 = vld [vmem:[#allocation8 + $0xb90] sm:$0xff]  ;;  %v2564_v47 = vld [vmem:[#allocation8 + $0x988] sm:$0xff]  ;;  %4157 = vtanh.f32 %v2178_v37 }
 0x2a2   : > { %3352 = vmatpush1.msra.mxu0 %v2517_v52  ;;  %3423 = vmatpush1.msra.mxu1 %v2581_v44  ;;  %v2563_v52 = vld [vmem:[#allocation8 + $0x980] sm:$0xff]  ;;  %v2612_v49 = vld [vmem:[#allocation8 + $0xb08] sm:$0xff] }
 0x2a3   : > { %3353 = vmatprep.subr.mxu0 %v2516_v53  ;;  %3424 = vmatprep.subr.mxu1 %v2580_v41  ;;  %v2627_v44 = vld [vmem:[#allocation8 + $0xb80] sm:$0xff]  ;;  %v2562_v53 = vld [vmem:[#allocation8 + $0x978] sm:$0xff] }
 0x2a4   : > { %3354 = vmatpush1.msra.mxu0 %v2515_v62  ;;  %3425 = vmatpush1.msra.mxu1 %v2579_v54  ;;  %v2626_v41 = vld [vmem:[#allocation8 + $0xb78] sm:$0xff]  ;;  %v2625_v62 = vld [vmem:[#allocation8 + $0xb70] sm:$0xff]  ;;  %v2560_v54 = vld [vmem:[#allocation8 + $0x968] sm:$0xff] }
 0x2a5   : > { %3355 = vmatprep.subr.mxu0 %v2578_v56  ;;  %3426 = vmatprep.subr.mxu1 %v2642_v30  ;;  %v2623_v56 = vld [vmem:[#allocation8 + $0xb60] sm:$0xff]  ;;  %v2558_v30 = vld [vmem:[#allocation8 + $0x958] sm:$0xff] }
 0x2a6   : > { %3356 = vmatpush2.msra.mxu0 %v2577_v60  ;;  %3427 = vmatpush2.msra.mxu1 %v2641_v1  ;;  %v2557_v60 = vld [vmem:[#allocation8 + $0x950] sm:$0xff] }
 0x2a7   : > { %3357 = vmatprep.subr.mxu0 %v2576_v19  ;;  %3428 = vmatprep.subr.mxu1 %v2640_v3  ;;  %v2621_v1 = vld [vmem:[#allocation8 + $0xb50] sm:$0xff]  ;;  %v2556_v19 = vld [vmem:[#allocation8 + $0x948] sm:$0xff] }
 0x2a8   : > { %3358 = vmatpush2.msra.mxu0 %v2575_v5  ;;  %3429 = vmatpush2.msra.mxu1 %v2639_v7  ;;  %v2620_v3 = vld [vmem:[#allocation8 + $0xb48] sm:$0xff]  ;;  %v2555_v5 = vld [vmem:[#allocation8 + $0x940] sm:$0xff] }
 0x2a9   : > { %3359 = vmatprep.subr.mxu0 %v2574_v50  ;;  %3430 = vmatprep.subr.mxu1 %v2638_v9  ;;  %v2619_v7 = vld [vmem:[#allocation8 + $0xb40] sm:$0xff]  ;;  %v2553_v9 = vld [vmem:[#allocation8 + $0x930] sm:$0xff] }
 0x2aa   : > { %3360 = vmatpush2.msra.mxu0 %v2573_v15  ;;  %3431 = vmatpush2.msra.mxu1 %v2637_v16  ;;  %v2552_v15 = vld [vmem:[#allocation8 + $0x928] sm:$0xff] }
 0x2ab   : > { %3361 = vmatprep.subr.mxu0 %v2572_v20  ;;  %3432 = vmatprep.subr.mxu1 %v2636_v23  ;;  %v4152_v50 = vpop.eup %4151  ;;  %v2616_v16 = vld [vmem:[#allocation8 + $0xb28] sm:$0xff]  ;;  %v2551_v20 = vld [vmem:[#allocation8 + $0x920] sm:$0xff] }
 0x2ac   : > { %3362 = vmatpush2.msra.mxu0 %v2571_v25  ;;  %3433 = vmatpush2.msra.mxu1 %v2635_v26  ;;  %v4154_v13 = vpop.eup %4153  ;;  %v2615_v23 = vld [vmem:[#allocation8 + $0xb20] sm:$0xff]  ;;  %v2550_v26 = vld [vmem:[#allocation8 + $0x918] sm:$0xff]  ;;  %v2219_v28 = vadd.f32 1.0, %v4152_v50 }
 0x2ad   : > { %3363 = vmatprep.subr.mxu0 %v2570_v38  ;;  %3434 = vmatprep.subr.mxu1 %v2634_v48  ;;  %v4156_v25 = vpop.eup %4155  ;;  %v2549_v48 = vld [vmem:[#allocation8 + $0x910] sm:$0xff]  ;;  %v2662_v50 = vld [vmem:[#allocation8 + $0xc98] sm:$0xff] }
 0x2ae   : > { %3364 = vmatpush2.msra.mxu0 %v2569_v42  ;;  %3435 = vmatpush2.msra.mxu1 %v2633_v6  ;;  %v4158_v38 = vpop.eup %4157  ;;  %v2221_v42 = vadd.f32 1.0, %v4154_v13  ;;  %v2548_v6 = vld [vmem:[#allocation8 + $0x908] sm:$0xff]  ;;  %v2224_v11 = vadd.f32 1.0, %v4156_v25  ;;  %v2725_v13 = vld [vmem:[#allocation8 + $0xe90] sm:$0xff] }
 0x2af   : > { %3365 = vmatprep.subr.mxu0 %v2568_v61  ;;  %3436 = vmatprep.subr.mxu1 %v2632_v32  ;;  %v2547_v61 = vld [vmem:[#allocation8 + $0x900] sm:$0xff]  ;;  %v4184_v25 = vld [vmem:[#allocation7 + $0x8] sm:$0xff] }
 0x2b0   : > { %3366 = vmatpush2.msra.mxu0 %v2567_v2  ;;  %3437 = vmatpush2.msra.mxu1 %v2631_v33  ;;  %v2611_v32 = vld [vmem:[#allocation8 + $0xb00] sm:$0xff]  ;;  %v2051_v2 = vmul.f32 0.5, %v4781_v12  ;;  %v2053_v33 = vmul.f32 0.5, %v4786_v22  ;;  %v2737_v22 = vld [vmem:[#allocation8 + $0xef0] sm:$0xff] }
 0x2b1   : > { %3367 = vmatprep.subr.mxu0 %v2566_v34  ;;  %3438 = vmatprep.subr.mxu1 %v2630_v35  ;;  %v2226_v34 = vadd.f32 1.0, %v4158_v38  ;;  %v2658_v38 = vld [vmem:[#allocation8 + $0xc78] sm:$0xff] }
 0x2b2   : > { %3368 = vmatpush2.msra.mxu0 %v2565_v40  ;;  %3439 = vmatpush2.msra.mxu1 %v2629_v45  ;;  %v2243_v35 = vmul.f32 %v2219_v28, %v2051_v2  ;;  %v2245_v37 = vmul.f32 %v2221_v42, %v2053_v33  ;;  %v2674_v40 = vld [vmem:[#allocation8 + $0xcf8] sm:$0xff]  ;;  %v4816_v28 = vpop.f32.mrf.mxu1  ;;  %v2657_v42 = vld [vmem:[#allocation8 + $0xc70] sm:$0xff]  ;;  %v2655_v33 = vld [vmem:[#allocation8 + $0xc60] sm:$0xff] }
 0x2b3   : > { %3369 = vmatprep.subr.mxu0 %v2564_v47  ;;  %3440 = vmatprep.subr.mxu1 %v2628_v51  ;;  %v2738_v45 = vld [vmem:[#allocation8 + $0xef8] sm:$0xff]  ;;  %v2056_v47 = vmul.f32 0.5, %v4788_v39  ;;  %v2673_v51 = vld [vmem:[#allocation8 + $0xcf0] sm:$0xff] }
 0x2b4   : > { %3370 = vmatpush2.msra.mxu0 %v2563_v52  ;;  %3441 = vmatpush2.msra.mxu1 %v2627_v44  ;;  %v2058_v52 = vmul.f32 0.5, %v4791_v31  ;;  %v2670_v39 = vld [vmem:[#allocation8 + $0xcd8] sm:$0xff]  ;;  %v2669_v31 = vld [vmem:[#allocation8 + $0xcd0] sm:$0xff] }
 0x2b5   : > { %3371 = vmatprep.subr.mxu0 %v2562_v53  ;;  %3442 = vmatprep.subr.mxu1 %v2626_v41  ;;  %v2248_v12 = vmul.f32 %v2224_v11, %v2056_v47  ;;  %v2672_v53 = vld [vmem:[#allocation8 + $0xce8] sm:$0xff]  ;;  %v2719_v11 = vld [vmem:[#allocation8 + $0xe60] sm:$0xff] }
 0x2b6   : > { %3372 = vmatpush2.msra.mxu0 %v2561_v29  ;;  %3443 = vmatpush2.msra.mxu1 %v2625_v62  ;;  %v2250_v44 = vmul.f32 %v2226_v34, %v2058_v52  ;;  %v2736_v41 = vld [vmem:[#allocation8 + $0xee8] sm:$0xff]  ;;  %v2671_v29 = vld [vmem:[#allocation8 + $0xce0] sm:$0xff]  ;;  %v2653_v52 = vld [vmem:[#allocation8 + $0xc50] sm:$0xff] }
 0x2b7   : > { %3373 = vmatprep.subr.mxu0 %v2560_v54  ;;  %3444 = vmatprep.subr.mxu1 %v2624_v46  ;;  %v2735_v62 = vld [vmem:[#allocation8 + $0xee0] sm:$0xff]  ;;  %v2734_v54 = vld [vmem:[#allocation8 + $0xed8] sm:$0xff]  ;;  %v2733_v46 = vld [vmem:[#allocation8 + $0xed0] sm:$0xff] }
 0x2b8   : > { %3374 = vmatpush2.msra.mxu0 %v2559_v55  ;;  %3445 = vmatpush2.msra.mxu1 %v2623_v56  ;;  %v2668_v55 = vld [vmem:[#allocation8 + $0xcc8] sm:$0xff] }
 0x2b9   : > { %3375 = vmatprep.subr.mxu0 %v2558_v30  ;;  %3446 = vmatprep.subr.mxu1 %v2622_v57  ;;  %v2732_v56 = vld [vmem:[#allocation8 + $0xec8] sm:$0xff]  ;;  %v2667_v30 = vld [vmem:[#allocation8 + $0xcc0] sm:$0xff] }
 0x2ba   : > { %3376 = vmatpush2.msra.mxu0 %v2557_v60  ;;  %3447 = vmatpush2.msra.mxu1 %v2621_v1  ;;  %v2731_v57 = vld [vmem:[#allocation8 + $0xec0] sm:$0xff]  ;;  %v2666_v60 = vld [vmem:[#allocation8 + $0xcb8] sm:$0xff] }
 0x2bb   : > { %3377 = vmatprep.subr.mxu0 %v2556_v19  ;;  %3448 = vmatprep.subr.mxu1 %v2620_v3  ;;  %v2730_v1 = vld [vmem:[#allocation8 + $0xeb8] sm:$0xff]  ;;  %v2665_v19 = vld [vmem:[#allocation8 + $0xcb0] sm:$0xff] }
 0x2bc   : > { %3378 = vmatpush2.msra.mxu0 %v2555_v5  ;;  %3449 = vmatpush2.msra.mxu1 %v2619_v7  ;;  %v2729_v3 = vld [vmem:[#allocation8 + $0xeb0] sm:$0xff]  ;;  %v2664_v5 = vld [vmem:[#allocation8 + $0xca8] sm:$0xff] }
 0x2bd   : > { %3379 = vmatprep.subr.mxu0 %v2554_v43  ;;  %3450 = vmatprep.subr.mxu1 %v2618_v8  ;;  %v2728_v7 = vld [vmem:[#allocation8 + $0xea8] sm:$0xff]  ;;  %v2663_v43 = vld [vmem:[#allocation8 + $0xca0] sm:$0xff] }
 0x2be   : > { %3380 = vmatpush2.msra.mxu0 %v2553_v9  ;;  %3451 = vmatpush2.msra.mxu1 %v2617_v10  ;;  %v2727_v8 = vld [vmem:[#allocation8 + $0xea0] sm:$0xff]  ;;  %v2726_v9 = vld [vmem:[#allocation8 + $0xe98] sm:$0xff]  ;;  %v2661_v10 = vld [vmem:[#allocation8 + $0xc90] sm:$0xff] }
 0x2bf   : > { %3381 = vmatprep.subr.mxu0 %v2552_v15  ;;  %3452 = vmatprep.subr.mxu1 %v2616_v16  ;;  %v2660_v15 = vld [vmem:[#allocation8 + $0xc88] sm:$0xff] }
 0x2c0   : > { %3382 = vmatpush2.msra.mxu0 %v2551_v20  ;;  %3453 = vmatpush2.msra.mxu1 %v2615_v23  ;;  %v2724_v16 = vld [vmem:[#allocation8 + $0xe88] sm:$0xff]  ;;  %v2659_v20 = vld [vmem:[#allocation8 + $0xc80] sm:$0xff] }
 0x2c1   : > { %3383 = vmatprep.subr.mxu0 %v2550_v26  ;;  %3454 = vmatprep.subr.mxu1 %v2614_v36  ;;  %v2723_v23 = vld [vmem:[#allocation8 + $0xe80] sm:$0xff]  ;;  %v1122_v26 = vrot.slane %v4184_v25, %v4647_v63  ;;  %v4813_v36 = vpop.f32.mrf.mxu0 }
 0x2c2   : > { %3384 = vmatpush2.msra.mxu0 %v2549_v48  ;;  %3455 = vmatpush2.msra.mxu1 %v2613_v27  ;;  %v2722_v48 = vld [vmem:[#allocation8 + $0xe78] sm:$0xff]  ;;  %v1130_v27 = vrot.slane %v4184_v25, %v4650_v17 }
 0x2c3   : > { %3385 = vmatprep.subr.mxu0 %v2548_v6  ;;  %3456 = vmatprep.subr.mxu1 %v2612_v49  ;;  %v2721_v6 = vld [vmem:[#allocation8 + $0xe70] sm:$0xff]  ;;  %v4818_v49 = vld [vmem:[#allocation7 + $0x10] sm:$0xff]  ;;  %v4823_v34 = vadd.f32 %v4772_v0, %v1122_v26  ;;  %v2652_v0 = vld [vmem:[#allocation8 + $0xc48] sm:$0xff] }
 0x2c4   : > { %3386 = vmatpush2.msra.mxu0 %v2547_v61  ;;  %3457 = vmatpush2.msra.mxu1 %v2611_v32  ;;  %v2656_v61 = vld [vmem:[#allocation8 + $0xc68] sm:$0xff]  ;;  %v1142_v2 = vrot.slane %v4818_v49, %v4675_v21  ;;  %v4828_v47 = vadd.f32 %v4776_v4, %v1130_v27  ;;  %v2650_v4 = vld [vmem:[#allocation8 + $0xc38] sm:$0xff]  ;;  %v2705_v26 = vld [vmem:[#allocation8 + $0xdf0] sm:$0xff] }
 0x2c5   : > { %3388 = vmatmul.mubr.f32.vlgmr.msra.gmra.mxu0 %v2243_v35  ;;  %3459 = vmatmul.mubr.f32.vlgmr.msra.gmra.mxu1 %v2245_v37  ;;  %v2720_v32 = vld [vmem:[#allocation8 + $0xe68] sm:$0xff]  ;;  %v1827_v35 = vpop.f32.mrf.mxu0  ;;  %v1150_v37 = vrot.slane %v4818_v49, %v4678_v24  ;;  %v2651_v24 = vld [vmem:[#allocation8 + $0xc40] sm:$0xff] }
 0x2c6   : > { %3465 = vmatprep.subr.mxu0 %v2674_v40  ;;  %3536 = vmatprep.subr.mxu1 %v2738_v45  ;;  %v2654_v40 = vld [vmem:[#allocation8 + $0xc58] sm:$0xff]  ;;  %v2768_v27 = vld [vmem:[#allocation8 + $0xfe8] sm:$0xff] }
 0x2c7   : > { %3466 = vmatpush1.msra.mxu0 %v2673_v51  ;;  %3529 = vmatprep.mubr.f32.mxu0 %v2248_v12  ;;  %v2718_v45 = vld [vmem:[#allocation8 + $0xe58] sm:$0xff]  ;;  %v1898_v51 = vpop.f32.mrf.mxu1  ;;  %v2717_v12 = vld [vmem:[#allocation8 + $0xe50] sm:$0xff] }
 0x2c8   : > { %3537 = vmatpush1.msra.mxu1 %v2737_v22  ;;  %3600 = vmatprep.mubr.f32.mxu1 %v2250_v44  ;;  %v2716_v22 = vld [vmem:[#allocation8 + $0xe48] sm:$0xff]  ;;  %v4830_v44 = vadd.f32 %v1827_v35, %v1142_v2  ;;  %v2702_v2 = vld [vmem:[#allocation8 + $0xdd8] sm:$0xff] }
 0x2c9   : > { %3467 = vmatprep.subr.mxu0 %v2672_v53  ;;  %3538 = vmatprep.subr.mxu1 %v2736_v41  ;;  %v2715_v53 = vld [vmem:[#allocation8 + $0xe40] sm:$0xff]  ;;  %v2079_v41 = vmul.f32 0.044715, %v4823_v34 }
 0x2ca   : > { %3468 = vmatpush1.msra.mxu0 %v2671_v29  ;;  %3539 = vmatpush1.msra.mxu1 %v2735_v62  ;;  %v4833_v29 = vadd.f32 %v1898_v51, %v1150_v37  ;;  %v2714_v62 = vld [vmem:[#allocation8 + $0xe38] sm:$0xff]  ;;  %v2701_v37 = vld [vmem:[#allocation8 + $0xdd0] sm:$0xff]  ;;  %v2764_v51 = vld [vmem:[#allocation8 + $0xfc8] sm:$0xff] }
 0x2cb   : > { %3469 = vmatprep.subr.mxu0 %v2670_v39  ;;  %3540 = vmatprep.subr.mxu1 %v2734_v54  ;;  %v2081_v39 = vmul.f32 0.044715, %v4828_v47  ;;  %v2649_v54 = vld [vmem:[#allocation8 + $0xc30] sm:$0xff] }
 0x2cc   : > { %3470 = vmatpush1.msra.mxu0 %v2669_v31  ;;  %3541 = vmatpush1.msra.mxu1 %v2733_v46  ;;  %v2713_v31 = vld [vmem:[#allocation8 + $0xe30] sm:$0xff]  ;;  %v2648_v46 = vld [vmem:[#allocation8 + $0xc28] sm:$0xff] }
 0x2cd   : > { %3471 = vmatprep.subr.mxu0 %v2668_v55  ;;  %3542 = vmatprep.subr.mxu1 %v2732_v56  ;;  %v2712_v55 = vld [vmem:[#allocation8 + $0xe28] sm:$0xff]  ;;  %v2084_v56 = vmul.f32 0.044715, %v4830_v44 }
 0x2ce   : > { %3472 = vmatpush1.msra.mxu0 %v2667_v30  ;;  %3543 = vmatpush1.msra.mxu1 %v2731_v57  ;;  %v2647_v30 = vld [vmem:[#allocation8 + $0xc20] sm:$0xff] }
 0x2cf   : > { %3473 = vmatprep.subr.mxu0 %v2666_v60  ;;  %3544 = vmatprep.subr.mxu1 %v2730_v1  ;;  %v2711_v57 = vld [vmem:[#allocation8 + $0xe20] sm:$0xff]  ;;  %v2103_v60 = vmul.f32 %v2079_v41, %v4823_v34  ;;  %v2086_v1 = vmul.f32 0.044715, %v4833_v29 }
 0x2d0   : > { %3474 = vmatpush1.msra.mxu0 %v2665_v19  ;;  %3545 = vmatpush1.msra.mxu1 %v2729_v3  ;;  %v2646_v19 = vld [vmem:[#allocation8 + $0xc18] sm:$0xff] }
 0x2d1   : > { %3475 = vmatprep.subr.mxu0 %v2664_v5  ;;  %3546 = vmatprep.subr.mxu1 %v2728_v7  ;;  %v2710_v3 = vld [vmem:[#allocation8 + $0xe18] sm:$0xff]  ;;  %v2105_v5 = vmul.f32 %v2081_v39, %v4828_v47  ;;  %v2645_v7 = vld [vmem:[#allocation8 + $0xc10] sm:$0xff] }
 0x2d2   : > { %3476 = vmatpush1.msra.mxu0 %v2663_v43  ;;  %3547 = vmatpush1.msra.mxu1 %v2727_v8  ;;  %v2709_v43 = vld [vmem:[#allocation8 + $0xe10] sm:$0xff]  ;;  %v2644_v8 = vld [vmem:[#allocation8 + $0xc08] sm:$0xff] }
 0x2d3   : > { %3477 = vmatprep.subr.mxu0 %v2662_v50  ;;  %3548 = vmatprep.subr.mxu1 %v2726_v9  ;;  %v2708_v50 = vld [vmem:[#allocation8 + $0xe08] sm:$0xff]  ;;  %v2108_v9 = vmul.f32 %v2084_v56, %v4830_v44  ;;  %v2129_v25 = vmul.f32 %v2105_v5, %v4828_v47 }
 0x2d4   : > { %3478 = vmatpush1.msra.mxu0 %v2661_v10  ;;  %3549 = vmatpush1.msra.mxu1 %v2725_v13  ;;  %v2643_v10 = vld [vmem:[#allocation8 + $0xc00] sm:$0xff]  ;;  %v2756_v5 = vld [vmem:[#allocation8 + $0xf88] sm:$0xff] }
 0x2d5   : > { %3479 = vmatprep.subr.mxu0 %v2660_v15  ;;  %3550 = vmatprep.subr.mxu1 %v2724_v16  ;;  %v2707_v13 = vld [vmem:[#allocation8 + $0xe00] sm:$0xff]  ;;  %v2127_v15 = vmul.f32 %v2103_v60, %v4823_v34  ;;  %v2110_v16 = vmul.f32 %v2086_v1, %v4833_v29  ;;  %v2153_v35 = vadd.f32 %v2129_v25, %v4828_v47  ;;  %v2693_v1 = vld [vmem:[#allocation8 + $0xd90] sm:$0xff]  ;;  %v2750_v25 = vld [vmem:[#allocation8 + $0xf58] sm:$0xff] }
 0x2d6   : > { %3480 = vmatpush1.msra.mxu0 %v2659_v20  ;;  %3551 = vmatpush1.msra.mxu1 %v2723_v23  ;;  %v2706_v20 = vld [vmem:[#allocation8 + $0xdf8] sm:$0xff] }
 0x2d7   : > { %3481 = vmatprep.subr.mxu0 %v2658_v38  ;;  %3552 = vmatprep.subr.mxu1 %v2722_v48  ;;  %v2770_v23 = vld [vmem:[#allocation8 + $0xff8] sm:$0xff]  ;;  %v2769_v38 = vld [vmem:[#allocation8 + $0xff0] sm:$0xff]  ;;  %v2704_v48 = vld [vmem:[#allocation8 + $0xde8] sm:$0xff]  ;;  %v2177_v39 = vmul.f32 0.7978846, %v2153_v35 }
 0x2d8   : > { %3482 = vmatpush1.msra.mxu0 %v2657_v42  ;;  %3553 = vmatpush1.msra.mxu1 %v2721_v6  ;;  %v2703_v42 = vld [vmem:[#allocation8 + $0xde0] sm:$0xff] }
 0x2d9   : > { %3483 = vmatprep.subr.mxu0 %v2656_v61  ;;  %3554 = vmatprep.subr.mxu1 %v2720_v32  ;;  %v2767_v6 = vld [vmem:[#allocation8 + $0xfe0] sm:$0xff]  ;;  %v2132_v61 = vmul.f32 %v2108_v9, %v4830_v44  ;;  %v2151_v32 = vadd.f32 %v2127_v15, %v4823_v34  ;;  %v2689_v9 = vld [vmem:[#allocation8 + $0xd70] sm:$0xff]  ;;  %v2752_v15 = vld [vmem:[#allocation8 + $0xf68] sm:$0xff] }
 0x2da   : > { %3484 = vmatpush1.msra.mxu0 %v2655_v33  ;;  %3555 = vmatpush1.msra.mxu1 %v2719_v11  ;;  %v2766_v33 = vld [vmem:[#allocation8 + $0xfd8] sm:$0xff]  ;;  %v2134_v11 = vmul.f32 %v2110_v16, %v4833_v29  ;;  %v2687_v16 = vld [vmem:[#allocation8 + $0xd60] sm:$0xff] }
 0x2db   : > { %3485 = vmatprep.subr.mxu0 %v2654_v40  ;;  %3556 = vmatprep.subr.mxu1 %v2718_v45  ;;  %v2765_v40 = vld [vmem:[#allocation8 + $0xfd0] sm:$0xff]  ;;  %v2700_v45 = vld [vmem:[#allocation8 + $0xdc8] sm:$0xff] }
 0x2dc   : > { %3486 = vmatpush1.msra.mxu0 %v2653_v52  ;;  %3557 = vmatpush1.msra.mxu1 %v2717_v12  ;;  %v2699_v52 = vld [vmem:[#allocation8 + $0xdc0] sm:$0xff]  ;;  %v2158_v41 = vadd.f32 %v2134_v11, %v4833_v29  ;;  %v2745_v11 = vld [vmem:[#allocation8 + $0xf30] sm:$0xff] }
 0x2dd   : > { %3487 = vmatprep.subr.mxu0 %v2652_v0  ;;  %3558 = vmatprep.subr.mxu1 %v2716_v22  ;;  %v2763_v12 = vld [vmem:[#allocation8 + $0xfc0] sm:$0xff]  ;;  %v2156_v0 = vadd.f32 %v2132_v61, %v4830_v44  ;;  %v2698_v22 = vld [vmem:[#allocation8 + $0xdb8] sm:$0xff] }
 0x2de   : > { %3488 = vmatpush1.msra.mxu0 %v2651_v24  ;;  %3559 = vmatpush1.msra.mxu1 %v2715_v53  ;;  %v2762_v24 = vld [vmem:[#allocation8 + $0xfb8] sm:$0xff]  ;;  %v2175_v53 = vmul.f32 0.7978846, %v2151_v32  ;;  %v2182_v60 = vmul.f32 0.7978846, %v2158_v41 }
 0x2df   : > { %3489 = vmatprep.subr.mxu0 %v2650_v4  ;;  %3560 = vmatprep.subr.mxu1 %v2714_v62  ;;  %v2697_v4 = vld [vmem:[#allocation8 + $0xdb0] sm:$0xff]  ;;  %v2180_v56 = vmul.f32 0.7978846, %v2156_v0  ;;  %v2682_v61 = vld [vmem:[#allocation8 + $0xd38] sm:$0xff] }
 0x2e0   : > { %3490 = vmatpush1.msra.mxu0 %v2649_v54  ;;  %3561 = vmatpush1.msra.mxu1 %v2713_v31  ;;  %v2761_v62 = vld [vmem:[#allocation8 + $0xfb0] sm:$0xff]  ;;  %v2696_v54 = vld [vmem:[#allocation8 + $0xda8] sm:$0xff]  ;;  %4159 = vtanh.f32 %v2175_v53  ;;  %v2746_v32 = vld [vmem:[#allocation8 + $0xf38] sm:$0xff] }
 0x2e1   : > { %3491 = vmatprep.subr.mxu0 %v2648_v46  ;;  %3562 = vmatprep.subr.mxu1 %v2712_v55  ;;  %v2760_v31 = vld [vmem:[#allocation8 + $0xfa8] sm:$0xff]  ;;  %v2695_v46 = vld [vmem:[#allocation8 + $0xda0] sm:$0xff]  ;;  %4161 = vtanh.f32 %v2177_v39  ;;  %v2742_v0 = vld [vmem:[#allocation8 + $0xf18] sm:$0xff] }
 0x2e2   : > { %3492 = vmatpush1.msra.mxu0 %v2647_v30  ;;  %3563 = vmatpush1.msra.mxu1 %v2711_v57  ;;  %v2759_v55 = vld [vmem:[#allocation8 + $0xfa0] sm:$0xff]  ;;  %v2694_v30 = vld [vmem:[#allocation8 + $0xd98] sm:$0xff]  ;;  %4163 = vtanh.f32 %v2180_v56  ;;  %v2741_v53 = vld [vmem:[#allocation8 + $0xf10] sm:$0xff] }
 0x2e3   : > { %3493 = vmatprep.subr.mxu0 %v2646_v19  ;;  %3564 = vmatprep.subr.mxu1 %v2710_v3  ;;  %v2758_v57 = vld [vmem:[#allocation8 + $0xf98] sm:$0xff]  ;;  %v2757_v19 = vld [vmem:[#allocation8 + $0xf90] sm:$0xff]  ;;  %v2692_v3 = vld [vmem:[#allocation8 + $0xd88] sm:$0xff]  ;;  %4165 = vtanh.f32 %v2182_v60 }
 0x2e4   : > { %3494 = vmatpush1.msra.mxu0 %v2645_v7  ;;  %3565 = vmatpush1.msra.mxu1 %v2709_v43  ;;  %v2691_v7 = vld [vmem:[#allocation8 + $0xd80] sm:$0xff]  ;;  %v2740_v39 = vld [vmem:[#allocation8 + $0xf08] sm:$0xff] }
 0x2e5   : > { %3495 = vmatprep.subr.mxu0 %v2644_v8  ;;  %3566 = vmatprep.subr.mxu1 %v2708_v50  ;;  %v2755_v43 = vld [vmem:[#allocation8 + $0xf80] sm:$0xff]  ;;  %v2690_v8 = vld [vmem:[#allocation8 + $0xd78] sm:$0xff] }
 0x2e6   : > { %3496 = vmatpush1.msra.mxu0 %v2643_v10  ;;  %3567 = vmatpush1.msra.mxu1 %v2707_v13  ;;  %v2754_v50 = vld [vmem:[#allocation8 + $0xf78] sm:$0xff]  ;;  %v2753_v10 = vld [vmem:[#allocation8 + $0xf70] sm:$0xff]  ;;  %v2688_v13 = vld [vmem:[#allocation8 + $0xd68] sm:$0xff] }
 0x2e7   : > { %3497 = vmatprep.subr.mxu0 %v2706_v20  ;;  %3568 = vmatprep.subr.mxu1 %v2770_v23  ;;  %v2751_v20 = vld [vmem:[#allocation8 + $0xf60] sm:$0xff]  ;;  %v2686_v23 = vld [vmem:[#allocation8 + $0xd58] sm:$0xff] }
 0x2e8   : > { %3498 = vmatpush2.msra.mxu0 %v2705_v26  ;;  %3569 = vmatpush2.msra.mxu1 %v2769_v38  ;;  %v2685_v26 = vld [vmem:[#allocation8 + $0xd50] sm:$0xff] }
 0x2e9   : > { %3499 = vmatprep.subr.mxu0 %v2704_v48  ;;  %3570 = vmatprep.subr.mxu1 %v2768_v27  ;;  %v2749_v38 = vld [vmem:[#allocation8 + $0xf50] sm:$0xff]  ;;  %v2684_v48 = vld [vmem:[#allocation8 + $0xd48] sm:$0xff] }
 0x2ea   : > { %3500 = vmatpush2.msra.mxu0 %v2703_v42  ;;  %3571 = vmatpush2.msra.mxu1 %v2767_v6  ;;  %v2748_v27 = vld [vmem:[#allocation8 + $0xf48] sm:$0xff]  ;;  %v2683_v42 = vld [vmem:[#allocation8 + $0xd40] sm:$0xff] }
 0x2eb   : > { %3501 = vmatprep.subr.mxu0 %v2702_v2  ;;  %3572 = vmatprep.subr.mxu1 %v2766_v33  ;;  %v2747_v6 = vld [vmem:[#allocation8 + $0xf40] sm:$0xff]  ;;  %v2681_v33 = vld [vmem:[#allocation8 + $0xd30] sm:$0xff] }
 0x2ec   : > { %3502 = vmatpush2.msra.mxu0 %v2701_v37  ;;  %3573 = vmatpush2.msra.mxu1 %v2765_v40  ;;  %v2680_v37 = vld [vmem:[#allocation8 + $0xd28] sm:$0xff] }
 0x2ed   : > { %3503 = vmatprep.subr.mxu0 %v2700_v45  ;;  %3574 = vmatprep.subr.mxu1 %v2764_v51  ;;  %v4160_v2 = vpop.eup %4159  ;;  %v2744_v40 = vld [vmem:[#allocation8 + $0xf28] sm:$0xff]  ;;  %v2679_v45 = vld [vmem:[#allocation8 + $0xd20] sm:$0xff] }
 0x2ee   : > { %3504 = vmatpush2.msra.mxu0 %v2699_v52  ;;  %3575 = vmatpush2.msra.mxu1 %v2763_v12  ;;  %v4162_v35 = vpop.eup %4161  ;;  %v2743_v51 = vld [vmem:[#allocation8 + $0xf20] sm:$0xff]  ;;  %v2678_v12 = vld [vmem:[#allocation8 + $0xd18] sm:$0xff]  ;;  %v2223_v41 = vadd.f32 1.0, %v4160_v2 }
 0x2ef   : > { %3505 = vmatprep.subr.mxu0 %v2698_v22  ;;  %3576 = vmatprep.subr.mxu1 %v2762_v24  ;;  %v4164_v52 = vpop.eup %4163  ;;  %v2677_v24 = vld [vmem:[#allocation8 + $0xd10] sm:$0xff]  ;;  %v2790_v2 = vld [vmem:[#allocation8 + $0x1098] sm:$0xff] }
 0x2f0   : > { %3506 = vmatpush2.msra.mxu0 %v2697_v4  ;;  %3577 = vmatpush2.msra.mxu1 %v2761_v62  ;;  %v4166_v22 = vpop.eup %4165  ;;  %v2225_v4 = vadd.f32 1.0, %v4162_v35  ;;  %v2676_v62 = vld [vmem:[#allocation8 + $0xd08] sm:$0xff]  ;;  %v2228_v56 = vadd.f32 1.0, %v4164_v52  ;;  %v2853_v35 = vld [vmem:[#allocation8 + $0x1290] sm:$0xff]  ;;  %v1138_v52 = vrot.slane %v4818_v49, %v4627_v58 }
 0x2f1   : > { %3507 = vmatprep.subr.mxu0 %v2696_v54  ;;  %3578 = vmatprep.subr.mxu1 %v2760_v31  ;;  %v2675_v54 = vld [vmem:[#allocation8 + $0xd00] sm:$0xff] }
 0x2f2   : > { %3508 = vmatpush2.msra.mxu0 %v2695_v46  ;;  %3579 = vmatpush2.msra.mxu1 %v2759_v55  ;;  %v2739_v31 = vld [vmem:[#allocation8 + $0xf00] sm:$0xff]  ;;  %v2055_v46 = vmul.f32 0.5, %v4823_v34  ;;  %v2057_v55 = vmul.f32 0.5, %v4828_v47  ;;  %v2865_v47 = vld [vmem:[#allocation8 + $0x12f0] sm:$0xff] }
 0x2f3   : > { %3509 = vmatprep.subr.mxu0 %v2694_v30  ;;  %3580 = vmatprep.subr.mxu1 %v2758_v57  ;;  %v2230_v30 = vadd.f32 1.0, %v4166_v22  ;;  %v2850_v22 = vld [vmem:[#allocation8 + $0x1278] sm:$0xff] }
 0x2f4   : > { %3510 = vmatpush2.msra.mxu0 %v2693_v1  ;;  %3581 = vmatpush2.msra.mxu1 %v2757_v19  ;;  %v2247_v57 = vmul.f32 %v2223_v41, %v2055_v46  ;;  %v2249_v60 = vmul.f32 %v2225_v4, %v2057_v55  ;;  %v2802_v1 = vld [vmem:[#allocation8 + $0x10f8] sm:$0xff]  ;;  %v2785_v41 = vld [vmem:[#allocation8 + $0x1070] sm:$0xff]  ;;  %v2847_v46 = vld [vmem:[#allocation8 + $0x1260] sm:$0xff]  ;;  %v4865_v55 = vadd.f32 %v4813_v36, %v1138_v52 }
 0x2f5   : > { %3511 = vmatprep.subr.mxu0 %v2692_v3  ;;  %3582 = vmatprep.subr.mxu1 %v2756_v5  ;;  %v2866_v19 = vld [vmem:[#allocation8 + $0x12f8] sm:$0xff]  ;;  %v2060_v3 = vmul.f32 0.5, %v4830_v44  ;;  %v2801_v5 = vld [vmem:[#allocation8 + $0x10f0] sm:$0xff]  ;;  %v2780_v36 = vld [vmem:[#allocation8 + $0x1048] sm:$0xff] }
 0x2f6   : > { %3512 = vmatpush2.msra.mxu0 %v2691_v7  ;;  %3583 = vmatpush2.msra.mxu1 %v2755_v43  ;;  %v2062_v7 = vmul.f32 0.5, %v4833_v29  ;;  %v2798_v44 = vld [vmem:[#allocation8 + $0x10d8] sm:$0xff]  ;;  %v2797_v29 = vld [vmem:[#allocation8 + $0x10d0] sm:$0xff]  ;;  %v2831_v52 = vld [vmem:[#allocation8 + $0x11e0] sm:$0xff] }
 0x2f7   : > { %3513 = vmatprep.subr.mxu0 %v2690_v8  ;;  %3584 = vmatprep.subr.mxu1 %v2754_v50  ;;  %v2252_v34 = vmul.f32 %v2228_v56, %v2060_v3  ;;  %v2800_v8 = vld [vmem:[#allocation8 + $0x10e8] sm:$0xff]  ;;  %v2849_v4 = vld [vmem:[#allocation8 + $0x1270] sm:$0xff]  ;;  %v1166_v56 = vrot.slane %v4818_v49, %v4708_v18  ;;  %v2779_v18 = vld [vmem:[#allocation8 + $0x1040] sm:$0xff] }
 0x2f8   : > { %3514 = vmatpush2.msra.mxu0 %v2689_v9  ;;  %3585 = vmatpush2.msra.mxu1 %v2753_v10  ;;  %v2254_v43 = vmul.f32 %v2230_v30, %v2062_v7  ;;  %v2864_v50 = vld [vmem:[#allocation8 + $0x12e8] sm:$0xff]  ;;  %v2799_v9 = vld [vmem:[#allocation8 + $0x10e0] sm:$0xff]  ;;  %v2782_v30 = vld [vmem:[#allocation8 + $0x1058] sm:$0xff]  ;;  %v2083_v7 = vmul.f32 0.044715, %v4865_v55 }
 0x2f9   : > { %3515 = vmatprep.subr.mxu0 %v2688_v13  ;;  %3586 = vmatprep.subr.mxu1 %v2752_v15  ;;  %v2863_v10 = vld [vmem:[#allocation8 + $0x12e0] sm:$0xff]  ;;  %v2862_v13 = vld [vmem:[#allocation8 + $0x12d8] sm:$0xff]  ;;  %v2861_v15 = vld [vmem:[#allocation8 + $0x12d0] sm:$0xff] }
 0x2fa   : > { %3516 = vmatpush2.msra.mxu0 %v2687_v16  ;;  %3587 = vmatpush2.msra.mxu1 %v2751_v20  ;;  %v2796_v16 = vld [vmem:[#allocation8 + $0x10c8] sm:$0xff] }
 0x2fb   : > { %3517 = vmatprep.subr.mxu0 %v2686_v23  ;;  %3588 = vmatprep.subr.mxu1 %v2750_v25  ;;  %v2860_v20 = vld [vmem:[#allocation8 + $0x12c8] sm:$0xff]  ;;  %v2795_v23 = vld [vmem:[#allocation8 + $0x10c0] sm:$0xff] }
 0x2fc   : > { %3518 = vmatpush2.msra.mxu0 %v2685_v26  ;;  %3589 = vmatpush2.msra.mxu1 %v2749_v38  ;;  %v2859_v25 = vld [vmem:[#allocation8 + $0x12c0] sm:$0xff]  ;;  %v2794_v26 = vld [vmem:[#allocation8 + $0x10b8] sm:$0xff]  ;;  %v2844_v3 = vld [vmem:[#allocation8 + $0x1248] sm:$0xff] }
 0x2fd   : > { %3519 = vmatprep.subr.mxu0 %v2684_v48  ;;  %3590 = vmatprep.subr.mxu1 %v2748_v27  ;;  %v2858_v38 = vld [vmem:[#allocation8 + $0x12b8] sm:$0xff]  ;;  %v2793_v48 = vld [vmem:[#allocation8 + $0x10b0] sm:$0xff] }
 0x2fe   : > { %3520 = vmatpush2.msra.mxu0 %v2683_v42  ;;  %3591 = vmatpush2.msra.mxu1 %v2747_v6  ;;  %v2857_v27 = vld [vmem:[#allocation8 + $0x12b0] sm:$0xff]  ;;  %v2792_v42 = vld [vmem:[#allocation8 + $0x10a8] sm:$0xff] }
 0x2ff   : > { %3521 = vmatprep.subr.mxu0 %v2682_v61  ;;  %3592 = vmatprep.subr.mxu1 %v2746_v32  ;;  %v2856_v6 = vld [vmem:[#allocation8 + $0x12a8] sm:$0xff]  ;;  %v2791_v61 = vld [vmem:[#allocation8 + $0x10a0] sm:$0xff] }
 0x300   : > { %3522 = vmatpush2.msra.mxu0 %v2681_v33  ;;  %3593 = vmatpush2.msra.mxu1 %v2745_v11  ;;  %v2855_v32 = vld [vmem:[#allocation8 + $0x12a0] sm:$0xff]  ;;  %v2854_v33 = vld [vmem:[#allocation8 + $0x1298] sm:$0xff]  ;;  %v2789_v11 = vld [vmem:[#allocation8 + $0x1090] sm:$0xff] }
 0x301   : > { %3523 = vmatprep.subr.mxu0 %v2680_v37  ;;  %3594 = vmatprep.subr.mxu1 %v2744_v40  ;;  %v2788_v37 = vld [vmem:[#allocation8 + $0x1088] sm:$0xff] }
 0x302   : > { %3524 = vmatpush2.msra.mxu0 %v2679_v45  ;;  %3595 = vmatpush2.msra.mxu1 %v2743_v51  ;;  %v2852_v40 = vld [vmem:[#allocation8 + $0x1288] sm:$0xff]  ;;  %v2787_v45 = vld [vmem:[#allocation8 + $0x1080] sm:$0xff] }
 0x303   : > { %3525 = vmatprep.subr.mxu0 %v2678_v12  ;;  %3596 = vmatprep.subr.mxu1 %v2742_v0  ;;  %v2851_v51 = vld [vmem:[#allocation8 + $0x1280] sm:$0xff]  ;;  %v4856_v12 = vpop.f32.mrf.mxu0  ;;  %v2786_v0 = vld [vmem:[#allocation8 + $0x1078] sm:$0xff] }
 0x304   : > { %3526 = vmatpush2.msra.mxu0 %v2677_v24  ;;  %3597 = vmatpush2.msra.mxu1 %v2741_v53  ;;  %v1146_v24 = vrot.slane %v4818_v49, %v4630_v59  ;;  %v4860_v53 = vpop.f32.mrf.mxu1 }
 0x305   : > { %3527 = vmatprep.subr.mxu0 %v2676_v62  ;;  %3598 = vmatprep.subr.mxu1 %v2740_v39  ;;  %v2784_v62 = vld [vmem:[#allocation8 + $0x1068] sm:$0xff]  ;;  %v1969_v59 = vpop.f32.mrf.mxu0 }
 0x306   : > { %3528 = vmatpush2.msra.mxu0 %v2675_v54  ;;  %3599 = vmatpush2.msra.mxu1 %v2739_v31  ;;  %v2848_v39 = vld [vmem:[#allocation8 + $0x1268] sm:$0xff]  ;;  %v1158_v54 = vrot.slane %v4818_v49, %v4705_v14  ;;  %v2783_v31 = vld [vmem:[#allocation8 + $0x1060] sm:$0xff]  ;;  %v2781_v14 = vld [vmem:[#allocation8 + $0x1050] sm:$0xff] }
 0x307   : > { %3530 = vmatmul.mubr.f32.vlgmr.msra.gmra.mxu0 %v2247_v57  ;;  %3601 = vmatmul.mubr.f32.vlgmr.msra.gmra.mxu1 %v2249_v60  ;;  %v2846_v57 = vld [vmem:[#allocation8 + $0x1258] sm:$0xff]  ;;  %v4870_v60 = vadd.f32 %v4816_v28, %v1146_v24  ;;  %v2843_v49 = vld [vmem:[#allocation8 + $0x1240] sm:$0xff] }
 0x308   : > { %3607 = vmatprep.subr.mxu0 %v2802_v1  ;;  %3678 = vmatprep.subr.mxu1 %v2866_v19  ;;  %v2040_v1 = vpop.f32.mrf.mxu1  ;;  %v2845_v19 = vld [vmem:[#allocation8 + $0x1250] sm:$0xff]  ;;  %v2778_v28 = vld [vmem:[#allocation8 + $0x1038] sm:$0xff] }
 0x309   : > { %3608 = vmatpush1.msra.mxu0 %v2801_v5  ;;  %3671 = vmatprep.mubr.f32.mxu0 %v2252_v34  ;;  %v4872_v5 = vadd.f32 %v1969_v59, %v1158_v54  ;;  %v4875_v34 = vadd.f32 %v2040_v1, %v1166_v56  ;;  %v2829_v54 = vld [vmem:[#allocation8 + $0x11d0] sm:$0xff]  ;;  %v2892_v59 = vld [vmem:[#allocation8 + $0x13c8] sm:$0xff]  ;;  %v2827_v56 = vld [vmem:[#allocation8 + $0x11c0] sm:$0xff] }
 0x30a   : > { %3679 = vmatpush1.msra.mxu1 %v2865_v47  ;;  %3742 = vmatprep.mubr.f32.mxu1 %v2254_v43  ;;  %v2842_v47 = vld [vmem:[#allocation8 + $0x1238] sm:$0xff]  ;;  %v2085_v43 = vmul.f32 0.044715, %v4870_v60 }
 0x30b   : > { %3609 = vmatprep.subr.mxu0 %v2800_v8  ;;  %3680 = vmatprep.subr.mxu1 %v2864_v50  ;;  %v2777_v8 = vld [vmem:[#allocation8 + $0x1030] sm:$0xff]  ;;  %v2826_v1 = vld [vmem:[#allocation8 + $0x11b8] sm:$0xff] }
 0x30c   : > { %3610 = vmatpush1.msra.mxu0 %v2799_v9  ;;  %3681 = vmatpush1.msra.mxu1 %v2863_v10  ;;  %v2841_v50 = vld [vmem:[#allocation8 + $0x1230] sm:$0xff]  ;;  %v2776_v9 = vld [vmem:[#allocation8 + $0x1028] sm:$0xff] }
 0x30d   : > { %3611 = vmatprep.subr.mxu0 %v2798_v44  ;;  %3682 = vmatprep.subr.mxu1 %v2862_v13  ;;  %v2840_v10 = vld [vmem:[#allocation8 + $0x1228] sm:$0xff]  ;;  %v2088_v44 = vmul.f32 0.044715, %v4872_v5  ;;  %v2775_v13 = vld [vmem:[#allocation8 + $0x1020] sm:$0xff] }
 0x30e   : > { %3612 = vmatpush1.msra.mxu0 %v2797_v29  ;;  %3683 = vmatpush1.msra.mxu1 %v2861_v15  ;;  %v2839_v29 = vld [vmem:[#allocation8 + $0x1220] sm:$0xff]  ;;  %v2107_v15 = vmul.f32 %v2083_v7, %v4865_v55  ;;  %v2824_v7 = vld [vmem:[#allocation8 + $0x11a8] sm:$0xff] }
 0x30f   : > { %3613 = vmatprep.subr.mxu0 %v2796_v16  ;;  %3684 = vmatprep.subr.mxu1 %v2860_v20  ;;  %v2090_v16 = vmul.f32 0.044715, %v4875_v34  ;;  %v2774_v20 = vld [vmem:[#allocation8 + $0x1018] sm:$0xff] }
 0x310   : > { %3614 = vmatpush1.msra.mxu0 %v2795_v23  ;;  %3685 = vmatpush1.msra.mxu1 %v2859_v25  ;;  %v2838_v23 = vld [vmem:[#allocation8 + $0x1218] sm:$0xff]  ;;  %v2109_v25 = vmul.f32 %v2085_v43, %v4870_v60  ;;  %v2887_v43 = vld [vmem:[#allocation8 + $0x13a0] sm:$0xff] }
 0x311   : > { %3615 = vmatprep.subr.mxu0 %v2794_v26  ;;  %3686 = vmatprep.subr.mxu1 %v2858_v38  ;;  %v2773_v26 = vld [vmem:[#allocation8 + $0x1010] sm:$0xff] }
 0x312   : > { %3616 = vmatpush1.msra.mxu0 %v2793_v48  ;;  %3687 = vmatpush1.msra.mxu1 %v2857_v27  ;;  %v2837_v38 = vld [vmem:[#allocation8 + $0x1210] sm:$0xff]  ;;  %v2772_v48 = vld [vmem:[#allocation8 + $0x1008] sm:$0xff] }
 0x313   : > { %3617 = vmatprep.subr.mxu0 %v2792_v42  ;;  %3688 = vmatprep.subr.mxu1 %v2856_v6  ;;  %v2836_v27 = vld [vmem:[#allocation8 + $0x1208] sm:$0xff]  ;;  %v2112_v42 = vmul.f32 %v2088_v44, %v4872_v5  ;;  %v2771_v6 = vld [vmem:[#allocation8 + $0x1000] sm:$0xff]  ;;  %v2821_v44 = vld [vmem:[#allocation8 + $0x1190] sm:$0xff] }
 0x314   : > { %3618 = vmatpush1.msra.mxu0 %v2791_v61  ;;  %3689 = vmatpush1.msra.mxu1 %v2855_v32  ;;  %v2835_v61 = vld [vmem:[#allocation8 + $0x1200] sm:$0xff]  ;;  %v2131_v32 = vmul.f32 %v2107_v15, %v4865_v55  ;;  %v2884_v15 = vld [vmem:[#allocation8 + $0x1388] sm:$0xff] }
 0x315   : > { %3619 = vmatprep.subr.mxu0 %v2790_v2  ;;  %3690 = vmatprep.subr.mxu1 %v2854_v33  ;;  %v2114_v2 = vmul.f32 %v2090_v16, %v4875_v34  ;;  %v2834_v33 = vld [vmem:[#allocation8 + $0x11f8] sm:$0xff]  ;;  %v2819_v16 = vld [vmem:[#allocation8 + $0x1180] sm:$0xff] }
 0x316   : > { %3620 = vmatpush1.msra.mxu0 %v2789_v11  ;;  %3691 = vmatpush1.msra.mxu1 %v2853_v35  ;;  %v2898_v11 = vld [vmem:[#allocation8 + $0x13f8] sm:$0xff]  ;;  %v2133_v35 = vmul.f32 %v2109_v25, %v4870_v60  ;;  %v2155_v24 = vadd.f32 %v2131_v32, %v4865_v55 }
 0x317   : > { %3621 = vmatprep.subr.mxu0 %v2788_v37  ;;  %3692 = vmatprep.subr.mxu1 %v2852_v40  ;;  %v2833_v37 = vld [vmem:[#allocation8 + $0x11f0] sm:$0xff]  ;;  %v2882_v25 = vld [vmem:[#allocation8 + $0x1378] sm:$0xff] }
 0x318   : > { %3622 = vmatpush1.msra.mxu0 %v2787_v45  ;;  %3693 = vmatpush1.msra.mxu1 %v2851_v51  ;;  %v2897_v40 = vld [vmem:[#allocation8 + $0x13f0] sm:$0xff]  ;;  %v2832_v45 = vld [vmem:[#allocation8 + $0x11e8] sm:$0xff]  ;;  %v2878_v32 = vld [vmem:[#allocation8 + $0x1358] sm:$0xff] }
 0x319   : > { %3623 = vmatprep.subr.mxu0 %v2786_v0  ;;  %3694 = vmatprep.subr.mxu1 %v2850_v22  ;;  %v2896_v51 = vld [vmem:[#allocation8 + $0x13e8] sm:$0xff]  ;;  %v2895_v0 = vld [vmem:[#allocation8 + $0x13e0] sm:$0xff]  ;;  %v2136_v22 = vmul.f32 %v2112_v42, %v4872_v5 }
 0x31a   : > { %3624 = vmatpush1.msra.mxu0 %v2785_v41  ;;  %3695 = vmatpush1.msra.mxu1 %v2849_v4  ;;  %v2830_v41 = vld [vmem:[#allocation8 + $0x11d8] sm:$0xff]  ;;  %v2815_v42 = vld [vmem:[#allocation8 + $0x1160] sm:$0xff] }
 0x31b   : > { %3625 = vmatprep.subr.mxu0 %v2784_v62  ;;  %3696 = vmatprep.subr.mxu1 %v2848_v39  ;;  %v2894_v4 = vld [vmem:[#allocation8 + $0x13d8] sm:$0xff]  ;;  %v2138_v62 = vmul.f32 %v2114_v2, %v4875_v34  ;;  %v2157_v39 = vadd.f32 %v2133_v35, %v4870_v60  ;;  %v2813_v2 = vld [vmem:[#allocation8 + $0x1150] sm:$0xff]  ;;  %v2876_v35 = vld [vmem:[#allocation8 + $0x1348] sm:$0xff] }
 0x31c   : > { %3626 = vmatpush1.msra.mxu0 %v2783_v31  ;;  %3697 = vmatpush1.msra.mxu1 %v2847_v46  ;;  %v2893_v31 = vld [vmem:[#allocation8 + $0x13d0] sm:$0xff]  ;;  %v2828_v46 = vld [vmem:[#allocation8 + $0x11c8] sm:$0xff] }
 0x31d   : > { %3627 = vmatprep.subr.mxu0 %v2782_v30  ;;  %3698 = vmatprep.subr.mxu1 %v2846_v57  ;;  %v2891_v30 = vld [vmem:[#allocation8 + $0x13c0] sm:$0xff]  ;;  %v2160_v57 = vadd.f32 %v2136_v22, %v4872_v5  ;;  %v2873_v22 = vld [vmem:[#allocation8 + $0x1330] sm:$0xff] }
 0x31e   : > { %3628 = vmatpush1.msra.mxu0 %v2781_v14  ;;  %3699 = vmatpush1.msra.mxu1 %v2845_v19  ;;  %v2890_v14 = vld [vmem:[#allocation8 + $0x13b8] sm:$0xff]  ;;  %v2179_v19 = vmul.f32 0.7978846, %v2155_v24 }
 0x31f   : > { %3629 = vmatprep.subr.mxu0 %v2780_v36  ;;  %3700 = vmatprep.subr.mxu1 %v2844_v3  ;;  %v2162_v36 = vadd.f32 %v2138_v62, %v4875_v34  ;;  %v2825_v3 = vld [vmem:[#allocation8 + $0x11b0] sm:$0xff]  ;;  %v2807_v62 = vld [vmem:[#allocation8 + $0x1120] sm:$0xff] }
 0x320   : > { %3630 = vmatpush1.msra.mxu0 %v2779_v18  ;;  %3701 = vmatpush1.msra.mxu1 %v2843_v49  ;;  %v2889_v18 = vld [vmem:[#allocation8 + $0x13b0] sm:$0xff]  ;;  %v2181_v49 = vmul.f32 0.7978846, %v2157_v39  ;;  %4167 = vtanh.f32 %v2179_v19  ;;  %v2871_v39 = vld [vmem:[#allocation8 + $0x1320] sm:$0xff]  ;;  %v2868_v19 = vld [vmem:[#allocation8 + $0x1308] sm:$0xff] }
 0x321   : > { %3631 = vmatprep.subr.mxu0 %v2778_v28  ;;  %3702 = vmatprep.subr.mxu1 %v2842_v47  ;;  %v2888_v28 = vld [vmem:[#allocation8 + $0x13a8] sm:$0xff]  ;;  %v2823_v47 = vld [vmem:[#allocation8 + $0x11a0] sm:$0xff] }
 0x322   : > { %3632 = vmatpush1.msra.mxu0 %v2777_v8  ;;  %3703 = vmatpush1.msra.mxu1 %v2841_v50  ;;  %v2184_v8 = vmul.f32 0.7978846, %v2160_v57  ;;  %v2822_v50 = vld [vmem:[#allocation8 + $0x1198] sm:$0xff]  ;;  %4169 = vtanh.f32 %v2181_v49  ;;  %v2061_v49 = vmul.f32 0.5, %v4870_v60  ;;  %v2993_v60 = vld [vmem:[#allocation8 + $0x16f0] sm:$0xff] }
 0x323   : > { %3633 = vmatprep.subr.mxu0 %v2776_v9  ;;  %3704 = vmatprep.subr.mxu1 %v2840_v10  ;;  %v2886_v9 = vld [vmem:[#allocation8 + $0x1398] sm:$0xff]  ;;  %v2186_v10 = vmul.f32 0.7978846, %v2162_v36  ;;  %v2803_v36 = vld [vmem:[#allocation8 + $0x1100] sm:$0xff] }
 0x324   : > { %3634 = vmatpush1.msra.mxu0 %v2775_v13  ;;  %3705 = vmatpush1.msra.mxu1 %v2839_v29  ;;  %v2885_v13 = vld [vmem:[#allocation8 + $0x1390] sm:$0xff]  ;;  %v2820_v29 = vld [vmem:[#allocation8 + $0x1188] sm:$0xff]  ;;  %4171 = vtanh.f32 %v2184_v8  ;;  %v2930_v8 = vld [vmem:[#allocation8 + $0x14f8] sm:$0xff] }
 0x325   : > { %3635 = vmatprep.subr.mxu0 %v2774_v20  ;;  %3706 = vmatprep.subr.mxu1 %v2838_v23  ;;  %v2883_v20 = vld [vmem:[#allocation8 + $0x1380] sm:$0xff]  ;;  %v2818_v23 = vld [vmem:[#allocation8 + $0x1178] sm:$0xff]  ;;  %4173 = vtanh.f32 %v2186_v10  ;;  %v2929_v10 = vld [vmem:[#allocation8 + $0x14f0] sm:$0xff] }
 0x326   : > { %3636 = vmatpush1.msra.mxu0 %v2773_v26  ;;  %3707 = vmatpush1.msra.mxu1 %v2837_v38  ;;  %v2817_v26 = vld [vmem:[#allocation8 + $0x1170] sm:$0xff] }
 0x327   : > { %3637 = vmatprep.subr.mxu0 %v2772_v48  ;;  %3708 = vmatprep.subr.mxu1 %v2836_v27  ;;  %v2881_v38 = vld [vmem:[#allocation8 + $0x1370] sm:$0xff]  ;;  %v2816_v48 = vld [vmem:[#allocation8 + $0x1168] sm:$0xff] }
 0x328   : > { %3638 = vmatpush1.msra.mxu0 %v2771_v6  ;;  %3709 = vmatpush1.msra.mxu1 %v2835_v61  ;;  %v2880_v27 = vld [vmem:[#allocation8 + $0x1368] sm:$0xff]  ;;  %v2879_v6 = vld [vmem:[#allocation8 + $0x1360] sm:$0xff]  ;;  %v2814_v61 = vld [vmem:[#allocation8 + $0x1158] sm:$0xff] }
 0x329   : > { %3639 = vmatprep.subr.mxu0 %v2834_v33  ;;  %3710 = vmatprep.subr.mxu1 %v2898_v11  ;;  %v2877_v33 = vld [vmem:[#allocation8 + $0x1350] sm:$0xff]  ;;  %v2812_v11 = vld [vmem:[#allocation8 + $0x1148] sm:$0xff] }
 0x32a   : > { %3640 = vmatpush2.msra.mxu0 %v2833_v37  ;;  %3711 = vmatpush2.msra.mxu1 %v2897_v40  ;;  %v2811_v37 = vld [vmem:[#allocation8 + $0x1140] sm:$0xff] }
 0x32b   : > { %3641 = vmatprep.subr.mxu0 %v2832_v45  ;;  %3712 = vmatprep.subr.mxu1 %v2896_v51  ;;  %v2875_v40 = vld [vmem:[#allocation8 + $0x1340] sm:$0xff]  ;;  %v2810_v45 = vld [vmem:[#allocation8 + $0x1138] sm:$0xff] }
 0x32c   : > { %3642 = vmatpush2.msra.mxu0 %v2831_v52  ;;  %3713 = vmatpush2.msra.mxu1 %v2895_v0  ;;  %v2874_v51 = vld [vmem:[#allocation8 + $0x1338] sm:$0xff]  ;;  %v2809_v0 = vld [vmem:[#allocation8 + $0x1130] sm:$0xff] }
 0x32d   : > { %3643 = vmatprep.subr.mxu0 %v2830_v41  ;;  %3714 = vmatprep.subr.mxu1 %v2894_v4  ;;  %v4168_v52 = vpop.eup %4167  ;;  %v2808_v41 = vld [vmem:[#allocation8 + $0x1128] sm:$0xff] }
 0x32e   : > { %3644 = vmatpush2.msra.mxu0 %v2829_v54  ;;  %3715 = vmatpush2.msra.mxu1 %v2893_v31  ;;  %v2872_v4 = vld [vmem:[#allocation8 + $0x1328] sm:$0xff]  ;;  %v2806_v31 = vld [vmem:[#allocation8 + $0x1118] sm:$0xff]  ;;  %v2227_v57 = vadd.f32 1.0, %v4168_v52 }
 0x32f   : > { %3645 = vmatprep.subr.mxu0 %v2828_v46  ;;  %3716 = vmatprep.subr.mxu1 %v2892_v59  ;;  %v4170_v24 = vpop.eup %4169  ;;  %v2870_v46 = vld [vmem:[#allocation8 + $0x1318] sm:$0xff]  ;;  %v2916_v52 = vld [vmem:[#allocation8 + $0x1488] sm:$0xff] }
 0x330   : > { %3646 = vmatpush2.msra.mxu0 %v2827_v56  ;;  %3717 = vmatpush2.msra.mxu1 %v2891_v30  ;;  %v2805_v56 = vld [vmem:[#allocation8 + $0x1110] sm:$0xff] }
 0x331   : > { %3647 = vmatprep.subr.mxu0 %v2826_v1  ;;  %3718 = vmatprep.subr.mxu1 %v2890_v14  ;;  %v4172_v54 = vpop.eup %4171  ;;  %v2869_v30 = vld [vmem:[#allocation8 + $0x1310] sm:$0xff]  ;;  %v2229_v1 = vadd.f32 1.0, %v4170_v24  ;;  %v2804_v14 = vld [vmem:[#allocation8 + $0x1108] sm:$0xff]  ;;  %v2979_v24 = vld [vmem:[#allocation8 + $0x1680] sm:$0xff] }
 0x332   : > { %3648 = vmatpush2.msra.mxu0 %v2825_v3  ;;  %3719 = vmatpush2.msra.mxu1 %v2889_v18  ;;  %v4174_v59 = vpop.eup %4173  ;;  %v2867_v3 = vld [vmem:[#allocation8 + $0x1300] sm:$0xff]  ;;  %v2059_v18 = vmul.f32 0.5, %v4865_v55 }
 0x333   : > { %3649 = vmatprep.subr.mxu0 %v2824_v7  ;;  %3720 = vmatprep.subr.mxu1 %v2888_v28  ;;  %v2232_v7 = vadd.f32 1.0, %v4172_v54  ;;  %v2234_v28 = vadd.f32 1.0, %v4174_v59  ;;  %v2912_v59 = vld [vmem:[#allocation8 + $0x1468] sm:$0xff] }
 0x334   : > { %3650 = vmatpush2.msra.mxu0 %v2823_v47  ;;  %3721 = vmatpush2.msra.mxu1 %v2887_v43  ;;  %v2251_v47 = vmul.f32 %v2227_v57, %v2059_v18  ;;  %v2253_v43 = vmul.f32 %v2229_v1, %v2061_v49  ;;  %v2975_v57 = vld [vmem:[#allocation8 + $0x1660] sm:$0xff]  ;;  %v2910_v1 = vld [vmem:[#allocation8 + $0x1458] sm:$0xff]  ;;  %v2972_v18 = vld [vmem:[#allocation8 + $0x1648] sm:$0xff] }
 0x335   : > { %3651 = vmatprep.subr.mxu0 %v2822_v50  ;;  %3722 = vmatprep.subr.mxu1 %v2886_v9  ;;  %v2994_v50 = vld [vmem:[#allocation8 + $0x16f8] sm:$0xff]  ;;  %v2064_v9 = vmul.f32 0.5, %v4872_v5  ;;  %v2907_v49 = vld [vmem:[#allocation8 + $0x1440] sm:$0xff] }
 0x336   : > { %3652 = vmatpush2.msra.mxu0 %v2821_v44  ;;  %3723 = vmatpush2.msra.mxu1 %v2885_v13  ;;  %v2066_v44 = vmul.f32 0.5, %v4875_v34  ;;  %v2926_v5 = vld [vmem:[#allocation8 + $0x14d8] sm:$0xff]  ;;  %v2925_v34 = vld [vmem:[#allocation8 + $0x14d0] sm:$0xff] }
 0x337   : > { %3653 = vmatprep.subr.mxu0 %v2820_v29  ;;  %3724 = vmatprep.subr.mxu1 %v2884_v15  ;;  %v2256_v55 = vmul.f32 %v2232_v7, %v2064_v9  ;;  %v2928_v29 = vld [vmem:[#allocation8 + $0x14e8] sm:$0xff] }
 0x338   : > { %3654 = vmatpush2.msra.mxu0 %v2819_v16  ;;  %3725 = vmatpush2.msra.mxu1 %v2883_v20  ;;  %v2258_v13 = vmul.f32 %v2234_v28, %v2066_v44  ;;  %v2992_v15 = vld [vmem:[#allocation8 + $0x16e8] sm:$0xff]  ;;  %v2927_v16 = vld [vmem:[#allocation8 + $0x14e0] sm:$0xff]  ;;  %v2906_v28 = vld [vmem:[#allocation8 + $0x1438] sm:$0xff] }
 0x339   : > { %3655 = vmatprep.subr.mxu0 %v2818_v23  ;;  %3726 = vmatprep.subr.mxu1 %v2882_v25  ;;  %v2991_v20 = vld [vmem:[#allocation8 + $0x16e0] sm:$0xff]  ;;  %v2990_v23 = vld [vmem:[#allocation8 + $0x16d8] sm:$0xff]  ;;  %v2989_v25 = vld [vmem:[#allocation8 + $0x16d0] sm:$0xff] }
 0x33a   : > { %3656 = vmatpush2.msra.mxu0 %v2817_v26  ;;  %3727 = vmatpush2.msra.mxu1 %v2881_v38  ;;  %v2924_v26 = vld [vmem:[#allocation8 + $0x14c8] sm:$0xff]  ;;  %v2967_v44 = vld [vmem:[#allocation8 + $0x1620] sm:$0xff] }
 0x33b   : > { %3657 = vmatprep.subr.mxu0 %v2816_v48  ;;  %3728 = vmatprep.subr.mxu1 %v2880_v27  ;;  %v2988_v38 = vld [vmem:[#allocation8 + $0x16c8] sm:$0xff]  ;;  %v2923_v48 = vld [vmem:[#allocation8 + $0x14c0] sm:$0xff] }
 0x33c   : > { %3658 = vmatpush2.msra.mxu0 %v2815_v42  ;;  %3729 = vmatpush2.msra.mxu1 %v2879_v6  ;;  %v2987_v27 = vld [vmem:[#allocation8 + $0x16c0] sm:$0xff]  ;;  %v2922_v42 = vld [vmem:[#allocation8 + $0x14b8] sm:$0xff]  ;;  %v2968_v9 = vld [vmem:[#allocation8 + $0x1628] sm:$0xff] }
 0x33d   : > { %3659 = vmatprep.subr.mxu0 %v2814_v61  ;;  %3730 = vmatprep.subr.mxu1 %v2878_v32  ;;  %v2986_v6 = vld [vmem:[#allocation8 + $0x16b8] sm:$0xff]  ;;  %v2921_v61 = vld [vmem:[#allocation8 + $0x14b0] sm:$0xff] }
 0x33e   : > { %3660 = vmatpush2.msra.mxu0 %v2813_v2  ;;  %3731 = vmatpush2.msra.mxu1 %v2877_v33  ;;  %v2985_v32 = vld [vmem:[#allocation8 + $0x16b0] sm:$0xff]  ;;  %v2920_v2 = vld [vmem:[#allocation8 + $0x14a8] sm:$0xff] }
 0x33f   : > { %3661 = vmatprep.subr.mxu0 %v2812_v11  ;;  %3732 = vmatprep.subr.mxu1 %v2876_v35  ;;  %v2984_v33 = vld [vmem:[#allocation8 + $0x16a8] sm:$0xff]  ;;  %v2919_v11 = vld [vmem:[#allocation8 + $0x14a0] sm:$0xff] }
 0x340   : > { %3662 = vmatpush2.msra.mxu0 %v2811_v37  ;;  %3733 = vmatpush2.msra.mxu1 %v2875_v40  ;;  %v2983_v35 = vld [vmem:[#allocation8 + $0x16a0] sm:$0xff]  ;;  %v2918_v37 = vld [vmem:[#allocation8 + $0x1498] sm:$0xff] }
 0x341   : > { %3663 = vmatprep.subr.mxu0 %v2810_v45  ;;  %3734 = vmatprep.subr.mxu1 %v2874_v51  ;;  %v2982_v40 = vld [vmem:[#allocation8 + $0x1698] sm:$0xff]  ;;  %v2917_v45 = vld [vmem:[#allocation8 + $0x1490] sm:$0xff] }
 0x342   : > { %3664 = vmatpush2.msra.mxu0 %v2809_v0  ;;  %3735 = vmatpush2.msra.mxu1 %v2873_v22  ;;  %v2981_v51 = vld [vmem:[#allocation8 + $0x1690] sm:$0xff]  ;;  %v2980_v0 = vld [vmem:[#allocation8 + $0x1688] sm:$0xff]  ;;  %v2915_v22 = vld [vmem:[#allocation8 + $0x1480] sm:$0xff] }
 0x343   : > { %3665 = vmatprep.subr.mxu0 %v2808_v41  ;;  %3736 = vmatprep.subr.mxu1 %v2872_v4  ;;  %v4185_v41 = vld [vmem:[#allocation7 + $0x10] sm:$0xff] }
 0x344   : > { %3666 = vmatpush2.msra.mxu0 %v2807_v62  ;;  %3737 = vmatpush2.msra.mxu1 %v2871_v39  ;;  %v1154_v4 = vrot.slane %v4185_v41, %v4647_v63  ;;  %v2914_v62 = vld [vmem:[#allocation8 + $0x1478] sm:$0xff]  ;;  %v1162_v54 = vrot.slane %v4185_v41, %v4650_v17 }
 0x345   : > { %3667 = vmatprep.subr.mxu0 %v2806_v31  ;;  %3738 = vmatprep.subr.mxu1 %v2870_v46  ;;  %v2978_v39 = vld [vmem:[#allocation8 + $0x1678] sm:$0xff]  ;;  %v2913_v31 = vld [vmem:[#allocation8 + $0x1470] sm:$0xff] }
 0x346   : > { %3668 = vmatpush2.msra.mxu0 %v2805_v56  ;;  %3739 = vmatpush2.msra.mxu1 %v2869_v30  ;;  %v2977_v46 = vld [vmem:[#allocation8 + $0x1670] sm:$0xff]  ;;  %v2976_v56 = vld [vmem:[#allocation8 + $0x1668] sm:$0xff]  ;;  %v2911_v30 = vld [vmem:[#allocation8 + $0x1460] sm:$0xff]  ;;  %v4899_v63 = vadd.f32 %v4856_v12, %v1154_v4  ;;  %v4902_v17 = vadd.f32 %v4860_v53, %v1162_v54 }
 0x347   : > { %3669 = vmatprep.subr.mxu0 %v2804_v14  ;;  %3740 = vmatprep.subr.mxu1 %v2868_v19  ;;  %v2974_v14 = vld [vmem:[#allocation8 + $0x1658] sm:$0xff]  ;;  %v2909_v19 = vld [vmem:[#allocation8 + $0x1450] sm:$0xff]  ;;  %v2971_v12 = vld [vmem:[#allocation8 + $0x1640] sm:$0xff] }
 0x348   : > { %3670 = vmatpush2.msra.mxu0 %v2803_v36  ;;  %3741 = vmatpush2.msra.mxu1 %v2867_v3  ;;  %v2973_v36 = vld [vmem:[#allocation8 + $0x1650] sm:$0xff]  ;;  %v2908_v3 = vld [vmem:[#allocation8 + $0x1448] sm:$0xff]  ;;  %v2087_v7 = vmul.f32 0.044715, %v4899_v63  ;;  %v2089_v53 = vmul.f32 0.044715, %v4902_v17 }
 0x349   : > { %3672 = vmatmul.mubr.f32.vlgmr.msra.gmra.mxu0 %v2251_v47  ;;  %3743 = vmatmul.mubr.f32.vlgmr.msra.gmra.mxu1 %v2253_v43  ;;  %v2970_v47 = vld [vmem:[#allocation8 + $0x1638] sm:$0xff]  ;;  %v2905_v43 = vld [vmem:[#allocation8 + $0x1430] sm:$0xff] }
 0x34a   : > { %3749 = vmatprep.subr.mxu0 %v2930_v8  ;;  %3820 = vmatprep.subr.mxu1 %v2994_v50  ;;  %v2969_v8 = vld [vmem:[#allocation8 + $0x1630] sm:$0xff]  ;;  %v2904_v50 = vld [vmem:[#allocation8 + $0x1428] sm:$0xff]  ;;  %v3018_v41 = vld [vmem:[#allocation8 + $0x17b8] sm:$0xff] }
 0x34b   : > { %3750 = vmatpush1.msra.mxu0 %v2929_v10  ;;  %3813 = vmatprep.mubr.f32.mxu0 %v2256_v55  ;;  %v2903_v10 = vld [vmem:[#allocation8 + $0x1420] sm:$0xff]  ;;  %v2111_v55 = vmul.f32 %v2087_v7, %v4899_v63  ;;  %v2945_v7 = vld [vmem:[#allocation8 + $0x1570] sm:$0xff] }
 0x34c   : > { %3821 = vmatpush1.msra.mxu1 %v2993_v60  ;;  %3884 = vmatprep.mubr.f32.mxu1 %v2258_v13  ;;  %v2902_v60 = vld [vmem:[#allocation8 + $0x1418] sm:$0xff] }
 0x34d   : > { %3751 = vmatprep.subr.mxu0 %v2928_v29  ;;  %3822 = vmatprep.subr.mxu1 %v2992_v15  ;;  %v2966_v13 = vld [vmem:[#allocation8 + $0x1618] sm:$0xff]  ;;  %v2113_v29 = vmul.f32 %v2089_v53, %v4902_v17  ;;  %v2901_v15 = vld [vmem:[#allocation8 + $0x1410] sm:$0xff]  ;;  %v3008_v53 = vld [vmem:[#allocation8 + $0x1768] sm:$0xff] }
 0x34e   : > { %3752 = vmatpush1.msra.mxu0 %v2927_v16  ;;  %3823 = vmatpush1.msra.mxu1 %v2991_v20  ;;  %v2965_v16 = vld [vmem:[#allocation8 + $0x1610] sm:$0xff]  ;;  %v2900_v20 = vld [vmem:[#allocation8 + $0x1408] sm:$0xff] }
 0x34f   : > { %3753 = vmatprep.subr.mxu0 %v2926_v5  ;;  %3824 = vmatprep.subr.mxu1 %v2990_v23  ;;  %v2964_v5 = vld [vmem:[#allocation8 + $0x1608] sm:$0xff]  ;;  %v2899_v23 = vld [vmem:[#allocation8 + $0x1400] sm:$0xff] }
 0x350   : > { %3754 = vmatpush1.msra.mxu0 %v2925_v34  ;;  %3825 = vmatpush1.msra.mxu1 %v2989_v25  ;;  %v2963_v34 = vld [vmem:[#allocation8 + $0x1600] sm:$0xff]  ;;  %v2135_v25 = vmul.f32 %v2111_v55, %v4899_v63  ;;  %v2940_v55 = vld [vmem:[#allocation8 + $0x1548] sm:$0xff] }
 0x351   : > { %3755 = vmatprep.subr.mxu0 %v2924_v26  ;;  %3826 = vmatprep.subr.mxu1 %v2988_v38  ;;  %v2962_v26 = vld [vmem:[#allocation8 + $0x15f8] sm:$0xff] }
 0x352   : > { %3756 = vmatpush1.msra.mxu0 %v2923_v48  ;;  %3827 = vmatpush1.msra.mxu1 %v2987_v27  ;;  %v3026_v38 = vld [vmem:[#allocation8 + $0x17f8] sm:$0xff]  ;;  %v2137_v48 = vmul.f32 %v2113_v29, %v4902_v17  ;;  %v2961_v27 = vld [vmem:[#allocation8 + $0x15f0] sm:$0xff]  ;;  %v3003_v29 = vld [vmem:[#allocation8 + $0x1740] sm:$0xff] }
 0x353   : > { %3757 = vmatprep.subr.mxu0 %v2922_v42  ;;  %3828 = vmatprep.subr.mxu1 %v2986_v6  ;;  %v3025_v42 = vld [vmem:[#allocation8 + $0x17f0] sm:$0xff]  ;;  %v2960_v6 = vld [vmem:[#allocation8 + $0x15e8] sm:$0xff] }
 0x354   : > { %3758 = vmatpush1.msra.mxu0 %v2921_v61  ;;  %3829 = vmatpush1.msra.mxu1 %v2985_v32  ;;  %v3024_v61 = vld [vmem:[#allocation8 + $0x17e8] sm:$0xff]  ;;  %v2959_v32 = vld [vmem:[#allocation8 + $0x15e0] sm:$0xff] }
 0x355   : > { %3759 = vmatprep.subr.mxu0 %v2920_v2  ;;  %3830 = vmatprep.subr.mxu1 %v2984_v33  ;;  %v3023_v2 = vld [vmem:[#allocation8 + $0x17e0] sm:$0xff]  ;;  %v2159_v33 = vadd.f32 %v2135_v25, %v4899_v63  ;;  %v2936_v25 = vld [vmem:[#allocation8 + $0x1528] sm:$0xff] }
 0x356   : > { %3760 = vmatpush1.msra.mxu0 %v2919_v11  ;;  %3831 = vmatpush1.msra.mxu1 %v2983_v35  ;;  %v2958_v11 = vld [vmem:[#allocation8 + $0x15d8] sm:$0xff] }
 0x357   : > { %3761 = vmatprep.subr.mxu0 %v2918_v37  ;;  %3832 = vmatprep.subr.mxu1 %v2982_v40  ;;  %v3022_v35 = vld [vmem:[#allocation8 + $0x17d8] sm:$0xff]  ;;  %v2161_v37 = vadd.f32 %v2137_v48, %v4902_v17  ;;  %v2957_v40 = vld [vmem:[#allocation8 + $0x15d0] sm:$0xff]  ;;  %v2183_v4 = vmul.f32 0.7978846, %v2159_v33  ;;  %v2999_v48 = vld [vmem:[#allocation8 + $0x1720] sm:$0xff] }
 0x358   : > { %3762 = vmatpush1.msra.mxu0 %v2917_v45  ;;  %3833 = vmatpush1.msra.mxu1 %v2981_v51  ;;  %v3021_v45 = vld [vmem:[#allocation8 + $0x17d0] sm:$0xff]  ;;  %v2956_v51 = vld [vmem:[#allocation8 + $0x15c8] sm:$0xff] }
 0x359   : > { %3763 = vmatprep.subr.mxu0 %v2916_v52  ;;  %3834 = vmatprep.subr.mxu1 %v2980_v0  ;;  %v3020_v52 = vld [vmem:[#allocation8 + $0x17c8] sm:$0xff]  ;;  %v2955_v0 = vld [vmem:[#allocation8 + $0x15c0] sm:$0xff]  ;;  %v2185_v54 = vmul.f32 0.7978846, %v2161_v37  ;;  %4175 = vtanh.f32 %v2183_v4  ;;  %v3176_v4 = vpop.f32.mrf.mxu1 }
 0x35a   : > { %3764 = vmatpush1.msra.mxu0 %v2915_v22  ;;  %3835 = vmatpush1.msra.mxu1 %v2979_v24  ;;  %v3019_v22 = vld [vmem:[#allocation8 + $0x17c0] sm:$0xff]  ;;  %v2954_v24 = vld [vmem:[#allocation8 + $0x15b8] sm:$0xff]  ;;  %v2932_v33 = vld [vmem:[#allocation8 + $0x1508] sm:$0xff] }
 0x35b   : > { %3765 = vmatprep.subr.mxu0 %v2914_v62  ;;  %3836 = vmatprep.subr.mxu1 %v2978_v39  ;;  %v2953_v62 = vld [vmem:[#allocation8 + $0x15b0] sm:$0xff]  ;;  %4177 = vtanh.f32 %v2185_v54  ;;  %v2995_v37 = vld [vmem:[#allocation8 + $0x1700] sm:$0xff]  ;;  %v3178_v54 = vpop.f32.mrf.mxu1 }
 0x35c   : > { %3766 = vmatpush1.msra.mxu0 %v2913_v31  ;;  %3837 = vmatpush1.msra.mxu1 %v2977_v46  ;;  %v3017_v39 = vld [vmem:[#allocation8 + $0x17b0] sm:$0xff]  ;;  %v2952_v31 = vld [vmem:[#allocation8 + $0x15a8] sm:$0xff] }
 0x35d   : > { %3767 = vmatprep.subr.mxu0 %v2912_v59  ;;  %3838 = vmatprep.subr.mxu1 %v2976_v56  ;;  %v3016_v46 = vld [vmem:[#allocation8 + $0x17a8] sm:$0xff]  ;;  %v2951_v59 = vld [vmem:[#allocation8 + $0x15a0] sm:$0xff] }
 0x35e   : > { %3768 = vmatpush1.msra.mxu0 %v2911_v30  ;;  %3839 = vmatpush1.msra.mxu1 %v2975_v57  ;;  %v3015_v56 = vld [vmem:[#allocation8 + $0x17a0] sm:$0xff]  ;;  %v2950_v30 = vld [vmem:[#allocation8 + $0x1598] sm:$0xff] }
 0x35f   : > { %3769 = vmatprep.subr.mxu0 %v2910_v1  ;;  %3840 = vmatprep.subr.mxu1 %v2974_v14  ;;  %v3014_v57 = vld [vmem:[#allocation8 + $0x1798] sm:$0xff]  ;;  %v2949_v1 = vld [vmem:[#allocation8 + $0x1590] sm:$0xff] }
 0x360   : > { %3770 = vmatpush1.msra.mxu0 %v2909_v19  ;;  %3841 = vmatpush1.msra.mxu1 %v2973_v36  ;;  %v3013_v14 = vld [vmem:[#allocation8 + $0x1790] sm:$0xff]  ;;  %v2948_v19 = vld [vmem:[#allocation8 + $0x1588] sm:$0xff] }
 0x361   : > { %3771 = vmatprep.subr.mxu0 %v2908_v3  ;;  %3842 = vmatprep.subr.mxu1 %v2972_v18  ;;  %v3012_v36 = vld [vmem:[#allocation8 + $0x1788] sm:$0xff]  ;;  %v2947_v3 = vld [vmem:[#allocation8 + $0x1580] sm:$0xff] }
 0x362   : > { %3772 = vmatpush1.msra.mxu0 %v2907_v49  ;;  %3843 = vmatpush1.msra.mxu1 %v2971_v12  ;;  %v3011_v18 = vld [vmem:[#allocation8 + $0x1780] sm:$0xff]  ;;  %v2946_v49 = vld [vmem:[#allocation8 + $0x1578] sm:$0xff] }
 0x363   : > { %3773 = vmatprep.subr.mxu0 %v2906_v28  ;;  %3844 = vmatprep.subr.mxu1 %v2970_v47  ;;  %v3010_v12 = vld [vmem:[#allocation8 + $0x1778] sm:$0xff]  ;;  %v3009_v28 = vld [vmem:[#allocation8 + $0x1770] sm:$0xff]  ;;  %v2944_v47 = vld [vmem:[#allocation8 + $0x1568] sm:$0xff] }
 0x364   : > { %3774 = vmatpush1.msra.mxu0 %v2905_v43  ;;  %3845 = vmatpush1.msra.mxu1 %v2969_v8  ;;  %v2943_v43 = vld [vmem:[#allocation8 + $0x1560] sm:$0xff] }
 0x365   : > { %3775 = vmatprep.subr.mxu0 %v2904_v50  ;;  %3846 = vmatprep.subr.mxu1 %v2968_v9  ;;  %v3007_v8 = vld [vmem:[#allocation8 + $0x1760] sm:$0xff]  ;;  %v2942_v50 = vld [vmem:[#allocation8 + $0x1558] sm:$0xff] }
 0x366   : > { %3776 = vmatpush1.msra.mxu0 %v2903_v10  ;;  %3847 = vmatpush1.msra.mxu1 %v2967_v44  ;;  %v3006_v9 = vld [vmem:[#allocation8 + $0x1758] sm:$0xff]  ;;  %v2941_v10 = vld [vmem:[#allocation8 + $0x1550] sm:$0xff] }
 0x367   : > { %3777 = vmatprep.subr.mxu0 %v2902_v60  ;;  %3848 = vmatprep.subr.mxu1 %v2966_v13  ;;  %v3005_v44 = vld [vmem:[#allocation8 + $0x1750] sm:$0xff]  ;;  %v3004_v60 = vld [vmem:[#allocation8 + $0x1748] sm:$0xff]  ;;  %v2939_v13 = vld [vmem:[#allocation8 + $0x1540] sm:$0xff] }
 0x368   : > { %3778 = vmatpush1.msra.mxu0 %v2901_v15  ;;  %3849 = vmatpush1.msra.mxu1 %v2965_v16  ;;  %v2938_v15 = vld [vmem:[#allocation8 + $0x1538] sm:$0xff] }
 0x369   : > { %3779 = vmatprep.subr.mxu0 %v2900_v20  ;;  %3850 = vmatprep.subr.mxu1 %v2964_v5  ;;  %v3002_v16 = vld [vmem:[#allocation8 + $0x1738] sm:$0xff]  ;;  %v4176_v20 = vpop.eup %4175  ;;  %v2937_v5 = vld [vmem:[#allocation8 + $0x1530] sm:$0xff] }
 0x36a   : > { %3780 = vmatpush1.msra.mxu0 %v2899_v23  ;;  %3851 = vmatpush1.msra.mxu1 %v2963_v34  ;;  %v3001_v23 = vld [vmem:[#allocation8 + $0x1730] sm:$0xff]  ;;  %v4178_v34 = vpop.eup %4177 }
 0x36b   : > { %3781 = vmatprep.subr.mxu0 %v2962_v26  ;;  %3852 = vmatprep.subr.mxu1 %v3026_v38  ;;  %v3000_v26 = vld [vmem:[#allocation8 + $0x1728] sm:$0xff]  ;;  %v2935_v38 = vld [vmem:[#allocation8 + $0x1520] sm:$0xff] }
 0x36c   : > { %3782 = vmatpush2.msra.mxu0 %v2961_v27  ;;  %3853 = vmatpush2.msra.mxu1 %v3025_v42  ;;  %v2934_v27 = vld [vmem:[#allocation8 + $0x1518] sm:$0xff] }
 0x36d   : > { %3783 = vmatprep.subr.mxu0 %v2960_v6  ;;  %3854 = vmatprep.subr.mxu1 %v3024_v61  ;;  %v2998_v42 = vld [vmem:[#allocation8 + $0x1718] sm:$0xff]  ;;  %v2933_v6 = vld [vmem:[#allocation8 + $0x1510] sm:$0xff] }
 0x36e   : > { %3784 = vmatpush2.msra.mxu0 %v2959_v32  ;;  %3855 = vmatpush2.msra.mxu1 %v3023_v2  ;;  %v2997_v61 = vld [vmem:[#allocation8 + $0x1710] sm:$0xff]  ;;  %v2231_v32 = vadd.f32 1.0, %v4176_v20  ;;  %v2233_v2 = vadd.f32 1.0, %v4178_v34 }
 0x36f   : > { %3785 = vmatprep.subr.mxu0 %v2958_v11  ;;  %3856 = vmatprep.subr.mxu1 %v3022_v35  ;;  %v2996_v11 = vld [vmem:[#allocation8 + $0x1708] sm:$0xff]  ;;  %v2931_v35 = vld [vmem:[#allocation8 + $0x1500] sm:$0xff] }
 0x370   : > { %3786 = vmatpush2.msra.mxu0 %v2957_v40  ;;  %3857 = vmatpush2.msra.mxu1 %v3021_v45  ;;  %v2063_v40 = vmul.f32 0.5, %v4899_v63  ;;  %v2065_v45 = vmul.f32 0.5, %v4902_v17 }
 0x371   : > { %3787 = vmatprep.subr.mxu0 %v2956_v51  ;;  %3858 = vmatprep.subr.mxu1 %v3020_v52 }
 0x372   : > { %3788 = vmatpush2.msra.mxu0 %v2955_v0  ;;  %3859 = vmatpush2.msra.mxu1 %v3019_v22  ;;  %v2255_v51 = vmul.f32 %v2231_v32, %v2063_v40  ;;  %v2257_v52 = vmul.f32 %v2233_v2, %v2065_v45  ;;  %v3027_v0 = vld [vmem:[#allocation10] sm:$0x3]  ;;  %v3105_v22 = vpop.f32.mrf.mxu0 }
 0x373   : > { %3789 = vmatprep.subr.mxu0 %v2954_v24  ;;  %3860 = vmatprep.subr.mxu1 %v3018_v41  ;;  %v3032_v24 = vrot.slane %v3027_v0, %v4627_v58  ;;  %v3036_v41 = vrot.slane %v3027_v0, %v4675_v21 }
 0x374   : > { %3790 = vmatpush2.msra.mxu0 %v2953_v62  ;;  %3861 = vmatpush2.msra.mxu1 %v3017_v39  ;;  %v3107_v63 = vpop.f32.mrf.mxu0 }
 0x375   : > { %3791 = vmatprep.subr.mxu0 %v2952_v31  ;;  %3862 = vmatprep.subr.mxu1 %v3016_v46  ;;  %v3106_v62 = vadd.f32 %v3105_v22, %v3032_v24  ;;  %v3108_v39 = vadd.f32 %v3107_v63, %v3036_v41  ;;  %v3318_v46 = vpop.f32.mrf.mxu1 }
 0x376   : > { %3792 = vmatpush2.msra.mxu0 %v2951_v59  ;;  %3863 = vmatpush2.msra.mxu1 %v3015_v56  ;;  %v3247_v17 = vpop.f32.mrf.mxu0 }
 0x377   : > { %3793 = vmatprep.subr.mxu0 %v2950_v30  ;;  %3864 = vmatprep.subr.mxu1 %v3014_v57  ;;  %v3177_v31 = vadd.f32 %v3176_v4, %v3106_v62  ;;  %v3179_v56 = vadd.f32 %v3178_v54, %v3108_v39 }
 0x378   : > { %3794 = vmatpush2.msra.mxu0 %v2949_v1  ;;  %3865 = vmatpush2.msra.mxu1 %v3013_v14  ;;  %v3249_v59 = vpop.f32.mrf.mxu0  ;;  %v3320_v14 = vpop.f32.mrf.mxu1 }
 0x379   : > { %3795 = vmatprep.subr.mxu0 %v2948_v19  ;;  %3866 = vmatprep.subr.mxu1 %v3012_v36  ;;  %v3248_v30 = vadd.f32 %v3247_v17, %v3177_v31  ;;  %v3250_v1 = vadd.f32 %v3249_v59, %v3179_v56 }
 0x37a   : > { %3796 = vmatpush2.msra.mxu0 %v2947_v3  ;;  %3867 = vmatpush2.msra.mxu1 %v3011_v18 }
 0x37b   : > { %3797 = vmatprep.subr.mxu0 %v2946_v49  ;;  %3868 = vmatprep.subr.mxu1 %v3010_v12  ;;  %v3319_v19 = vadd.f32 %v3318_v46, %v3248_v30  ;;  %v3321_v58 = vadd.f32 %v3320_v14, %v3250_v1 }
 0x37c   : > { %3798 = vmatpush2.msra.mxu0 %v2945_v7  ;;  %3869 = vmatpush2.msra.mxu1 %v3009_v28 }
 0x37d   : > { %3799 = vmatprep.subr.mxu0 %v2944_v47  ;;  %3870 = vmatprep.subr.mxu1 %v3008_v53 }
 0x37e   : > { %3800 = vmatpush2.msra.mxu0 %v2943_v43  ;;  %3871 = vmatpush2.msra.mxu1 %v3007_v8 }
 0x37f   : > { %3801 = vmatprep.subr.mxu0 %v2942_v50  ;;  %3872 = vmatprep.subr.mxu1 %v3006_v9 }
 0x380   : > { %3802 = vmatpush2.msra.mxu0 %v2941_v10  ;;  %3873 = vmatpush2.msra.mxu1 %v3005_v44 }
 0x381   : > { %3803 = vmatprep.subr.mxu0 %v2940_v55  ;;  %3874 = vmatprep.subr.mxu1 %v3004_v60 }
 0x382   : > { %3804 = vmatpush2.msra.mxu0 %v2939_v13  ;;  %3875 = vmatpush2.msra.mxu1 %v3003_v29 }
 0x383   : > { %3805 = vmatprep.subr.mxu0 %v2938_v15  ;;  %3876 = vmatprep.subr.mxu1 %v3002_v16 }
 0x384   : > { %3806 = vmatpush2.msra.mxu0 %v2937_v5  ;;  %3877 = vmatpush2.msra.mxu1 %v3001_v23 }
 0x385   : > { %3807 = vmatprep.subr.mxu0 %v2936_v25  ;;  %3878 = vmatprep.subr.mxu1 %v3000_v26  ;;  %v3389_v57 = vpop.f32.mrf.mxu0  ;;  %v3460_v36 = vpop.f32.mrf.mxu1 }
 0x386   : > { %3808 = vmatpush2.msra.mxu0 %v2935_v38  ;;  %3879 = vmatpush2.msra.mxu1 %v2999_v48  ;;  %v3390_v18 = vadd.f32 %v3389_v57, %v3319_v19 }
 0x387   : > { %3809 = vmatprep.subr.mxu0 %v2934_v27  ;;  %3880 = vmatprep.subr.mxu1 %v2998_v42  ;;  %v3391_v3 = vpop.f32.mrf.mxu0  ;;  %v3462_v12 = vpop.f32.mrf.mxu1 }
 0x388   : > { %3810 = vmatpush2.msra.mxu0 %v2933_v6  ;;  %3881 = vmatpush2.msra.mxu1 %v2997_v61  ;;  %v3392_v49 = vadd.f32 %v3391_v3, %v3321_v58  ;;  %v3461_v7 = vadd.f32 %v3460_v36, %v3390_v18 }
 0x389   : > { %3811 = vmatprep.subr.mxu0 %v2932_v33  ;;  %3882 = vmatprep.subr.mxu1 %v2996_v11 }
 0x38a   : > { %3812 = vmatpush2.msra.mxu0 %v2931_v35  ;;  %3883 = vmatpush2.msra.mxu1 %v2995_v37  ;;  %v3463_v53 = vadd.f32 %v3462_v12, %v3392_v49 }
 0x38b   : > { %3814 = vmatmul.mubr.f32.vlgmr.msra.gmra.mxu0 %v2255_v51  ;;  %3885 = vmatmul.mubr.f32.vlgmr.msra.gmra.mxu1 %v2257_v52 }
 0x3c7   : > { %v3531_v21 = vpop.f32.mrf.mxu0  ;;  %v3602_v28 = vpop.f32.mrf.mxu1 }
 0x3c8   : > { %v3532_v43 = vadd.f32 %v3531_v21, %v3461_v7 }
 0x3c9   : > { %v3533_v47 = vpop.f32.mrf.mxu0  ;;  %v3604_v9 = vpop.f32.mrf.mxu1 }
 0x3ca   : > { %v3534_v50 = vadd.f32 %v3533_v47, %v3463_v53  ;;  %v3603_v10 = vadd.f32 %v3602_v28, %v3532_v43 }
 0x3cc   : > { %v3605_v60 = vadd.f32 %v3604_v9, %v3534_v50 }
 0x409   : > { %v3673_v8 = vpop.f32.mrf.mxu0  ;;  %v3744_v44 = vpop.f32.mrf.mxu1 }
 0x40a   : > { %v3674_v13 = vadd.f32 %v3673_v8, %v3603_v10 }
 0x40b   : > { %v3675_v55 = vpop.f32.mrf.mxu0  ;;  %v3746_v15 = vpop.f32.mrf.mxu1 }
 0x40c   : > { %v3676_v29 = vadd.f32 %v3675_v55, %v3605_v60  ;;  %v3745_v16 = vadd.f32 %v3744_v44, %v3674_v13 }
 0x40e   : > { %v3747_v23 = vadd.f32 %v3746_v15, %v3676_v29 }
 0x44b   : > { %v3815_v20 = vpop.f32.mrf.mxu0  ;;  %v3886_v5 = vpop.f32.mrf.mxu1 }
 0x44c   : > { %v3816_v34 = vadd.f32 %v3815_v20, %v3745_v16 }
 0x44d   : > { %v3817_v25 = vpop.f32.mrf.mxu0  ;;  %v3888_v48 = vpop.f32.mrf.mxu1 }
 0x44e   : > { %v3887_v26 = vadd.f32 %v3886_v5, %v3816_v34  ;;  %v3818_v38 = vadd.f32 %v3817_v25, %v3747_v23 }
 0x450   : > { %3891 = vst [vmem:[%s294_s11] sm:$0xff] %v3887_v26  ;;  %v3889_v27 = vadd.f32 %v3888_v48, %v3818_v38 }
 0x452   : > { %3892 = vst [vmem:[%s294_s11 + $0x8] sm:$0xff] %v3889_v27 }
 0x453   : > { %4331 = shalt.err (!%p4328_p11)
}
 0x454   : > { %s4332_s22 = scalar_lea.hbm %s3906_s6, 256  ;;  %s4336_s7 = scalar_lea.hbm %s4958_s5, 512 }
 0x455   : > { %p4333_p13 = scmp.ne.s32.totalorder %s3906_s6, %s4332_s22  ;;  %p4337_p4 = scmp.lt.s32.totalorder %s3906_s6, %s4958_s5 }
 0x456   : > { %p4338_p6 = scmp.lt.s32.totalorder %s4336_s7, %s4332_s22 }
 0x457   : > { %p4334_p1 = pnand %p4333_p13, %p4976_p7 }
 0x458   : > { %p4339_p2 = por %p4338_p6, %p4337_p4 }
 0x459   : > { %p4335_p3 = pneg %p4334_p1 }
 0x45b   : > { %p4340_p8 = pnand %p4339_p2, %p4335_p3 }
 0x45d   : > { %4343 = shalt.err (!%p4340_p8)
}
 0x45e   : > { %4058 = dma.vmem_to_hbm [thread:$0]  (%p4976_p7), %s3909_s23, 256, %s3906_s6, %s3894_s15  }
 0x45f PF: > { %s3920_s25 = sand.u32 1, %s4378_s18   ;;  %p4977_p10 = scmp.ne.s32.totalorder %s4968_s14, 0 }
 0x460   : > { %p4978_p0 = scmp.ge.s32.totalorder %s4390_s21, 2  ;;  %s3921_s11 = scalar_lea.sflag [#allocation4], %s3920_s25 }
 0x462   : > { %p4078_p12 = pnand %p4978_p0, %p4977_p10 }
 0x464   : > { %p4079_p5 = pneg %p4078_p12 }
 0x466   : > { %4373 = dma.done.wait (%p4079_p5), %s3921_s11, 256  }
 0x467   : > { %4375 = vsyncadd (%p4079_p5), %s3921_s11, 4294967040  ;;  %p20_p9 = scmp.ge.s32.totalorder %s4517_s28, 4   ;;  %s4979_s18 = smov %s4382_s19 }
 0x468   : > { %s4980_s19 = smov %s4386_s20  ;;  %s4981_s20 = smov %s4528_s9 }
 0x469   : > { %s4982_s21 = smov %s4517_s28  ;;  %22 = sbr.rel (!%p20_p9) target bundleno = 7 (0x7), region = 101 }
 0x46e   :  { %3926 = vsyncpa [#allocation3], 1 }
 0x46f   :  { %3928 = vsyncpa [#allocation3 + $0x1], 1 }
 0x470   :  { %3929 = vsyncpa [#allocation6], 1 }
 0x471   :  { %3930 = vsyncpa [#allocation9], 1 }
 0x472   :  { %3931 = vsyncpa [#allocation4], 1 }
 0x473   :  { %3933 = vsyncpa [#allocation4 + $0x1], 1 }

</bundles_post_ra>
